<compile_context>
chip_gen: v7x
topology: tpu7x:2x2x1
jax: 0.10.0
libtpu: 0.0.40
codegen_flags: <defaults>
</compile_context>

<pallas_src>
import functools

import jax
import jax.numpy as jnp
from jax.experimental import pallas as pl
from jax.experimental.pallas import tpu as pltpu

NUM_ATOM_TYPE = 119
NUM_CHIRALITY_TAG = 3
NUM_BOND_TYPE = 5          # includes aromatic + self-loop type (=4)
NUM_BOND_DIRECTION = 3
BN_EPS = 1e-5


def _round_up(x, m):
    return (x + m - 1) // m * m


# ------------------------------ fused kernel -------------------------------- #
def fused_gcn_kernel(n_ref, invn_ref, h0_ref, adj_ref,
                     wT_ref, b_ref, gamma_ref, beta_ref, eb_ref,
                     pool_ref, wfT_ref, bf_ref, w1T_ref, b1_ref,
                     w2T_ref, b2_ref,
                     hfeat_ref, out_ref, *, num_layer):
    """Single invocation: all layers + head.

    n_ref/invn_ref: SMEM scalars (valid node count, 1/n).
    h0:   (NP, D)  f32  initial node embeddings (padded rows = 0)
    adj:  (NP, NP) bf16 normalized adjacency (padded rows/cols = 0)
    wT/b/gamma/beta/eb: stacked per-layer params, fully resident in VMEM.
    pool: (GP, NP) bf16 mean-pool matrix; head weights pre-transposed (bf16).
    """
    NP = h0_ref.shape[0]
    n = n_ref[0]
    inv_n = invn_ref[0]

    # Valid-row mask, computed once (hoisted out of the layer loop).
    row_ids = jax.lax.broadcasted_iota(jnp.int32, (NP, 1), 0)
    maskf = (row_ids < n).astype(jnp.float32)

    h = h0_ref[...]                       # (NP, D) f32, padded rows exactly 0

    # Fully unrolled layer loop -> one basic block, static ref indexing.
    for l in range(num_layer):
        # --- GCNConv: node linear transform (MXU, bf16 in / f32 accumulate) --
        h_lin = jnp.dot(h.astype(jnp.bfloat16), wT_ref[l],
                        preferred_element_type=jnp.float32) + b_ref[l]
        # --- message passing: normalized adjacency @ h_lin + edge-emb agg ----
        agg = (jnp.dot(adj_ref[...], h_lin.astype(jnp.bfloat16),
                       preferred_element_type=jnp.float32)
               + eb_ref[l].astype(jnp.float32))

        # --- BatchNorm1d (training-mode batch stats); padded rows masked -----
        mean = jnp.sum(agg * maskf, axis=0, keepdims=True) * inv_n
        cent = agg - mean
        var = jnp.sum(cent * cent * maskf, axis=0, keepdims=True) * inv_n
        hn = cent * jax.lax.rsqrt(var + BN_EPS)
        hn = hn * gamma_ref[l] + beta_ref[l]

        # ReLU on all but the last layer; drop_ratio = 0 -> dropout = identity.
        if l < num_layer - 1:
            hn = jnp.maximum(hn, 0.0)
        h = hn * maskf                    # keep padded rows at exactly zero

    # --- fused head: mean-pool + feat_lin + out MLP (bf16 MXU, f32 acc) ------
    pooled = jnp.dot(pool_ref[...], h.astype(jnp.bfloat16),
                     preferred_element_type=jnp.float32)
    hf = jnp.dot(pooled.astype(jnp.bfloat16), wfT_ref[...],
                 preferred_element_type=jnp.float32) + bf_ref[...]
    hfeat_ref[...] = hf
    z = jnp.maximum(
        jnp.dot(hf.astype(jnp.bfloat16), w1T_ref[...],
                preferred_element_type=jnp.float32) + b1_ref[...], 0.0)
    # Output padded to 128 lanes (lane-dense stores); sliced in the wrapper.
    out_ref[...] = jnp.dot(z.astype(jnp.bfloat16), w2T_ref[...],
                           preferred_element_type=jnp.float32) + b2_ref[...]


# -------------------------------- wrapper ------------------------------------ #
def run_fused_gcn(n_arr, invn_arr, h0, adj, wT_s, b_s, gamma_s, beta_s, eb_s,
                  pool_mat, WfT, bf, W1T, b1, W2T, b2, num_layer):
    GP = pool_mat.shape[0]
    F = WfT.shape[1]
    F2P = W2T.shape[1]

    smem = pl.BlockSpec(memory_space=pltpu.MemorySpace.SMEM)
    vmem = pl.BlockSpec(memory_space=pltpu.MemorySpace.VMEM)

    kern = functools.partial(fused_gcn_kernel, num_layer=num_layer)
    return pl.pallas_call(
        kern,
        out_shape=(jax.ShapeDtypeStruct((GP, F), jnp.float32),
                   jax.ShapeDtypeStruct((GP, F2P), jnp.float32)),
        in_specs=[smem, smem] + [vmem] * 14,
        out_specs=(vmem, vmem),
    )(n_arr, invn_arr, h0, adj, wT_s, b_s, gamma_s, beta_s, eb_s,
      pool_mat, WfT, bf, W1T, b1, W2T, b2)


# ------------------------------- parameters ---------------------------------- #
def linear_init(key, out_dim, in_dim):
    k1, k2 = jax.random.split(key)
    bound = 1.0 / jnp.sqrt(jnp.float32(in_dim))
    W = jax.random.uniform(k1, (out_dim, in_dim), jnp.float32, -bound, bound)
    b = jax.random.uniform(k2, (out_dim,), jnp.float32, -bound, bound)
    return W, b


def xavier_uniform(key, num_emb, dim):
    bound = jnp.sqrt(6.0 / (num_emb + dim))
    return jax.random.uniform(key, (num_emb, dim), jnp.float32, -bound, bound)


def make_params(key, num_layer, emb_dim, feat_dim):
    keys = jax.random.split(key, 8 + 4 * num_layer)
    params = {
        "num_layer": num_layer,
        "emb_dim": emb_dim,
        "x_emb1": xavier_uniform(keys[0], NUM_ATOM_TYPE, emb_dim),
        "x_emb2": xavier_uniform(keys[1], NUM_CHIRALITY_TAG, emb_dim),
        "layers": [],
    }
    for l in range(num_layer):
        kW, ke1, ke2 = keys[2 + 3 * l], keys[3 + 3 * l], keys[4 + 3 * l]
        W, b = linear_init(kW, emb_dim, emb_dim)
        params["layers"].append({
            "W": W, "b": b,
            "edge_emb1": xavier_uniform(ke1, NUM_BOND_TYPE, emb_dim),
            "edge_emb2": xavier_uniform(ke2, NUM_BOND_DIRECTION, emb_dim),
            "gamma": jnp.ones((emb_dim,), jnp.float32),
            "beta": jnp.zeros((emb_dim,), jnp.float32),
        })
    k_off = 2 + 3 * num_layer
    params["Wf"], params["bf"] = linear_init(keys[k_off], feat_dim, emb_dim)
    params["W1"], params["b1"] = linear_init(keys[k_off + 1], feat_dim, feat_dim)
    params["W2"], params["b2"] = linear_init(keys[k_off + 2], feat_dim // 2, feat_dim)
    return params


# --------------------------------- forward ----------------------------------- #
def gcn_forward(params, x, edge_index, edge_attr, batch, num_graphs):
    N = x.shape[0]
    D = params["emb_dim"]
    L = params["num_layer"]
    NP = max(128, _round_up(N, 128))       # lane-dense node padding
    GP = max(8, _round_up(num_graphs, 8))  # sublane-dense graph padding

    # Node embedding (gather glue) -> padded (NP, D), padded rows = 0.
    h0 = params["x_emb1"][x[:, 0]] + params["x_emb2"][x[:, 1]]
    h0 = jnp.zeros((NP, D), jnp.float32).at[:N].set(h0)

    # Self loops (GCNConv.forward semantics).
    sl = jnp.arange(N, dtype=edge_index.dtype)
    ei = jnp.concatenate([edge_index, jnp.stack([sl, sl])], axis=1)
    sl_attr = jnp.concatenate(
        [jnp.full((N, 1), 4, dtype=edge_attr.dtype),
         jnp.zeros((N, 1), dtype=edge_attr.dtype)], axis=1)
    ea = jnp.concatenate([edge_attr, sl_attr], axis=0)

    src, dst = ei[0], ei[1]                      # flow: source_to_target
    deg = jnp.zeros((N,), jnp.float32).at[src].add(1.0)
    dis = jnp.where(deg > 0, jax.lax.rsqrt(jnp.maximum(deg, 1e-12)), 0.0)
    norm = dis[src] * dis[dst]

    # Dense normalized adjacency (padded, bf16 for the MXU).
    adj = jnp.zeros((NP, NP), jnp.float32).at[dst, src].add(norm)
    adj = adj.astype(jnp.bfloat16)

    # All per-layer edge-embedding aggregates precomputed & stacked: (L, NP, D).
    edge_emb = jnp.stack(
        [lp["edge_emb1"][ea[:, 0]] + lp["edge_emb2"][ea[:, 1]]
         for lp in params["layers"]], axis=0)                    # (L, E, D)
    eb = jax.vmap(
        lambda em: jax.ops.segment_sum(norm[:, None] * em, dst,
                                       num_segments=NP))(edge_emb)
    eb = eb.astype(jnp.bfloat16)       # halve the largest streamed block

    # Stacked per-layer weights, pre-transposed (h @ W^T), bf16 for MXU.
    wT_s = jnp.stack([lp["W"].T for lp in params["layers"]]).astype(jnp.bfloat16)
    b_s = jnp.stack([lp["b"].reshape(1, D) for lp in params["layers"]])
    gamma_s = jnp.stack([lp["gamma"].reshape(1, D) for lp in params["layers"]])
    beta_s = jnp.stack([lp["beta"].reshape(1, D) for lp in params["layers"]])

    # global_mean_pool as a padded (GP, NP) averaging matrix (bf16 for MXU).
    onehot = (batch[None, :] == jnp.arange(num_graphs)[:, None]).astype(jnp.float32)
    counts = jnp.sum(onehot, axis=1, keepdims=True)
    pool = onehot / jnp.maximum(counts, 1.0)
    pool_mat = jnp.zeros((GP, NP), jnp.float32).at[:num_graphs, :N].set(pool)
    pool_mat = pool_mat.astype(jnp.bfloat16)

    F = params["Wf"].shape[0]
    F2 = params["W2"].shape[0]
    F2P = max(128, _round_up(F2, 128))   # lane-dense output padding

    WfT = params["Wf"].T.astype(jnp.bfloat16)
    bf = params["bf"].reshape(1, F)
    W1T = params["W1"].T.astype(jnp.bfloat16)
    b1 = params["b1"].reshape(1, F)
    W2T = jnp.zeros((F, F2P), jnp.float32).at[:, :F2].set(
        params["W2"].T).astype(jnp.bfloat16)
    b2 = jnp.zeros((1, F2P), jnp.float32).at[:, :F2].set(
        params["b2"].reshape(1, F2))

    # Valid node count as data (SMEM scalars) -> no recompile per N.
    n_arr = jnp.array([N], jnp.int32)
    invn_arr = jnp.array([1.0 / N], jnp.float32)

    h_feat, out = run_fused_gcn(
        n_arr, invn_arr, h0, adj, wT_s, b_s, gamma_s, beta_s, eb,
        pool_mat, WfT, bf, W1T, b1, W2T, b2, L)
    return h_feat[:num_graphs], out[:num_graphs, :F2]


# ----------------------------------- main ------------------------------------ #
if __name__ == "__main__":
    key = jax.random.PRNGKey(0)
    k_param, k_x0, k_x1, k_src, k_dst, k_e0, k_e1 = jax.random.split(key, 7)

    # Small but module-consistent sizes (lane-friendly emb/feat dims).
    NUM_LAYER, EMB_DIM, FEAT_DIM = 5, 128, 128
    N_NODES, N_EDGES, N_GRAPHS = 16, 24, 2

    params = make_params(k_param, NUM_LAYER, EMB_DIM, FEAT_DIM)

    x = jnp.stack(
        [jax.random.randint(k_x0, (N_NODES,), 0, NUM_ATOM_TYPE),
         jax.random.randint(k_x1, (N_NODES,), 0, NUM_CHIRALITY_TAG)], axis=1)
    edge_index = jnp.stack(
        [jax.random.randint(k_src, (N_EDGES,), 0, N_NODES),
         jax.random.randint(k_dst, (N_EDGES,), 0, N_NODES)], axis=0)
    edge_attr = jnp.stack(
        [jax.random.randint(k_e0, (N_EDGES,), 0, NUM_BOND_TYPE - 1),
         jax.random.randint(k_e1, (N_EDGES,), 0, NUM_BOND_DIRECTION)], axis=1)
    batch = jnp.concatenate(
        [jnp.zeros((N_NODES // 2,), jnp.int32),
         jnp.ones((N_NODES - N_NODES // 2,), jnp.int32)])

    h_feat, out = gcn_forward(params, x, edge_index, edge_attr, batch, N_GRAPHS)
    jax.block_until_ready((h_feat, out))
    assert h_feat.shape == (N_GRAPHS, FEAT_DIM)
    assert out.shape == (N_GRAPHS, FEAT_DIM // 2)
    assert bool(jnp.all(jnp.isfinite(h_feat))) and bool(jnp.all(jnp.isfinite(out)))
    print("KERNEL_OK")
</pallas_src>

<mosaic_0001>
module attributes {stable_mosaic.version = 11 : i64} {
  func.func @fused_gcn_kernel(%arg0: memref<1xi32, #tpu.memory_space<smem>>, %arg1: memref<1xf32, #tpu.memory_space<smem>>, %arg2: memref<128x128xf32, #tpu.memory_space<vmem>>, %arg3: memref<128x128xbf16, #tpu.memory_space<vmem>>, %arg4: memref<5x128x128xbf16, #tpu.memory_space<vmem>>, %arg5: memref<5x1x128xf32, #tpu.memory_space<vmem>>, %arg6: memref<5x1x128xf32, #tpu.memory_space<vmem>>, %arg7: memref<5x1x128xf32, #tpu.memory_space<vmem>>, %arg8: memref<5x128x128xbf16, #tpu.memory_space<vmem>>, %arg9: memref<8x128xbf16, #tpu.memory_space<vmem>>, %arg10: memref<128x128xbf16, #tpu.memory_space<vmem>>, %arg11: memref<1x128xf32, #tpu.memory_space<vmem>>, %arg12: memref<128x128xbf16, #tpu.memory_space<vmem>>, %arg13: memref<1x128xf32, #tpu.memory_space<vmem>>, %arg14: memref<128x128xbf16, #tpu.memory_space<vmem>>, %arg15: memref<1x128xf32, #tpu.memory_space<vmem>>, %arg16: memref<8x128xf32, #tpu.memory_space<vmem>>, %arg17: memref<8x128xf32, #tpu.memory_space<vmem>>) attributes {dimension_semantics = [], scalar_prefetch = 0 : i64, scratch_operands = 0 : i64, tpu.core_type = #tpu.core_type<tc>} {
    %c0 = arith.constant 0 : index
    %0 = memref.load %arg0[%c0] : memref<1xi32, #tpu.memory_space<smem>>
    %c0_0 = arith.constant 0 : index
    %1 = memref.load %arg1[%c0_0] : memref<1xf32, #tpu.memory_space<smem>>
    %2 = tpu.iota {dimensions = array<i32: 0>} : vector<128x1xi32>
    %3 = vector.broadcast %0 : i32 to vector<128x1xi32>
    %4 = arith.cmpi slt, %2, %3 : vector<128x1xi32>
    %5 = arith.extui %4 : vector<128x1xi1> to vector<128x1xi32>
    %6 = arith.sitofp %5 : vector<128x1xi32> to vector<128x1xf32>
    %c0_1 = arith.constant 0 : index
    %c0_2 = arith.constant 0 : index
    %7 = vector.load %arg2[%c0_1, %c0_2] : memref<128x128xf32, #tpu.memory_space<vmem>>, vector<128x128xf32>
    %8 = arith.truncf %7 : vector<128x128xf32> to vector<128x128xbf16>
    %c0_3 = arith.constant 0 : index
    %c0_4 = arith.constant 0 : index
    %c0_5 = arith.constant 0 : index
    %9 = vector.load %arg4[%c0_3, %c0_4, %c0_5] : memref<5x128x128xbf16, #tpu.memory_space<vmem>>, vector<1x128x128xbf16>
    %10 = vector.shape_cast %9 : vector<1x128x128xbf16> to vector<128x128xbf16>
    %cst = arith.constant dense<0.000000e+00> : vector<128x128xf32>
    %11 = tpu.matmul %8, %10, %cst {dimension_numbers = #tpu.dot_dimension_numbers<[1], [0], [0], [1], [0, 0, 1, 1], [], []>} : vector<128x128xbf16>, vector<128x128xbf16>, vector<128x128xf32> -> vector<128x128xf32>
    %c0_6 = arith.constant 0 : index
    %c0_7 = arith.constant 0 : index
    %c0_8 = arith.constant 0 : index
    %12 = vector.load %arg5[%c0_6, %c0_7, %c0_8] : memref<5x1x128xf32, #tpu.memory_space<vmem>>, vector<1x1x128xf32>
    %13 = vector.shape_cast %12 : vector<1x1x128xf32> to vector<1x128xf32>
    %14 = vector.broadcast %13 : vector<1x128xf32> to vector<128x128xf32>
    %15 = arith.addf %11, %14 : vector<128x128xf32>
    %c0_9 = arith.constant 0 : index
    %c0_10 = arith.constant 0 : index
    %16 = vector.load %arg3[%c0_9, %c0_10] : memref<128x128xbf16, #tpu.memory_space<vmem>>, vector<128x128xbf16>
    %17 = arith.truncf %15 : vector<128x128xf32> to vector<128x128xbf16>
    %cst_11 = arith.constant dense<0.000000e+00> : vector<128x128xf32>
    %18 = tpu.matmul %16, %17, %cst_11 {dimension_numbers = #tpu.dot_dimension_numbers<[1], [0], [0], [1], [0, 0, 1, 1], [], []>} : vector<128x128xbf16>, vector<128x128xbf16>, vector<128x128xf32> -> vector<128x128xf32>
    %c0_12 = arith.constant 0 : index
    %c0_13 = arith.constant 0 : index
    %c0_14 = arith.constant 0 : index
    %19 = vector.load %arg8[%c0_12, %c0_13, %c0_14] : memref<5x128x128xbf16, #tpu.memory_space<vmem>>, vector<1x128x128xbf16>
    %20 = vector.shape_cast %19 : vector<1x128x128xbf16> to vector<128x128xbf16>
    %21 = arith.extf %20 : vector<128x128xbf16> to vector<128x128xf32>
    %22 = arith.addf %18, %21 : vector<128x128xf32>
    %23 = vector.broadcast %6 : vector<128x1xf32> to vector<128x128xf32>
    %24 = arith.mulf %22, %23 : vector<128x128xf32>
    %cst_15 = arith.constant dense<0.000000e+00> : vector<128xf32>
    %25 = vector.multi_reduction <add>, %24, %cst_15 [0] : vector<128x128xf32> to vector<128xf32>
    %26 = vector.shape_cast %25 : vector<128xf32> to vector<1x128xf32>
    %27 = vector.broadcast %1 : f32 to vector<1x128xf32>
    %28 = arith.mulf %26, %27 : vector<1x128xf32>
    %29 = vector.broadcast %28 : vector<1x128xf32> to vector<128x128xf32>
    %30 = arith.subf %22, %29 : vector<128x128xf32>
    %31 = arith.mulf %30, %30 : vector<128x128xf32>
    %32 = vector.broadcast %6 : vector<128x1xf32> to vector<128x128xf32>
    %33 = arith.mulf %31, %32 : vector<128x128xf32>
    %cst_16 = arith.constant dense<0.000000e+00> : vector<128xf32>
    %34 = vector.multi_reduction <add>, %33, %cst_16 [0] : vector<128x128xf32> to vector<128xf32>
    %35 = vector.shape_cast %34 : vector<128xf32> to vector<1x128xf32>
    %36 = vector.broadcast %1 : f32 to vector<1x128xf32>
    %37 = arith.mulf %35, %36 : vector<1x128xf32>
    %cst_17 = arith.constant 9.99999974E-6 : f32
    %38 = vector.broadcast %cst_17 : f32 to vector<1x128xf32>
    %39 = arith.addf %37, %38 : vector<1x128xf32>
    %40 = math.rsqrt %39 : vector<1x128xf32>
    %41 = vector.broadcast %40 : vector<1x128xf32> to vector<128x128xf32>
    %42 = arith.mulf %30, %41 : vector<128x128xf32>
    %c0_18 = arith.constant 0 : index
    %c0_19 = arith.constant 0 : index
    %c0_20 = arith.constant 0 : index
    %43 = vector.load %arg6[%c0_18, %c0_19, %c0_20] : memref<5x1x128xf32, #tpu.memory_space<vmem>>, vector<1x1x128xf32>
    %44 = vector.shape_cast %43 : vector<1x1x128xf32> to vector<1x128xf32>
    %45 = vector.broadcast %44 : vector<1x128xf32> to vector<128x128xf32>
    %46 = arith.mulf %42, %45 : vector<128x128xf32>
    %c0_21 = arith.constant 0 : index
    %c0_22 = arith.constant 0 : index
    %c0_23 = arith.constant 0 : index
    %47 = vector.load %arg7[%c0_21, %c0_22, %c0_23] : memref<5x1x128xf32, #tpu.memory_space<vmem>>, vector<1x1x128xf32>
    %48 = vector.shape_cast %47 : vector<1x1x128xf32> to vector<1x128xf32>
    %49 = vector.broadcast %48 : vector<1x128xf32> to vector<128x128xf32>
    %50 = arith.addf %46, %49 : vector<128x128xf32>
    %cst_24 = arith.constant 0.000000e+00 : f32
    %51 = vector.broadcast %cst_24 : f32 to vector<128x128xf32>
    %52 = arith.maximumf %50, %51 : vector<128x128xf32>
    %53 = vector.broadcast %6 : vector<128x1xf32> to vector<128x128xf32>
    %54 = arith.mulf %52, %53 : vector<128x128xf32>
    %55 = arith.truncf %54 : vector<128x128xf32> to vector<128x128xbf16>
    %c1 = arith.constant 1 : index
    %c0_25 = arith.constant 0 : index
    %c0_26 = arith.constant 0 : index
    %56 = vector.load %arg4[%c1, %c0_25, %c0_26] : memref<5x128x128xbf16, #tpu.memory_space<vmem>>, vector<1x128x128xbf16>
    %57 = vector.shape_cast %56 : vector<1x128x128xbf16> to vector<128x128xbf16>
    %cst_27 = arith.constant dense<0.000000e+00> : vector<128x128xf32>
    %58 = tpu.matmul %55, %57, %cst_27 {dimension_numbers = #tpu.dot_dimension_numbers<[1], [0], [0], [1], [0, 0, 1, 1], [], []>} : vector<128x128xbf16>, vector<128x128xbf16>, vector<128x128xf32> -> vector<128x128xf32>
    %c1_28 = arith.constant 1 : index
    %c0_29 = arith.constant 0 : index
    %c0_30 = arith.constant 0 : index
    %59 = vector.load %arg5[%c1_28, %c0_29, %c0_30] : memref<5x1x128xf32, #tpu.memory_space<vmem>>, vector<1x1x128xf32>
    %60 = vector.shape_cast %59 : vector<1x1x128xf32> to vector<1x128xf32>
    %61 = vector.broadcast %60 : vector<1x128xf32> to vector<128x128xf32>
    %62 = arith.addf %58, %61 : vector<128x128xf32>
    %c0_31 = arith.constant 0 : index
    %c0_32 = arith.constant 0 : index
    %63 = vector.load %arg3[%c0_31, %c0_32] : memref<128x128xbf16, #tpu.memory_space<vmem>>, vector<128x128xbf16>
    %64 = arith.truncf %62 : vector<128x128xf32> to vector<128x128xbf16>
    %cst_33 = arith.constant dense<0.000000e+00> : vector<128x128xf32>
    %65 = tpu.matmul %63, %64, %cst_33 {dimension_numbers = #tpu.dot_dimension_numbers<[1], [0], [0], [1], [0, 0, 1, 1], [], []>} : vector<128x128xbf16>, vector<128x128xbf16>, vector<128x128xf32> -> vector<128x128xf32>
    %c1_34 = arith.constant 1 : index
    %c0_35 = arith.constant 0 : index
    %c0_36 = arith.constant 0 : index
    %66 = vector.load %arg8[%c1_34, %c0_35, %c0_36] : memref<5x128x128xbf16, #tpu.memory_space<vmem>>, vector<1x128x128xbf16>
    %67 = vector.shape_cast %66 : vector<1x128x128xbf16> to vector<128x128xbf16>
    %68 = arith.extf %67 : vector<128x128xbf16> to vector<128x128xf32>
    %69 = arith.addf %65, %68 : vector<128x128xf32>
    %70 = vector.broadcast %6 : vector<128x1xf32> to vector<128x128xf32>
    %71 = arith.mulf %69, %70 : vector<128x128xf32>
    %cst_37 = arith.constant dense<0.000000e+00> : vector<128xf32>
    %72 = vector.multi_reduction <add>, %71, %cst_37 [0] : vector<128x128xf32> to vector<128xf32>
    %73 = vector.shape_cast %72 : vector<128xf32> to vector<1x128xf32>
    %74 = vector.broadcast %1 : f32 to vector<1x128xf32>
    %75 = arith.mulf %73, %74 : vector<1x128xf32>
    %76 = vector.broadcast %75 : vector<1x128xf32> to vector<128x128xf32>
    %77 = arith.subf %69, %76 : vector<128x128xf32>
    %78 = arith.mulf %77, %77 : vector<128x128xf32>
    %79 = vector.broadcast %6 : vector<128x1xf32> to vector<128x128xf32>
    %80 = arith.mulf %78, %79 : vector<128x128xf32>
    %cst_38 = arith.constant dense<0.000000e+00> : vector<128xf32>
    %81 = vector.multi_reduction <add>, %80, %cst_38 [0] : vector<128x128xf32> to vector<128xf32>
    %82 = vector.shape_cast %81 : vector<128xf32> to vector<1x128xf32>
    %83 = vector.broadcast %1 : f32 to vector<1x128xf32>
    %84 = arith.mulf %82, %83 : vector<1x128xf32>
    %cst_39 = arith.constant 9.99999974E-6 : f32
    %85 = vector.broadcast %cst_39 : f32 to vector<1x128xf32>
    %86 = arith.addf %84, %85 : vector<1x128xf32>
    %87 = math.rsqrt %86 : vector<1x128xf32>
    %88 = vector.broadcast %87 : vector<1x128xf32> to vector<128x128xf32>
    %89 = arith.mulf %77, %88 : vector<128x128xf32>
    %c1_40 = arith.constant 1 : index
    %c0_41 = arith.constant 0 : index
    %c0_42 = arith.constant 0 : index
    %90 = vector.load %arg6[%c1_40, %c0_41, %c0_42] : memref<5x1x128xf32, #tpu.memory_space<vmem>>, vector<1x1x128xf32>
    %91 = vector.shape_cast %90 : vector<1x1x128xf32> to vector<1x128xf32>
    %92 = vector.broadcast %91 : vector<1x128xf32> to vector<128x128xf32>
    %93 = arith.mulf %89, %92 : vector<128x128xf32>
    %c1_43 = arith.constant 1 : index
    %c0_44 = arith.constant 0 : index
    %c0_45 = arith.constant 0 : index
    %94 = vector.load %arg7[%c1_43, %c0_44, %c0_45] : memref<5x1x128xf32, #tpu.memory_space<vmem>>, vector<1x1x128xf32>
    %95 = vector.shape_cast %94 : vector<1x1x128xf32> to vector<1x128xf32>
    %96 = vector.broadcast %95 : vector<1x128xf32> to vector<128x128xf32>
    %97 = arith.addf %93, %96 : vector<128x128xf32>
    %cst_46 = arith.constant 0.000000e+00 : f32
    %98 = vector.broadcast %cst_46 : f32 to vector<128x128xf32>
    %99 = arith.maximumf %97, %98 : vector<128x128xf32>
    %100 = vector.broadcast %6 : vector<128x1xf32> to vector<128x128xf32>
    %101 = arith.mulf %99, %100 : vector<128x128xf32>
    %102 = arith.truncf %101 : vector<128x128xf32> to vector<128x128xbf16>
    %c2 = arith.constant 2 : index
    %c0_47 = arith.constant 0 : index
    %c0_48 = arith.constant 0 : index
    %103 = vector.load %arg4[%c2, %c0_47, %c0_48] : memref<5x128x128xbf16, #tpu.memory_space<vmem>>, vector<1x128x128xbf16>
    %104 = vector.shape_cast %103 : vector<1x128x128xbf16> to vector<128x128xbf16>
    %cst_49 = arith.constant dense<0.000000e+00> : vector<128x128xf32>
    %105 = tpu.matmul %102, %104, %cst_49 {dimension_numbers = #tpu.dot_dimension_numbers<[1], [0], [0], [1], [0, 0, 1, 1], [], []>} : vector<128x128xbf16>, vector<128x128xbf16>, vector<128x128xf32> -> vector<128x128xf32>
    %c2_50 = arith.constant 2 : index
    %c0_51 = arith.constant 0 : index
    %c0_52 = arith.constant 0 : index
    %106 = vector.load %arg5[%c2_50, %c0_51, %c0_52] : memref<5x1x128xf32, #tpu.memory_space<vmem>>, vector<1x1x128xf32>
    %107 = vector.shape_cast %106 : vector<1x1x128xf32> to vector<1x128xf32>
    %108 = vector.broadcast %107 : vector<1x128xf32> to vector<128x128xf32>
    %109 = arith.addf %105, %108 : vector<128x128xf32>
    %c0_53 = arith.constant 0 : index
    %c0_54 = arith.constant 0 : index
    %110 = vector.load %arg3[%c0_53, %c0_54] : memref<128x128xbf16, #tpu.memory_space<vmem>>, vector<128x128xbf16>
    %111 = arith.truncf %109 : vector<128x128xf32> to vector<128x128xbf16>
    %cst_55 = arith.constant dense<0.000000e+00> : vector<128x128xf32>
    %112 = tpu.matmul %110, %111, %cst_55 {dimension_numbers = #tpu.dot_dimension_numbers<[1], [0], [0], [1], [0, 0, 1, 1], [], []>} : vector<128x128xbf16>, vector<128x128xbf16>, vector<128x128xf32> -> vector<128x128xf32>
    %c2_56 = arith.constant 2 : index
    %c0_57 = arith.constant 0 : index
    %c0_58 = arith.constant 0 : index
    %113 = vector.load %arg8[%c2_56, %c0_57, %c0_58] : memref<5x128x128xbf16, #tpu.memory_space<vmem>>, vector<1x128x128xbf16>
    %114 = vector.shape_cast %113 : vector<1x128x128xbf16> to vector<128x128xbf16>
    %115 = arith.extf %114 : vector<128x128xbf16> to vector<128x128xf32>
    %116 = arith.addf %112, %115 : vector<128x128xf32>
    %117 = vector.broadcast %6 : vector<128x1xf32> to vector<128x128xf32>
    %118 = arith.mulf %116, %117 : vector<128x128xf32>
    %cst_59 = arith.constant dense<0.000000e+00> : vector<128xf32>
    %119 = vector.multi_reduction <add>, %118, %cst_59 [0] : vector<128x128xf32> to vector<128xf32>
    %120 = vector.shape_cast %119 : vector<128xf32> to vector<1x128xf32>
    %121 = vector.broadcast %1 : f32 to vector<1x128xf32>
    %122 = arith.mulf %120, %121 : vector<1x128xf32>
    %123 = vector.broadcast %122 : vector<1x128xf32> to vector<128x128xf32>
    %124 = arith.subf %116, %123 : vector<128x128xf32>
    %125 = arith.mulf %124, %124 : vector<128x128xf32>
    %126 = vector.broadcast %6 : vector<128x1xf32> to vector<128x128xf32>
    %127 = arith.mulf %125, %126 : vector<128x128xf32>
    %cst_60 = arith.constant dense<0.000000e+00> : vector<128xf32>
    %128 = vector.multi_reduction <add>, %127, %cst_60 [0] : vector<128x128xf32> to vector<128xf32>
    %129 = vector.shape_cast %128 : vector<128xf32> to vector<1x128xf32>
    %130 = vector.broadcast %1 : f32 to vector<1x128xf32>
    %131 = arith.mulf %129, %130 : vector<1x128xf32>
    %cst_61 = arith.constant 9.99999974E-6 : f32
    %132 = vector.broadcast %cst_61 : f32 to vector<1x128xf32>
    %133 = arith.addf %131, %132 : vector<1x128xf32>
    %134 = math.rsqrt %133 : vector<1x128xf32>
    %135 = vector.broadcast %134 : vector<1x128xf32> to vector<128x128xf32>
    %136 = arith.mulf %124, %135 : vector<128x128xf32>
    %c2_62 = arith.constant 2 : index
    %c0_63 = arith.constant 0 : index
    %c0_64 = arith.constant 0 : index
    %137 = vector.load %arg6[%c2_62, %c0_63, %c0_64] : memref<5x1x128xf32, #tpu.memory_space<vmem>>, vector<1x1x128xf32>
    %138 = vector.shape_cast %137 : vector<1x1x128xf32> to vector<1x128xf32>
    %139 = vector.broadcast %138 : vector<1x128xf32> to vector<128x128xf32>
    %140 = arith.mulf %136, %139 : vector<128x128xf32>
    %c2_65 = arith.constant 2 : index
    %c0_66 = arith.constant 0 : index
    %c0_67 = arith.constant 0 : index
    %141 = vector.load %arg7[%c2_65, %c0_66, %c0_67] : memref<5x1x128xf32, #tpu.memory_space<vmem>>, vector<1x1x128xf32>
    %142 = vector.shape_cast %141 : vector<1x1x128xf32> to vector<1x128xf32>
    %143 = vector.broadcast %142 : vector<1x128xf32> to vector<128x128xf32>
    %144 = arith.addf %140, %143 : vector<128x128xf32>
    %cst_68 = arith.constant 0.000000e+00 : f32
    %145 = vector.broadcast %cst_68 : f32 to vector<128x128xf32>
    %146 = arith.maximumf %144, %145 : vector<128x128xf32>
    %147 = vector.broadcast %6 : vector<128x1xf32> to vector<128x128xf32>
    %148 = arith.mulf %146, %147 : vector<128x128xf32>
    %149 = arith.truncf %148 : vector<128x128xf32> to vector<128x128xbf16>
    %c3 = arith.constant 3 : index
    %c0_69 = arith.constant 0 : index
    %c0_70 = arith.constant 0 : index
    %150 = vector.load %arg4[%c3, %c0_69, %c0_70] : memref<5x128x128xbf16, #tpu.memory_space<vmem>>, vector<1x128x128xbf16>
    %151 = vector.shape_cast %150 : vector<1x128x128xbf16> to vector<128x128xbf16>
    %cst_71 = arith.constant dense<0.000000e+00> : vector<128x128xf32>
    %152 = tpu.matmul %149, %151, %cst_71 {dimension_numbers = #tpu.dot_dimension_numbers<[1], [0], [0], [1], [0, 0, 1, 1], [], []>} : vector<128x128xbf16>, vector<128x128xbf16>, vector<128x128xf32> -> vector<128x128xf32>
    %c3_72 = arith.constant 3 : index
    %c0_73 = arith.constant 0 : index
    %c0_74 = arith.constant 0 : index
    %153 = vector.load %arg5[%c3_72, %c0_73, %c0_74] : memref<5x1x128xf32, #tpu.memory_space<vmem>>, vector<1x1x128xf32>
    %154 = vector.shape_cast %153 : vector<1x1x128xf32> to vector<1x128xf32>
    %155 = vector.broadcast %154 : vector<1x128xf32> to vector<128x128xf32>
    %156 = arith.addf %152, %155 : vector<128x128xf32>
    %c0_75 = arith.constant 0 : index
    %c0_76 = arith.constant 0 : index
    %157 = vector.load %arg3[%c0_75, %c0_76] : memref<128x128xbf16, #tpu.memory_space<vmem>>, vector<128x128xbf16>
    %158 = arith.truncf %156 : vector<128x128xf32> to vector<128x128xbf16>
    %cst_77 = arith.constant dense<0.000000e+00> : vector<128x128xf32>
    %159 = tpu.matmul %157, %158, %cst_77 {dimension_numbers = #tpu.dot_dimension_numbers<[1], [0], [0], [1], [0, 0, 1, 1], [], []>} : vector<128x128xbf16>, vector<128x128xbf16>, vector<128x128xf32> -> vector<128x128xf32>
    %c3_78 = arith.constant 3 : index
    %c0_79 = arith.constant 0 : index
    %c0_80 = arith.constant 0 : index
    %160 = vector.load %arg8[%c3_78, %c0_79, %c0_80] : memref<5x128x128xbf16, #tpu.memory_space<vmem>>, vector<1x128x128xbf16>
    %161 = vector.shape_cast %160 : vector<1x128x128xbf16> to vector<128x128xbf16>
    %162 = arith.extf %161 : vector<128x128xbf16> to vector<128x128xf32>
    %163 = arith.addf %159, %162 : vector<128x128xf32>
    %164 = vector.broadcast %6 : vector<128x1xf32> to vector<128x128xf32>
    %165 = arith.mulf %163, %164 : vector<128x128xf32>
    %cst_81 = arith.constant dense<0.000000e+00> : vector<128xf32>
    %166 = vector.multi_reduction <add>, %165, %cst_81 [0] : vector<128x128xf32> to vector<128xf32>
    %167 = vector.shape_cast %166 : vector<128xf32> to vector<1x128xf32>
    %168 = vector.broadcast %1 : f32 to vector<1x128xf32>
    %169 = arith.mulf %167, %168 : vector<1x128xf32>
    %170 = vector.broadcast %169 : vector<1x128xf32> to vector<128x128xf32>
    %171 = arith.subf %163, %170 : vector<128x128xf32>
    %172 = arith.mulf %171, %171 : vector<128x128xf32>
    %173 = vector.broadcast %6 : vector<128x1xf32> to vector<128x128xf32>
    %174 = arith.mulf %172, %173 : vector<128x128xf32>
    %cst_82 = arith.constant dense<0.000000e+00> : vector<128xf32>
    %175 = vector.multi_reduction <add>, %174, %cst_82 [0] : vector<128x128xf32> to vector<128xf32>
    %176 = vector.shape_cast %175 : vector<128xf32> to vector<1x128xf32>
    %177 = vector.broadcast %1 : f32 to vector<1x128xf32>
    %178 = arith.mulf %176, %177 : vector<1x128xf32>
    %cst_83 = arith.constant 9.99999974E-6 : f32
    %179 = vector.broadcast %cst_83 : f32 to vector<1x128xf32>
    %180 = arith.addf %178, %179 : vector<1x128xf32>
    %181 = math.rsqrt %180 : vector<1x128xf32>
    %182 = vector.broadcast %181 : vector<1x128xf32> to vector<128x128xf32>
    %183 = arith.mulf %171, %182 : vector<128x128xf32>
    %c3_84 = arith.constant 3 : index
    %c0_85 = arith.constant 0 : index
    %c0_86 = arith.constant 0 : index
    %184 = vector.load %arg6[%c3_84, %c0_85, %c0_86] : memref<5x1x128xf32, #tpu.memory_space<vmem>>, vector<1x1x128xf32>
    %185 = vector.shape_cast %184 : vector<1x1x128xf32> to vector<1x128xf32>
    %186 = vector.broadcast %185 : vector<1x128xf32> to vector<128x128xf32>
    %187 = arith.mulf %183, %186 : vector<128x128xf32>
    %c3_87 = arith.constant 3 : index
    %c0_88 = arith.constant 0 : index
    %c0_89 = arith.constant 0 : index
    %188 = vector.load %arg7[%c3_87, %c0_88, %c0_89] : memref<5x1x128xf32, #tpu.memory_space<vmem>>, vector<1x1x128xf32>
    %189 = vector.shape_cast %188 : vector<1x1x128xf32> to vector<1x128xf32>
    %190 = vector.broadcast %189 : vector<1x128xf32> to vector<128x128xf32>
    %191 = arith.addf %187, %190 : vector<128x128xf32>
    %cst_90 = arith.constant 0.000000e+00 : f32
    %192 = vector.broadcast %cst_90 : f32 to vector<128x128xf32>
    %193 = arith.maximumf %191, %192 : vector<128x128xf32>
    %194 = vector.broadcast %6 : vector<128x1xf32> to vector<128x128xf32>
    %195 = arith.mulf %193, %194 : vector<128x128xf32>
    %196 = arith.truncf %195 : vector<128x128xf32> to vector<128x128xbf16>
    %c4 = arith.constant 4 : index
    %c0_91 = arith.constant 0 : index
    %c0_92 = arith.constant 0 : index
    %197 = vector.load %arg4[%c4, %c0_91, %c0_92] : memref<5x128x128xbf16, #tpu.memory_space<vmem>>, vector<1x128x128xbf16>
    %198 = vector.shape_cast %197 : vector<1x128x128xbf16> to vector<128x128xbf16>
    %cst_93 = arith.constant dense<0.000000e+00> : vector<128x128xf32>
    %199 = tpu.matmul %196, %198, %cst_93 {dimension_numbers = #tpu.dot_dimension_numbers<[1], [0], [0], [1], [0, 0, 1, 1], [], []>} : vector<128x128xbf16>, vector<128x128xbf16>, vector<128x128xf32> -> vector<128x128xf32>
    %c4_94 = arith.constant 4 : index
    %c0_95 = arith.constant 0 : index
    %c0_96 = arith.constant 0 : index
    %200 = vector.load %arg5[%c4_94, %c0_95, %c0_96] : memref<5x1x128xf32, #tpu.memory_space<vmem>>, vector<1x1x128xf32>
    %201 = vector.shape_cast %200 : vector<1x1x128xf32> to vector<1x128xf32>
    %202 = vector.broadcast %201 : vector<1x128xf32> to vector<128x128xf32>
    %203 = arith.addf %199, %202 : vector<128x128xf32>
    %c0_97 = arith.constant 0 : index
    %c0_98 = arith.constant 0 : index
    %204 = vector.load %arg3[%c0_97, %c0_98] : memref<128x128xbf16, #tpu.memory_space<vmem>>, vector<128x128xbf16>
    %205 = arith.truncf %203 : vector<128x128xf32> to vector<128x128xbf16>
    %cst_99 = arith.constant dense<0.000000e+00> : vector<128x128xf32>
    %206 = tpu.matmul %204, %205, %cst_99 {dimension_numbers = #tpu.dot_dimension_numbers<[1], [0], [0], [1], [0, 0, 1, 1], [], []>} : vector<128x128xbf16>, vector<128x128xbf16>, vector<128x128xf32> -> vector<128x128xf32>
    %c4_100 = arith.constant 4 : index
    %c0_101 = arith.constant 0 : index
    %c0_102 = arith.constant 0 : index
    %207 = vector.load %arg8[%c4_100, %c0_101, %c0_102] : memref<5x128x128xbf16, #tpu.memory_space<vmem>>, vector<1x128x128xbf16>
    %208 = vector.shape_cast %207 : vector<1x128x128xbf16> to vector<128x128xbf16>
    %209 = arith.extf %208 : vector<128x128xbf16> to vector<128x128xf32>
    %210 = arith.addf %206, %209 : vector<128x128xf32>
    %211 = vector.broadcast %6 : vector<128x1xf32> to vector<128x128xf32>
    %212 = arith.mulf %210, %211 : vector<128x128xf32>
    %cst_103 = arith.constant dense<0.000000e+00> : vector<128xf32>
    %213 = vector.multi_reduction <add>, %212, %cst_103 [0] : vector<128x128xf32> to vector<128xf32>
    %214 = vector.shape_cast %213 : vector<128xf32> to vector<1x128xf32>
    %215 = vector.broadcast %1 : f32 to vector<1x128xf32>
    %216 = arith.mulf %214, %215 : vector<1x128xf32>
    %217 = vector.broadcast %216 : vector<1x128xf32> to vector<128x128xf32>
    %218 = arith.subf %210, %217 : vector<128x128xf32>
    %219 = arith.mulf %218, %218 : vector<128x128xf32>
    %220 = vector.broadcast %6 : vector<128x1xf32> to vector<128x128xf32>
    %221 = arith.mulf %219, %220 : vector<128x128xf32>
    %cst_104 = arith.constant dense<0.000000e+00> : vector<128xf32>
    %222 = vector.multi_reduction <add>, %221, %cst_104 [0] : vector<128x128xf32> to vector<128xf32>
    %223 = vector.shape_cast %222 : vector<128xf32> to vector<1x128xf32>
    %224 = vector.broadcast %1 : f32 to vector<1x128xf32>
    %225 = arith.mulf %223, %224 : vector<1x128xf32>
    %cst_105 = arith.constant 9.99999974E-6 : f32
    %226 = vector.broadcast %cst_105 : f32 to vector<1x128xf32>
    %227 = arith.addf %225, %226 : vector<1x128xf32>
    %228 = math.rsqrt %227 : vector<1x128xf32>
    %229 = vector.broadcast %228 : vector<1x128xf32> to vector<128x128xf32>
    %230 = arith.mulf %218, %229 : vector<128x128xf32>
    %c4_106 = arith.constant 4 : index
    %c0_107 = arith.constant 0 : index
    %c0_108 = arith.constant 0 : index
    %231 = vector.load %arg6[%c4_106, %c0_107, %c0_108] : memref<5x1x128xf32, #tpu.memory_space<vmem>>, vector<1x1x128xf32>
    %232 = vector.shape_cast %231 : vector<1x1x128xf32> to vector<1x128xf32>
    %233 = vector.broadcast %232 : vector<1x128xf32> to vector<128x128xf32>
    %234 = arith.mulf %230, %233 : vector<128x128xf32>
    %c4_109 = arith.constant 4 : index
    %c0_110 = arith.constant 0 : index
    %c0_111 = arith.constant 0 : index
    %235 = vector.load %arg7[%c4_109, %c0_110, %c0_111] : memref<5x1x128xf32, #tpu.memory_space<vmem>>, vector<1x1x128xf32>
    %236 = vector.shape_cast %235 : vector<1x1x128xf32> to vector<1x128xf32>
    %237 = vector.broadcast %236 : vector<1x128xf32> to vector<128x128xf32>
    %238 = arith.addf %234, %237 : vector<128x128xf32>
    %239 = vector.broadcast %6 : vector<128x1xf32> to vector<128x128xf32>
    %240 = arith.mulf %238, %239 : vector<128x128xf32>
    %c0_112 = arith.constant 0 : index
    %c0_113 = arith.constant 0 : index
    %241 = vector.load %arg9[%c0_112, %c0_113] : memref<8x128xbf16, #tpu.memory_space<vmem>>, vector<8x128xbf16>
    %242 = arith.truncf %240 : vector<128x128xf32> to vector<128x128xbf16>
    %cst_114 = arith.constant dense<0.000000e+00> : vector<8x128xf32>
    %243 = tpu.matmul %241, %242, %cst_114 {dimension_numbers = #tpu.dot_dimension_numbers<[1], [0], [0], [1], [0, 0, 1, 1], [], []>} : vector<8x128xbf16>, vector<128x128xbf16>, vector<8x128xf32> -> vector<8x128xf32>
    %244 = arith.truncf %243 : vector<8x128xf32> to vector<8x128xbf16>
    %c0_115 = arith.constant 0 : index
    %c0_116 = arith.constant 0 : index
    %245 = vector.load %arg10[%c0_115, %c0_116] : memref<128x128xbf16, #tpu.memory_space<vmem>>, vector<128x128xbf16>
    %cst_117 = arith.constant dense<0.000000e+00> : vector<8x128xf32>
    %246 = tpu.matmul %244, %245, %cst_117 {dimension_numbers = #tpu.dot_dimension_numbers<[1], [0], [0], [1], [0, 0, 1, 1], [], []>} : vector<8x128xbf16>, vector<128x128xbf16>, vector<8x128xf32> -> vector<8x128xf32>
    %c0_118 = arith.constant 0 : index
    %c0_119 = arith.constant 0 : index
    %247 = vector.load %arg11[%c0_118, %c0_119] : memref<1x128xf32, #tpu.memory_space<vmem>>, vector<1x128xf32>
    %248 = vector.broadcast %247 : vector<1x128xf32> to vector<8x128xf32>
    %249 = arith.addf %246, %248 : vector<8x128xf32>
    %c0_120 = arith.constant 0 : index
    %c0_121 = arith.constant 0 : index
    %250 = vector.load %arg16[%c0_120, %c0_121] : memref<8x128xf32, #tpu.memory_space<vmem>>, vector<8x128xf32>
    tpu.vector_store %arg16[%c0_120, %c0_121], %249 {strides = array<i32>} : memref<8x128xf32, #tpu.memory_space<vmem>>, vector<8x128xf32>,
    %251 = arith.truncf %249 : vector<8x128xf32> to vector<8x128xbf16>
    %c0_122 = arith.constant 0 : index
    %c0_123 = arith.constant 0 : index
    %252 = vector.load %arg12[%c0_122, %c0_123] : memref<128x128xbf16, #tpu.memory_space<vmem>>, vector<128x128xbf16>
    %cst_124 = arith.constant dense<0.000000e+00> : vector<8x128xf32>
    %253 = tpu.matmul %251, %252, %cst_124 {dimension_numbers = #tpu.dot_dimension_numbers<[1], [0], [0], [1], [0, 0, 1, 1], [], []>} : vector<8x128xbf16>, vector<128x128xbf16>, vector<8x128xf32> -> vector<8x128xf32>
    %c0_125 = arith.constant 0 : index
    %c0_126 = arith.constant 0 : index
    %254 = vector.load %arg13[%c0_125, %c0_126] : memref<1x128xf32, #tpu.memory_space<vmem>>, vector<1x128xf32>
    %255 = vector.broadcast %254 : vector<1x128xf32> to vector<8x128xf32>
    %256 = arith.addf %253, %255 : vector<8x128xf32>
    %cst_127 = arith.constant 0.000000e+00 : f32
    %257 = vector.broadcast %cst_127 : f32 to vector<8x128xf32>
    %258 = arith.maximumf %256, %257 : vector<8x128xf32>
    %259 = arith.truncf %258 : vector<8x128xf32> to vector<8x128xbf16>
    %c0_128 = arith.constant 0 : index
    %c0_129 = arith.constant 0 : index
    %260 = vector.load %arg14[%c0_128, %c0_129] : memref<128x128xbf16, #tpu.memory_space<vmem>>, vector<128x128xbf16>
    %cst_130 = arith.constant dense<0.000000e+00> : vector<8x128xf32>
    %261 = tpu.matmul %259, %260, %cst_130 {dimension_numbers = #tpu.dot_dimension_numbers<[1], [0], [0], [1], [0, 0, 1, 1], [], []>} : vector<8x128xbf16>, vector<128x128xbf16>, vector<8x128xf32> -> vector<8x128xf32>
    %c0_131 = arith.constant 0 : index
    %c0_132 = arith.constant 0 : index
    %262 = vector.load %arg15[%c0_131, %c0_132] : memref<1x128xf32, #tpu.memory_space<vmem>>, vector<1x128xf32>
    %263 = vector.broadcast %262 : vector<1x128xf32> to vector<8x128xf32>
    %264 = arith.addf %261, %263 : vector<8x128xf32>
    %c0_133 = arith.constant 0 : index
    %c0_134 = arith.constant 0 : index
    %265 = vector.load %arg17[%c0_133, %c0_134] : memref<8x128xf32, #tpu.memory_space<vmem>>, vector<8x128xf32>
    tpu.vector_store %arg17[%c0_133, %c0_134], %264 {strides = array<i32>} : memref<8x128xf32, #tpu.memory_space<vmem>>, vector<8x128xf32>,
    return
  }
}

</mosaic_0001>

<bundles_post_ra>
// kernel: tpu_custom_call.1
= control target key start
LH: loop header
LB: loop body
LE: loop exit
PB: predicated region body
PF: predicated region fallthrough
CT: control target
= control target key end

     0   :  { %s6112_s0 = inlined_call_operand.<no memory space> [shape: s32[1], index: 0, kind: input, shape index: {}]   ;;  %s6113_s1 = inlined_call_operand.<no memory space> [shape: f32[1], index: 1, kind: input, shape index: {}]   ;;  %s6114_s2 = inlined_call_operand.hbm [shape: f32[128,128], index: 2, kind: input, shape index: {}]   ;;  %s6115_s3 = inlined_call_operand.hbm [shape: bf16[128,128], index: 3, kind: input, shape index: {}]   ;;  %s6116_s4 = inlined_call_operand.hbm [shape: bf16[5,128,128], index: 4, kind: input, shape index: {}]   ;;  %s6117_s5 = inlined_call_operand.vmem [shape: f32[5,1,128], index: 5, kind: input, shape index: {}]   ;;  %s6118_s6 = inlined_call_operand.vmem [shape: f32[5,1,128], index: 6, kind: input, shape index: {}]   ;;  %s6119_s7 = inlined_call_operand.vmem [shape: f32[5,1,128], index: 7, kind: input, shape index: {}]   ;;  %s6120_s8 = inlined_call_operand.hbm [shape: bf16[5,128,128], index: 8, kind: input, shape index: {}]   ;;  %s6121_s9 = inlined_call_operand.vmem [shape: bf16[8,128], index: 9, kind: input, shape index: {}]   ;;  %s6122_s10 = inlined_call_operand.hbm [shape: bf16[128,128], index: 10, kind: input, shape index: {}]   ;;  %s6123_s11 = inlined_call_operand.vmem [shape: f32[1,128], index: 11, kind: input, shape index: {}]   ;;  %s6124_s12 = inlined_call_operand.hbm [shape: bf16[128,128], index: 12, kind: input, shape index: {}]   ;;  %s6125_s13 = inlined_call_operand.vmem [shape: f32[1,128], index: 13, kind: input, shape index: {}]   ;;  %s6126_s14 = inlined_call_operand.hbm [shape: bf16[128,128], index: 14, kind: input, shape index: {}]   ;;  %s6127_s15 = inlined_call_operand.vmem [shape: f32[1,128], index: 15, kind: input, shape index: {}]   ;;  %s6128_s16 = inlined_call_operand.hbm [shape: f32[8,128], index: 16, kind: output, shape index: {0}]   ;;  %s6129_s17 = inlined_call_operand.hbm [shape: f32[8,128], index: 17, kind: output, shape index: {1}]  }
   0x1   :  { %6131 = sst [smem:[#allocation25_spill]] %s6112_s0 }
   0x2   :  { %6132 = sst [smem:[#allocation26_spill]] %s6113_s1 }
   0x3   :  { %6133 = sst [smem:[#allocation27_spill]] %s6129_s17 }
   0x4   :  { %25 = vsyncpa [#allocation5], 0 }
   0x5   :  { %26 = vsyncpa [#allocation8], 0 }
   0x6   :  { %27 = vsyncpa [#allocation11], 0 }
   0x7   :  { %28 = vsyncpa [#allocation14], 0 }
   0x8   :  { %29 = vsyncpa [#allocation6], 0 }
   0x9   :  { %30 = vsyncpa [#allocation18], 0  ;;  %s4544_s24 = smov [#allocation7]   ;;  %s4334_s28 = scalar_lea.hbm %s6115_s3, 1024 }
   0xa   :  { %s52_s25 = sshll.u32 %s4544_s24, 4  ;;  %p4335_p0 = scmp.ne.s32.totalorder %s6115_s3, %s4334_s28  ;;  %s53_s25 = int_to_ptr.vmem [resolvable:$true] %s52_s25 }
   0xb   :  { %p4338_p1 = scmp.lt.u32.totalorder %s4334_s28, %s6115_s3 }
   0xd   :  { %p4340_p2 = pnand %p4338_p1, %p4335_p0 }
   0xf   :  { %4343 = shalt.err (!%p4340_p2)
}
  0x10   :  { %s4344_s19 = scalar_lea.vmem %s53_s25, 1024  ;;  %p4349_p4 = scmp.lt.s32.totalorder %s53_s25, %s53_s25 }
  0x11   :  { %p4345_p3 = scmp.ne.s32.totalorder %s53_s25, %s4344_s19  ;;  %p4350_p5 = scmp.lt.s32.totalorder %s4344_s19, %s4344_s19 }
  0x13   :  { %p4351_p6 = por %p4350_p5, %p4349_p4 }
  0x15   :  { %p4352_p7 = pnand %p4351_p6, %p4345_p3 }
  0x17   :  { %4355 = shalt.err (!%p4352_p7)
}
  0x18   :  { %s4545_s1 = smov 64   ;;  %s4546_s20 = smov 4  }
  0x19   :  { %58 = dma.hbm_to_vmem [thread:$0]  %s6115_s3, 1024, %s53_s25, [#allocation8], %s4545_s1, %s4545_s1, %s4546_s20  }
  0x1a   :  { %s4547_s23 = smov [#allocation10]   ;;  %s4548_s26 = smov [#allocation13]  }
  0x1b   :  { %s82_s24 = sshll.u32 %s4547_s23, 4  ;;  %s110_s27 = sshll.u32 %s4548_s26, 4  ;;  %s83_s24 = int_to_ptr.vmem [resolvable:$true] %s82_s24  ;;  %s111_s27 = int_to_ptr.vmem [resolvable:$true] %s110_s27 }
  0x1c   :  { %s4356_s0 = scalar_lea.hbm %s6120_s8, 5120 }
  0x1d   :  { %p4357_p8 = scmp.ne.s32.totalorder %s6120_s8, %s4356_s0  ;;  %p4360_p9 = scmp.lt.u32.totalorder %s4356_s0, %s6120_s8 }
  0x1f   :  { %p4362_p10 = pnand %p4360_p9, %p4357_p8 }
  0x21   :  { %4365 = shalt.err (!%p4362_p10)
}
  0x22   :  { %s4366_s3 = scalar_lea.vmem %s83_s24, 5120  ;;  %p4371_p12 = scmp.lt.s32.totalorder %s83_s24, %s83_s24 }
  0x23   :  { %p4367_p11 = scmp.ne.s32.totalorder %s83_s24, %s4366_s3  ;;  %p4372_p13 = scmp.lt.s32.totalorder %s4366_s3, %s4366_s3 }
  0x25   :  { %p4373_p0 = por %p4372_p13, %p4371_p12 }
  0x27   :  { %p4374_p1 = pnand %p4373_p0, %p4367_p11 }
  0x29   :  { %4377 = shalt.err (!%p4374_p1)
}
  0x2a   :  { %88 = dma.hbm_to_vmem [thread:$0]  %s6120_s8, 5120, %s83_s24, [#allocation11], %s4545_s1, %s4545_s1, %s4546_s20  }
  0x2b   :  { %s4378_s23 = scalar_lea.hbm %s6124_s12, 1024 }
  0x2c   :  { %p4379_p2 = scmp.ne.s32.totalorder %s6124_s12, %s4378_s23  ;;  %p4382_p3 = scmp.lt.u32.totalorder %s4378_s23, %s6124_s12 }
  0x2e   :  { %p4384_p4 = pnand %p4382_p3, %p4379_p2 }
  0x30   :  { %4387 = shalt.err (!%p4384_p4)
}
  0x31   :  { %s4388_s30 = scalar_lea.vmem %s111_s27, 1024  ;;  %p4393_p6 = scmp.lt.s32.totalorder %s111_s27, %s111_s27 }
  0x32   :  { %p4389_p5 = scmp.ne.s32.totalorder %s111_s27, %s4388_s30  ;;  %p4394_p7 = scmp.lt.s32.totalorder %s4388_s30, %s4388_s30 }
  0x34   :  { %p4395_p8 = por %p4394_p7, %p4393_p6 }
  0x36   :  { %p4396_p9 = pnand %p4395_p8, %p4389_p5 }
  0x38   :  { %4399 = shalt.err (!%p4396_p9)
}
  0x39   :  { %116 = dma.hbm_to_vmem [thread:$0]  %s6124_s12, 1024, %s111_s27, [#allocation14], %s4545_s1, %s4545_s1, %s4546_s20  }
  0x3a   :  { %s4549_s18 = smov [#allocation4]   ;;  %s4400_s21 = scalar_lea.hbm %s6114_s2, 2048 }
  0x3b   :  { %s40_s19 = sshll.u32 %s4549_s18, 4  ;;  %p4401_p10 = scmp.ne.s32.totalorder %s6114_s2, %s4400_s21  ;;  %s41_s19 = int_to_ptr.vmem [resolvable:$true] %s40_s19 }
  0x3c   :  { %p4404_p11 = scmp.lt.u32.totalorder %s4400_s21, %s6114_s2 }
  0x3e   :  { %p4406_p12 = pnand %p4404_p11, %p4401_p10 }
  0x40   :  { %4409 = shalt.err (!%p4406_p12)
}
  0x41   :  { %s4410_s28 = scalar_lea.vmem %s41_s19, 2048  ;;  %p4415_p0 = scmp.lt.s32.totalorder %s41_s19, %s41_s19 }
  0x42   :  { %p4411_p13 = scmp.ne.s32.totalorder %s41_s19, %s4410_s28  ;;  %p4416_p1 = scmp.lt.s32.totalorder %s4410_s28, %s4410_s28 }
  0x44   :  { %p4417_p2 = por %p4416_p1, %p4415_p0 }
  0x46   :  { %p4418_p3 = pnand %p4417_p2, %p4411_p13 }
  0x48   :  { %4421 = shalt.err (!%p4418_p3)
}
  0x49   :  { %s4550_s12 = smov 128   ;;  %s4551_s27 = smov 8  }
  0x4a   :  { %46 = dma.hbm_to_vmem [thread:$0]  %s6114_s2, 2048, %s41_s19, [#allocation5], %s4550_s12, %s4550_s12, %s4551_s27  }
  0x4b   :  { %s4552_s30 = smov [#allocation9]   ;;  %s4553_s24 = smov [#allocation12]  }
  0x4c   :  { %s64_s8 = sshll.u32 %s4552_s30, 4  ;;  %s96_s18 = sshll.u32 %s4553_s24, 4  ;;  %s65_s8 = int_to_ptr.vmem [resolvable:$true] %s64_s8  ;;  %s4706_s18 = int_to_ptr.vmem [resolvable:$true] %s96_s18 }
  0x4d   :  { %s4422_s21 = scalar_lea.hbm %s6116_s4, 5120 }
  0x4e   :  { %p4423_p4 = scmp.ne.s32.totalorder %s6116_s4, %s4422_s21  ;;  %p4426_p5 = scmp.lt.u32.totalorder %s4422_s21, %s6116_s4 }
  0x50   :  { %p4428_p6 = pnand %p4426_p5, %p4423_p4 }
  0x52   :  { %4431 = shalt.err (!%p4428_p6)
}
  0x53   :  { %s4432_s2 = scalar_lea.vmem %s65_s8, 5120  ;;  %p4437_p8 = scmp.lt.s32.totalorder %s65_s8, %s65_s8 }
  0x54   :  { %p4433_p7 = scmp.ne.s32.totalorder %s65_s8, %s4432_s2  ;;  %p4438_p9 = scmp.lt.s32.totalorder %s4432_s2, %s4432_s2 }
  0x56   :  { %p4439_p10 = por %p4438_p9, %p4437_p8 }
  0x58   :  { %p4440_p11 = pnand %p4439_p10, %p4433_p7 }
  0x5a   :  { %4443 = shalt.err (!%p4440_p11)
}
  0x5b   :  { %70 = dma.hbm_to_vmem [thread:$0]  %s6116_s4, 5120, %s65_s8, [#allocation8], %s4545_s1, %s4545_s1, %s4546_s20  }
  0x5c   :  { %s4444_s29 = scalar_lea.hbm %s6122_s10, 1024 }
  0x5d   :  { %p4445_p12 = scmp.ne.s32.totalorder %s6122_s10, %s4444_s29  ;;  %p4448_p13 = scmp.lt.u32.totalorder %s4444_s29, %s6122_s10 }
  0x5f   :  { %p4450_p0 = pnand %p4448_p13, %p4445_p12 }
  0x61   :  { %4453 = shalt.err (!%p4450_p0)
}
  0x62   :  { %s4454_s25 = scalar_lea.vmem %s4706_s18, 1024  ;;  %p4459_p2 = scmp.lt.s32.totalorder %s4706_s18, %s4706_s18 }
  0x63   :  { %p4455_p1 = scmp.ne.s32.totalorder %s4706_s18, %s4454_s25  ;;  %p4460_p3 = scmp.lt.s32.totalorder %s4454_s25, %s4454_s25 }
  0x65   :  { %p4461_p4 = por %p4460_p3, %p4459_p2 }
  0x67   :  { %p4462_p5 = pnand %p4461_p4, %p4455_p1 }
  0x69   :  { %4465 = shalt.err (!%p4462_p5)
}
  0x6a   :  { %102 = dma.hbm_to_vmem [thread:$0]  %s6122_s10, 1024, %s4706_s18, [#allocation11], %s4545_s1, %s4545_s1, %s4546_s20  }
  0x6b   :  { %s4554_s21 = smov [#allocation15]   ;;  %s4466_s26 = scalar_lea.hbm %s6126_s14, 1024 }
  0x6c   :  { %s124_s22 = sshll.u32 %s4554_s21, 4  ;;  %p4467_p6 = scmp.ne.s32.totalorder %s6126_s14, %s4466_s26  ;;  %s125_s22 = int_to_ptr.vmem [resolvable:$true] %s124_s22 }
  0x6d   :  { %p4470_p7 = scmp.lt.u32.totalorder %s4466_s26, %s6126_s14 }
  0x6f   :  { %p4472_p8 = pnand %p4470_p7, %p4467_p6 }
  0x71   :  { %4475 = shalt.err (!%p4472_p8)
}
  0x72   :  { %s4476_s27 = scalar_lea.vmem %s125_s22, 1024  ;;  %p4481_p10 = scmp.lt.s32.totalorder %s125_s22, %s125_s22 }
  0x73   :  { %p4477_p9 = scmp.ne.s32.totalorder %s125_s22, %s4476_s27  ;;  %p4482_p11 = scmp.lt.s32.totalorder %s4476_s27, %s4476_s27 }
  0x75   :  { %p4483_p12 = por %p4482_p11, %p4481_p10 }
  0x77   :  { %p4484_p13 = pnand %p4483_p12, %p4477_p9 }
  0x79   :  { %4487 = shalt.err (!%p4484_p13)
}
  0x7a   :  { %130 = dma.hbm_to_vmem [thread:$0]  %s6126_s14, 1024, %s125_s22, [#allocation14], %s4545_s1, %s4545_s1, %s4546_s20  }
  0x7b   :  { %4532 = dma.done.wait [#allocation5], 2048  }
  0x7c   :  { %4533 = vsyncadd [#allocation5], 4294965248 }
  0x7d   :  { %4534 = dma.done.wait [#allocation8], 6144  }
  0x7e   :  { %4535 = vsyncadd [#allocation8], 4294961152 }
  0x7f   :  { %4536 = dma.done.wait [#allocation11], 6144  }
  0x80   :  { %4537 = vsyncadd [#allocation11], 4294961152 }
  0x81   :  { %4538 = dma.done.wait [#allocation14], 2048  }
  0x82   :  { %4539 = vsyncadd [#allocation14], 4294965248  ;;  %v4237_v0 = vld [vmem:[#allocation9] sm:$0xff]   ;;  %v4238_v1 = vld [vmem:[#allocation9 + $0x8] sm:$0xff]   ;;  %s6134_s0 = sld [smem:[#allocation25_spill]]  ;;  %s6135_s3 = sld [smem:[#allocation26_spill]] }
  0x83   :  { %3822 = vmatprep.subr.bf16.mxu0 %v4237_v0  ;;  %v4239_v2 = vld [vmem:[#allocation9 + $0x10] sm:$0xff]   ;;  %v4240_v3 = vld [vmem:[#allocation9 + $0x18] sm:$0xff]   ;;  %v223_v4 = vld [vmem:[#allocation4] sm:$0xff] }
  0x84   :  { %3823 = vmatpush3.bf16.msra.mxu0 %v4237_v0  ;;  %v224_v5 = vld [vmem:[#allocation4 + $0x8] sm:$0xff]  ;;  %v4241_v7 = vld [vmem:[#allocation9 + $0x20] sm:$0xff]   ;;  %v4243_v9 = vld [vmem:[#allocation9 + $0x30] sm:$0xff]  }
  0x85   :  { %3824 = vmatprep.subr.bf16.mxu0 %v4238_v1  ;;  %v239_v6 = vpack.c.bf16 %v224_v5, %v223_v4  ;;  %v4242_v8 = vld [vmem:[#allocation9 + $0x28] sm:$0xff]   ;;  %v4244_v10 = vld [vmem:[#allocation9 + $0x38] sm:$0xff]   ;;  %v225_v11 = vld [vmem:[#allocation4 + $0x10] sm:$0xff] }
  0x86   :  { %v226_v12 = vld [vmem:[#allocation4 + $0x18] sm:$0xff]  ;;  %v227_v13 = vld [vmem:[#allocation4 + $0x20] sm:$0xff]  ;;  %v228_v14 = vld [vmem:[#allocation4 + $0x28] sm:$0xff] }
  0x87   :  { %3838 = vmatprep.mubr.bf16.mxu0 %v239_v6  ;;  %v240_v15 = vpack.c.bf16 %v226_v12, %v225_v11  ;;  %v241_v16 = vpack.c.bf16 %v228_v14, %v227_v13  ;;  %v229_v17 = vld [vmem:[#allocation4 + $0x30] sm:$0xff]  ;;  %v230_v18 = vld [vmem:[#allocation4 + $0x38] sm:$0xff]  ;;  %v231_v19 = vld [vmem:[#allocation4 + $0x40] sm:$0xff] }
  0x88   :  { %3825 = vmatpush3.bf16.msra.mxu0 %v4238_v1  ;;  %v232_v20 = vld [vmem:[#allocation4 + $0x48] sm:$0xff]  ;;  %v242_v21 = vpack.c.bf16 %v230_v18, %v229_v17  ;;  %v233_v23 = vld [vmem:[#allocation4 + $0x50] sm:$0xff]  ;;  %v234_v24 = vld [vmem:[#allocation4 + $0x58] sm:$0xff] }
  0x89   :  { %3826 = vmatprep.subr.bf16.mxu0 %v4239_v2  ;;  %v243_v22 = vpack.c.bf16 %v232_v20, %v231_v19  ;;  %v235_v25 = vld [vmem:[#allocation4 + $0x60] sm:$0xff]  ;;  %v236_v26 = vld [vmem:[#allocation4 + $0x68] sm:$0xff]  ;;  %v244_v27 = vpack.c.bf16 %v234_v24, %v233_v23  ;;  %v237_v29 = vld [vmem:[#allocation4 + $0x70] sm:$0xff] }
  0x8a   :  { %v245_v28 = vpack.c.bf16 %v236_v26, %v235_v25  ;;  %v238_v30 = vld [vmem:[#allocation4 + $0x78] sm:$0xff]  ;;  %v4758_v32 = vld [vmem:[#allocation7] sm:$0xff]   ;;  %v4766_v11 = vld [vmem:[#allocation7 + $0x10] sm:$0xff]  }
  0x8b   :  { %v246_v31 = vpack.c.bf16 %v238_v30, %v237_v29  ;;  %3870 = vmatprep.mubr.bf16.mxu1 %v4758_v32  ;;  %v3329_v34 = vld [vmem:[%s6117_s5] ss:$0 sm:$0xff]  ;;  %v4770_v12 = vld [vmem:[#allocation7 + $0x18] sm:$0xff]   ;;  %v4776_v14 = vld [vmem:[#allocation7 + $0x28] sm:$0xff]   ;;  %v4792_v29 = vstv %s6134_s0 }
  0x8c   :  { %3827 = vmatpush3.bf16.msra.mxu0 %v4239_v2  ;;  %v4772_v13 = vld [vmem:[#allocation7 + $0x20] sm:$0xff]   ;;  %v4254_v18 = vld [vmem:[#allocation9 + $0x48] sm:$0xff]   ;;  %v4255_v19 = vld [vmem:[#allocation9 + $0x50] sm:$0xff]  }
  0x8d   :  { %3828 = vmatprep.subr.bf16.mxu0 %v4240_v3  ;;  %v4253_v17 = vld [vmem:[#allocation9 + $0x40] sm:$0xff]   ;;  %v4256_v20 = vld [vmem:[#allocation9 + $0x58] sm:$0xff]   ;;  %v4258_v23 = vld [vmem:[#allocation9 + $0x68] sm:$0xff]  }
  0x8e   :  { %v3432_v25 = vld [vmem:[#allocation10] sm:$0xff]   ;;  %v4259_v26 = vld [vmem:[#allocation9 + $0x70] sm:$0xff]   ;;  %v4260_v30 = vld [vmem:[#allocation9 + $0x78] sm:$0xff]  }
  0x90   :  { %3829 = vmatpush3.bf16.msra.mxu0 %v4240_v3 }
  0x91   :  { %3830 = vmatprep.subr.bf16.mxu0 %v4241_v7 }
  0x94   :  { %3831 = vmatpush3.bf16.msra.mxu0 %v4241_v7 }
  0x95   :  { %3832 = vmatprep.subr.bf16.mxu0 %v4242_v8 }
  0x98   :  { %3833 = vmatpush3.bf16.msra.mxu0 %v4242_v8 }
  0x99   :  { %3834 = vmatprep.subr.bf16.mxu0 %v4243_v9 }
  0x9c   :  { %3835 = vmatpush3.bf16.msra.mxu0 %v4243_v9 }
  0x9d   :  { %3836 = vmatprep.subr.bf16.mxu0 %v4244_v10 }
  0xa0   :  { %3837 = vmatpush3.bf16.msra.mxu0 %v4244_v10  ;;  %v4764_v10 = vld [vmem:[#allocation7 + $0x8] sm:$0xff]  }
  0xa1   :  { %3886 = vmatprep.subr.bf16.mxu0 %v4253_v17 }
  0xa3   :  { %3839 = vmatmul.mubr.bf16.vlgmr.msra.gmra.mrb[0].mxu0 %v240_v15  ;;  %v4778_v15 = vld [vmem:[#allocation7 + $0x30] sm:$0xff]  }
  0xa4   :  { %3842 = vmatprep.mubr.bf16.mxu0 %v241_v16  ;;  %v4782_v16 = vld [vmem:[#allocation7 + $0x38] sm:$0xff]   ;;  %3887 = vmatpush3.bf16.msra.mxu0 %v4253_v17 }
  0xa5   :  { %3888 = vmatprep.subr.bf16.mxu0 %v4254_v18 }
  0xa8   :  { %3889 = vmatpush3.bf16.msra.mxu0 %v4254_v18 }
  0xa9   :  { %3890 = vmatprep.subr.bf16.mxu0 %v4255_v19 }
  0xab   :  { %3843 = vmatmul.mubr.bf16.gmra.mrb[4].mxu0 %v242_v21  ;;  %v4257_v21 = vld [vmem:[#allocation9 + $0x60] sm:$0xff]  }
  0xac   :  { %3846 = vmatprep.mubr.bf16.mxu0 %v243_v22  ;;  %3891 = vmatpush3.bf16.msra.mxu0 %v4255_v19  ;;  %v157_v22 = vlaneseq }
  0xad   :  { %3892 = vmatprep.subr.bf16.mxu0 %v4256_v20 }
  0xae   :  { %v4786_v24 = vshrl.u32 %v157_v22, 7 }
  0xb0   :  { %3893 = vmatpush3.bf16.msra.mxu0 %v4256_v20  ;;  %vm175_vm0 = vcmp.lt.s32.totalorder %v4786_v24, %v4792_v29  ;;  %v167_v19 = vadd.s32 72, %v4786_v24 }
  0xb1   :  { %3894 = vmatprep.subr.bf16.mxu0 %v4257_v21 }
  0xb2   :  { %vm184_vm9 = vcmp.lt.s32.totalorder %v167_v19, %v4792_v29 }
  0xb3   :  { %3847 = vmatmul.mubr.bf16.gmra.mrb[8].mxu0 %v244_v27  ;;  %v3591_v27 = vld [vmem:[#allocation10 + $0x8] sm:$0xff]  }
  0xb4   :  { %3850 = vmatprep.mubr.bf16.mxu0 %v245_v28  ;;  %3895 = vmatpush3.bf16.msra.mxu0 %v4257_v21  ;;  %v159_v28 = vadd.s32 8, %v4786_v24 }
  0xb5   :  { %3896 = vmatprep.subr.bf16.mxu0 %v4258_v23 }
  0xb6   :  { %vm176_vm1 = vcmp.lt.s32.totalorder %v159_v28, %v4792_v29 }
  0xb8   :  { %3897 = vmatpush3.bf16.msra.mxu0 %v4258_v23 }
  0xb9   :  { %3898 = vmatprep.subr.bf16.mxu0 %v4259_v26 }
  0xbb   :  { %3851 = vmatmul.mubr.bf16.gmra.mrb[12].mxu0 %v246_v31  ;;  %v160_v31 = vadd.s32 16, %v4786_v24 }
  0xbc   :  { %3899 = vmatpush3.bf16.msra.mxu0 %v4259_v26 }
  0xbd   :  { %3900 = vmatprep.subr.bf16.mxu0 %v4260_v30  ;;  %vm177_vm2 = vcmp.lt.s32.totalorder %v160_v31, %v4792_v29 }
  0xc0   :  { %3901 = vmatpush3.bf16.msra.mxu0 %v4260_v30 }
 0x176   :  { %v3840_v33 = vpop.f32.mrb[0].mxu0 }
 0x177   :  { %v352_v35 = vpop.f32.mrb[1].mxu0  ;;  %v361_v37 = vadd.f32 %v3840_v33, %v3329_v34  ;;  %v3433_v33 = vunpack.c.l.bf16 %v3432_v25 }
 0x178   :  { %v3841_v36 = vpop.f32.mrb[2].mxu0  ;;  %v353_v40 = vadd.f32 %v3329_v34, %v352_v35 }
 0x179   :  { %v364_v38 = vadd.f32 %v3841_v36, %v3329_v34  ;;  %v355_v39 = vpop.f32.mrb[3].mxu0  ;;  %v161_v36 = vadd.s32 24, %v4786_v24 }
 0x17a   :  { %v356_v41 = vadd.f32 %v3329_v34, %v355_v39 }
 0x17b   :  { %v432_v42 = vpack.c.bf16 %v364_v38, %v361_v37  ;;  %v3434_v37 = vunpack.c.h.bf16 %v3432_v25  ;;  %vm178_vm3 = vcmp.lt.s32.totalorder %v161_v36, %v4792_v29  ;;  %v3595_v25 = vld [vmem:[#allocation10 + $0x28] sm:$0xff]   ;;  %v169_v36 = vadd.s32 88, %v4786_v24 }
 0x17c   :  { %v431_v43 = vpack.c.bf16 %v356_v41, %v353_v40  ;;  %v3438_v40 = vunpack.c.h.bf16 %v3591_v27 }
 0x17d   :  { %vm186_vm11 = vcmp.lt.s32.totalorder %v169_v36, %v4792_v29 }
 0x17e   :  { %v3844_v44 = vpop.f32.mrb[4].mxu0  ;;  %3854 = vmatprep.subr.bf16.mxu1 %v431_v43 }
 0x17f   :  { %v368_v45 = vpop.f32.mrb[5].mxu0  ;;  %3855 = vmatpush3.bf16.msra.mxu1 %v431_v43  ;;  %v377_v47 = vadd.f32 %v3844_v44, %v3329_v34  ;;  %v3592_v43 = vld [vmem:[#allocation10 + $0x10] sm:$0xff]   ;;  %v4555_v44 = vmov 0.0  }
 0x180   :  { %v3845_v46 = vpop.f32.mrb[6].mxu0  ;;  %3856 = vmatprep.subr.bf16.mxu1 %v432_v42  ;;  %v369_v50 = vadd.f32 %v3329_v34, %v368_v45  ;;  %v4804_v45 = vsel %vm175_vm0, 1.0, %v4555_v44  ;;  %v4904_v19 = vsel %vm186_vm11, 1.0, %v4555_v44  ;;  %vm4556_vm0 = vmmov 0  }
 0x181   :  { %v380_v48 = vadd.f32 %v3845_v46, %v3329_v34  ;;  %v371_v49 = vpop.f32.mrb[7].mxu0  ;;  %v4807_v46 = vsel %vm176_vm1, 1.0, %v4555_v44 }
 0x182   :  { %v372_v51 = vadd.f32 %v3329_v34, %v371_v49 }
 0x183   :  { %v434_v52 = vpack.c.bf16 %v380_v48, %v377_v47  ;;  %3857 = vmatpush3.bf16.msra.mxu1 %v432_v42  ;;  %v162_v42 = vadd.s32 32, %v4786_v24 }
 0x184   :  { %v433_v53 = vpack.c.bf16 %v372_v51, %v369_v50  ;;  %v3593_v50 = vld [vmem:[#allocation10 + $0x18] sm:$0xff]   ;;  %v163_v51 = vadd.s32 40, %v4786_v24 }
 0x185   :  { %vm179_vm4 = vcmp.lt.s32.totalorder %v162_v42, %v4792_v29 }
 0x186   :  { %v3848_v54 = vpop.f32.mrb[8].mxu0  ;;  %3858 = vmatprep.subr.bf16.mxu1 %v433_v53  ;;  %vm180_vm5 = vcmp.lt.s32.totalorder %v163_v51, %v4792_v29 }
 0x187   :  { %v384_v55 = vpop.f32.mrb[9].mxu0  ;;  %3859 = vmatpush3.bf16.msra.mxu1 %v433_v53  ;;  %v393_v57 = vadd.f32 %v3848_v54, %v3329_v34  ;;  %v164_v53 = vadd.s32 48, %v4786_v24  ;;  %v3441_v54 = vunpack.c.l.bf16 %v3592_v43  ;;  %v4846_v17 = vsel %vm180_vm5, 1.0, %v4555_v44 }
 0x188   :  { %v3849_v56 = vpop.f32.mrb[10].mxu0  ;;  %3860 = vmatprep.subr.bf16.mxu1 %v434_v52  ;;  %v385_v60 = vadd.f32 %v3329_v34, %v384_v55 }
 0x189   :  { %v396_v58 = vadd.f32 %v3849_v56, %v3329_v34  ;;  %v387_v59 = vpop.f32.mrb[11].mxu0  ;;  %vm181_vm6 = vcmp.lt.s32.totalorder %v164_v53, %v4792_v29 }
 0x18a   :  { %v388_v61 = vadd.f32 %v3329_v34, %v387_v59  ;;  %v3445_v59 = vunpack.c.l.bf16 %v3593_v50  ;;  %v4858_v26 = vsel %vm181_vm6, 1.0, %v4555_v44 }
 0x18b   :  { %v436_v62 = vpack.c.bf16 %v396_v58, %v393_v57  ;;  %3861 = vmatpush3.bf16.msra.mxu1 %v434_v52  ;;  %v4818_v52 = vsel %vm177_vm2, 1.0, %v4555_v44  ;;  %v4829_v58 = vsel %vm178_vm3, 1.0, %v4555_v44 }
 0x18c   :  { %v435_v63 = vpack.c.bf16 %v388_v61, %v385_v60  ;;  %v165_v60 = vadd.s32 56, %v4786_v24 }
 0x18e   :  { %v3852_v0 = vpop.f32.mrb[12].mxu0  ;;  %3862 = vmatprep.subr.bf16.mxu1 %v435_v63  ;;  %vm182_vm7 = vcmp.lt.s32.totalorder %v165_v60, %v4792_v29 }
 0x18f   :  { %v400_v1 = vpop.f32.mrb[13].mxu0  ;;  %3863 = vmatpush3.bf16.msra.mxu1 %v435_v63  ;;  %v409_v3 = vadd.f32 %v3852_v0, %v3329_v34  ;;  %v3442_v0 = vunpack.c.h.bf16 %v3592_v43 }
 0x190   :  { %v3853_v2 = vpop.f32.mrb[14].mxu0  ;;  %3864 = vmatprep.subr.bf16.mxu1 %v436_v62  ;;  %v401_v6 = vadd.f32 %v3329_v34, %v400_v1  ;;  %v4837_v1 = vsel %vm179_vm4, 1.0, %v4555_v44 }
 0x191   :  { %v412_v4 = vadd.f32 %v3853_v2, %v3329_v34  ;;  %v403_v5 = vpop.f32.mrb[15].mxu0 }
 0x192   :  { %v404_v7 = vadd.f32 %v3329_v34, %v403_v5  ;;  %v3437_v34 = vunpack.c.l.bf16 %v3591_v27  ;;  %v168_v27 = vadd.s32 80, %v4786_v24 }
 0x193   :  { %v438_v8 = vpack.c.bf16 %v412_v4, %v409_v3  ;;  %3865 = vmatpush3.bf16.msra.mxu1 %v436_v62  ;;  %v3446_v3 = vunpack.c.h.bf16 %v3593_v50 }
 0x194   :  { %v437_v9 = vpack.c.bf16 %v404_v7, %v401_v6  ;;  %vm185_vm10 = vcmp.lt.s32.totalorder %v168_v27, %v4792_v29 }
 0x196   :  { %3866 = vmatprep.subr.bf16.mxu1 %v437_v9 }
 0x197   :  { %3867 = vmatpush3.bf16.msra.mxu1 %v437_v9  ;;  %v3594_v9 = vld [vmem:[#allocation10 + $0x20] sm:$0xff]  }
 0x198   :  { %3868 = vmatprep.subr.bf16.mxu1 %v438_v8  ;;  %v3449_v28 = vunpack.c.l.bf16 %v3594_v9 }
 0x19b   :  { %3869 = vmatpush3.bf16.msra.mxu1 %v438_v8  ;;  %v166_v8 = vadd.s32 64, %v4786_v24 }
 0x19d   :  { %vm183_vm8 = vcmp.lt.s32.totalorder %v166_v8, %v4792_v29 }
 0x19e   :  { %3871 = vmatmul.mubr.bf16.vlgmr.msra.gmra.mrb[0].mxu1 %v4764_v10  ;;  %v4877_v42 = vsel %vm183_vm8, 1.0, %v4555_v44 }
 0x19f   :  { %3874 = vmatprep.mubr.bf16.mxu1 %v4766_v11 }
 0x1a6   :  { %3875 = vmatmul.mubr.bf16.gmra.mrb[4].mxu1 %v4770_v12 }
 0x1a7   :  { %3878 = vmatprep.mubr.bf16.mxu1 %v4772_v13 }
 0x1ae   :  { %3879 = vmatmul.mubr.bf16.gmra.mrb[8].mxu1 %v4776_v14 }
 0x1af   :  { %3882 = vmatprep.mubr.bf16.mxu1 %v4778_v15 }
 0x1b6   :  { %3883 = vmatmul.mubr.bf16.gmra.mrb[12].mxu1 %v4782_v16 }
 0x1b7   :  { %3934 = vmatprep.mubr.bf16.mxu1 %v4758_v32 }
 0x271   :  { %v3872_v35 = vpop.f32.mrb[0].mxu1 }
 0x272   :  { %v553_v38 = vpop.f32.mrb[1].mxu1  ;;  %v4809_v48 = vadd.f32 %v3872_v35, %v3437_v34  ;;  %v4869_v34 = vsel %vm182_vm7, 1.0, %v4555_v44  ;;  %v3453_v35 = vunpack.c.l.bf16 %v3595_v25 }
 0x273   :  { %v4800_v39 = vadd.f32 %v3433_v33, %v553_v38  ;;  %v3873_v41 = vpop.f32.mrb[2].mxu1 }
 0x274   :  { %v556_v47 = vpop.f32.mrb[3].mxu1  ;;  %v4823_v56 = vadd.f32 %v3873_v41, %v3438_v40  ;;  %v618_v61 = vmul.f32 %v4818_v52, %v4809_v48  ;;  %v3450_v41 = vunpack.c.h.bf16 %v3594_v9 }
 0x275   :  { %v4812_v49 = vadd.f32 %v3434_v37, %v556_v47  ;;  %v616_v55 = vmul.f32 %v4804_v45, %v4800_v39  ;;  %v3454_v47 = vunpack.c.h.bf16 %v3595_v25 }
 0x276   :  { %v619_v4 = vmul.f32 %v4829_v58, %v4823_v56 }
 0x277   :  { %v617_v57 = vmul.f32 %v4807_v46, %v4812_v49 }
 0x279   :  { %v632_v62 = vadd.f32 %v617_v57, %v616_v55  ;;  %v3876_v63 = vpop.f32.mrb[4].mxu1  ;;  %v170_v55 = vadd.s32 96, %v4786_v24  ;;  %v3596_v57 = vld [vmem:[#allocation10 + $0x30] sm:$0xff]  }
 0x27a   :  { %v569_v2 = vpop.f32.mrb[5].mxu1  ;;  %v4849_v20 = vadd.f32 %v3876_v63, %v3445_v59  ;;  %v4886_v59 = vsel %vm184_vm9, 1.0, %v4555_v44 }
 0x27b   :  { %v633_v5 = vadd.f32 %v632_v62, %v618_v61  ;;  %v4841_v6 = vadd.f32 %v3441_v54, %v569_v2  ;;  %v3877_v7 = vpop.f32.mrb[6].mxu1  ;;  %v171_v61 = vadd.s32 104, %v4786_v24  ;;  %vm187_vm12 = vcmp.lt.s32.totalorder %v170_v55, %v4792_v29 }
 0x27c   :  { %v572_v18 = vpop.f32.mrb[7].mxu1  ;;  %v4861_v31 = vadd.f32 %v3877_v7, %v3446_v3  ;;  %v622_v37 = vmul.f32 %v4858_v26, %v4849_v20  ;;  %v3597_v3 = vld [vmem:[#allocation10 + $0x38] sm:$0xff]   ;;  %v3457_v7 = vunpack.c.l.bf16 %v3596_v57 }
 0x27d   :  { %v620_v21 = vmul.f32 %v4837_v1, %v4841_v6  ;;  %v634_v22 = vadd.f32 %v633_v5, %v619_v4  ;;  %v4853_v23 = vadd.f32 %v3442_v0, %v572_v18  ;;  %v4896_v4 = vsel %vm185_vm10, 1.0, %v4555_v44 }
 0x27e   :  { %v623_v50 = vmul.f32 %v4869_v34, %v4861_v31  ;;  %v172_v5 = vadd.s32 112, %v4786_v24  ;;  %vm188_vm13 = vcmp.lt.s32.totalorder %v171_v61, %v4792_v29 }
 0x27f   :  { %v635_v30 = vadd.f32 %v634_v22, %v620_v21  ;;  %v621_v33 = vmul.f32 %v4846_v17, %v4853_v23  ;;  %v3461_v21 = vunpack.c.l.bf16 %v3597_v3  ;;  %v173_v22 = vadd.s32 120, %v4786_v24 }
 0x280   :  { %vm189_vm14 = vcmp.lt.s32.totalorder %v172_v5, %v4792_v29 }
 0x281   :  { %v636_v38 = vadd.f32 %v635_v30, %v621_v33  ;;  %v3880_v40 = vpop.f32.mrb[8].mxu1  ;;  %v3458_v30 = vunpack.c.h.bf16 %v3596_v57  ;;  %v4912_v33 = vsel %vm187_vm12, 1.0, %v4555_v44  ;;  %vm190_vm15 = vcmp.lt.s32.totalorder %v173_v22, %v4792_v29 }
 0x282   :  { %v585_v43 = vpop.f32.mrb[9].mxu1  ;;  %v4889_v62 = vadd.f32 %v3880_v40, %v3453_v35  ;;  %v3462_v40 = vunpack.c.h.bf16 %v3597_v3  ;;  %v4921_v55 = vsel %vm189_vm14, 1.0, %v4555_v44 }
 0x283   :  { %v637_v51 = vadd.f32 %v636_v38, %v622_v37  ;;  %v4881_v53 = vadd.f32 %v3449_v28, %v585_v43  ;;  %v3881_v54 = vpop.f32.mrb[10].mxu1 }
 0x284   :  { %v588_v60 = vpop.f32.mrb[11].mxu1  ;;  %v597_v9 = vadd.f32 %v3881_v54, %v3454_v47  ;;  %v626_v25 = vmul.f32 %v4896_v4, %v4889_v62 }
 0x285   :  { %v624_v63 = vmul.f32 %v4877_v42, %v4881_v53  ;;  %v638_v0 = vadd.f32 %v637_v51, %v623_v50  ;;  %v589_v2 = vadd.f32 %v3450_v41, %v588_v60  ;;  %v4917_v41 = vsel %vm188_vm13, 1.0, %v4555_v44 }
 0x286   :  { %v627_v36 = vmul.f32 %v4904_v19, %v597_v9 }
 0x287   :  { %v639_v8 = vadd.f32 %v638_v0, %v624_v63  ;;  %v625_v18 = vmul.f32 %v4886_v59, %v589_v2  ;;  %v4925_v63 = vsel %vm190_vm15, 1.0, %v4555_v44 }
 0x289   :  { %v640_v27 = vadd.f32 %v639_v8, %v625_v18  ;;  %v3884_v28 = vpop.f32.mrb[12].mxu1 }
 0x28a   :  { %v601_v35 = vpop.f32.mrb[13].mxu1  ;;  %v610_v47 = vadd.f32 %v3884_v28, %v3461_v21 }
 0x28b   :  { %v641_v37 = vadd.f32 %v640_v27, %v626_v25  ;;  %v602_v38 = vadd.f32 %v3457_v7, %v601_v35  ;;  %v3885_v24 = vpop.f32.mrb[14].mxu1  ;;  %v4932_v27 = vstv %s6135_s3 }
 0x28c   :  { %v604_v43 = vpop.f32.mrb[15].mxu1  ;;  %v613_v60 = vadd.f32 %v3885_v24, %v3462_v40  ;;  %v630_v29 = vmul.f32 %v4921_v55, %v610_v47 }
 0x28d   :  { %v628_v50 = vmul.f32 %v4912_v33, %v602_v38  ;;  %v642_v51 = vadd.f32 %v641_v37, %v627_v36  ;;  %v605_v54 = vadd.f32 %v3458_v30, %v604_v43 }
 0x28e   :  { %v631_v3 = vmul.f32 %v4925_v63, %v613_v60 }
 0x28f   :  { %v643_v57 = vadd.f32 %v642_v51, %v628_v50  ;;  %v629_v61 = vmul.f32 %v4917_v41, %v605_v54 }
 0x291   :  { %v644_v0 = vadd.f32 %v643_v57, %v629_v61 }
 0x293   :  { %v645_v5 = vadd.f32 %v644_v0, %v630_v29 }
 0x295   :  { %v646_v7 = vadd.f32 %v645_v5, %v631_v3 }
 0x297   :  { %v647_v8 = vrot.slane %v646_v7, 4 }
 0x299   :  { %v648_v18 = vadd.f32 %v647_v8, %v646_v7 }
 0x29b   :  { %v649_v21 = vrot.slane %v648_v18, 2 }
 0x29d   :  { %v650_v22 = vadd.f32 %v649_v21, %v648_v18 }
 0x29f   :  { %v651_v25 = vrot.slane %v650_v22, 1 }
 0x2a1   :  { %v652_v28 = vadd.f32 %v651_v25, %v650_v22 }
 0x2a3   :  { %v654_v30 = vmul.f32 %v4932_v27, %v652_v28 }
 0x2a5   :  { %v4936_v35 = vsub.f32 %v4800_v39, %v654_v30  ;;  %v4939_v36 = vsub.f32 %v4812_v49, %v654_v30  ;;  %v4942_v37 = vsub.f32 %v4809_v48, %v654_v30  ;;  %v4945_v40 = vsub.f32 %v4823_v56, %v654_v30 }
 0x2a6   :  { %v4948_v24 = vsub.f32 %v4841_v6, %v654_v30  ;;  %v4951_v43 = vsub.f32 %v4853_v23, %v654_v30  ;;  %v4954_v50 = vsub.f32 %v4849_v20, %v654_v30  ;;  %v4957_v39 = vsub.f32 %v4861_v31, %v654_v30 }
 0x2a7   :  { %v4960_v49 = vsub.f32 %v4881_v53, %v654_v30  ;;  %v4962_v48 = vsub.f32 %v589_v2, %v654_v30  ;;  %v4965_v56 = vsub.f32 %v4889_v62, %v654_v30  ;;  %v4967_v51 = vsub.f32 %v597_v9, %v654_v30 }
 0x2a8   :  { %v4969_v6 = vsub.f32 %v602_v38, %v654_v30  ;;  %v668_v23 = vsub.f32 %v605_v54, %v654_v30  ;;  %v4971_v57 = vsub.f32 %v610_v47, %v654_v30  ;;  %v4973_v20 = vsub.f32 %v613_v60, %v654_v30 }
 0x2a9   :  { %v671_v31 = vmul.f32 %v4936_v35, %v4936_v35  ;;  %v672_v53 = vmul.f32 %v4939_v36, %v4939_v36  ;;  %v673_v2 = vmul.f32 %v4942_v37, %v4942_v37  ;;  %v674_v38 = vmul.f32 %v4945_v40, %v4945_v40 }
 0x2aa   :  { %v675_v47 = vmul.f32 %v4948_v24, %v4948_v24  ;;  %v676_v61 = vmul.f32 %v4951_v43, %v4951_v43  ;;  %v677_v3 = vmul.f32 %v4954_v50, %v4954_v50  ;;  %v678_v8 = vmul.f32 %v4957_v39, %v4957_v39 }
 0x2ab   :  { %v687_v62 = vmul.f32 %v4804_v45, %v671_v31  ;;  %v688_v9 = vmul.f32 %v4807_v46, %v672_v53  ;;  %v689_v54 = vmul.f32 %v4818_v52, %v673_v2  ;;  %v690_v29 = vmul.f32 %v4829_v58, %v674_v38 }
 0x2ac   :  { %v691_v5 = vmul.f32 %v4837_v1, %v675_v47  ;;  %v692_v18 = vmul.f32 %v4846_v17, %v676_v61  ;;  %v679_v22 = vmul.f32 %v4960_v49, %v4960_v49  ;;  %v693_v25 = vmul.f32 %v4858_v26, %v677_v3 }
 0x2ad   :  { %v703_v60 = vadd.f32 %v688_v9, %v687_v62  ;;  %v680_v30 = vmul.f32 %v4962_v48, %v4962_v48  ;;  %v694_v31 = vmul.f32 %v4869_v34, %v678_v8  ;;  %v681_v2 = vmul.f32 %v4965_v56, %v4965_v56 }
 0x2ae   :  { %v695_v62 = vmul.f32 %v4877_v42, %v679_v22  ;;  %v682_v38 = vmul.f32 %v4967_v51, %v4967_v51 }
 0x2af   :  { %v704_v0 = vadd.f32 %v703_v60, %v689_v54  ;;  %v696_v47 = vmul.f32 %v4886_v59, %v680_v30  ;;  %v683_v60 = vmul.f32 %v4969_v6, %v4969_v6  ;;  %v697_v61 = vmul.f32 %v4896_v4, %v681_v2 }
 0x2b0   :  { %v698_v3 = vmul.f32 %v4904_v19, %v682_v38 }
 0x2b1   :  { %v705_v7 = vadd.f32 %v704_v0, %v690_v29  ;;  %v684_v0 = vmul.f32 %v668_v23, %v668_v23  ;;  %v699_v8 = vmul.f32 %v4912_v33, %v683_v60 }
 0x2b3   :  { %v706_v21 = vadd.f32 %v705_v7, %v691_v5  ;;  %v685_v7 = vmul.f32 %v4971_v57, %v4971_v57  ;;  %v700_v22 = vmul.f32 %v4917_v41, %v684_v0  ;;  %v5027_v0 = vld [vmem:[%s6118_s6] ss:$0 sm:$0xff] }
 0x2b5   :  { %v707_v28 = vadd.f32 %v706_v21, %v692_v18  ;;  %v686_v21 = vmul.f32 %v4973_v20, %v4973_v20 }
 0x2b7   :  { %v708_v53 = vadd.f32 %v707_v28, %v693_v25  ;;  %v701_v28 = vmul.f32 %v4921_v55, %v685_v7 }
 0x2b9   :  { %v709_v9 = vadd.f32 %v708_v53, %v694_v31  ;;  %v702_v31 = vmul.f32 %v4925_v63, %v686_v21  ;;  %v5039_v21 = vld [vmem:[%s6119_s7] ss:$0 sm:$0xff] }
 0x2bb   :  { %v710_v54 = vadd.f32 %v709_v9, %v695_v62 }
 0x2bd   :  { %v711_v29 = vadd.f32 %v710_v54, %v696_v47 }
 0x2bf   :  { %v712_v5 = vadd.f32 %v711_v29, %v697_v61 }
 0x2c1   :  { %v713_v18 = vadd.f32 %v712_v5, %v698_v3 }
 0x2c3   :  { %v714_v25 = vadd.f32 %v713_v18, %v699_v8 }
 0x2c5   :  { %v715_v30 = vadd.f32 %v714_v25, %v700_v22 }
 0x2c7   :  { %v716_v53 = vadd.f32 %v715_v30, %v701_v28 }
 0x2c9   :  { %v717_v2 = vadd.f32 %v716_v53, %v702_v31 }
 0x2cb   :  { %v718_v62 = vrot.slane %v717_v2, 4 }
 0x2cd   :  { %v719_v9 = vadd.f32 %v718_v62, %v717_v2 }
 0x2cf   :  { %v720_v38 = vrot.slane %v719_v9, 2 }
 0x2d1   :  { %v721_v47 = vadd.f32 %v720_v38, %v719_v9 }
 0x2d3   :  { %v722_v54 = vrot.slane %v721_v47, 1 }
 0x2d5   :  { %v723_v60 = vadd.f32 %v722_v54, %v721_v47 }
 0x2d7   :  { %v724_v61 = vmul.f32 %v723_v60, %v4932_v27 }
 0x2d9   :  { %v725_v29 = vadd.f32 1e-05, %v724_v61 }
 0x2db   :  { %4309 = vrsqrt.f32 %v725_v29 }
 0x2e5   :  { %v5022_v3 = vpop.eup %4309 }
 0x2e6   :  { %v740_v5 = vmul.f32 %v5022_v3, %v668_v23  ;;  %v727_v7 = vmul.f32 %v5022_v3, %v4936_v35  ;;  %v728_v8 = vmul.f32 %v5022_v3, %v4939_v36  ;;  %v729_v18 = vmul.f32 %v5022_v3, %v4942_v37 }
 0x2e7   :  { %v730_v22 = vmul.f32 %v5022_v3, %v4945_v40  ;;  %v731_v23 = vmul.f32 %v5022_v3, %v4948_v24  ;;  %v732_v35 = vmul.f32 %v5022_v3, %v4951_v43  ;;  %v733_v36 = vmul.f32 %v5022_v3, %v4954_v50 }
 0x2e8   :  { %v763_v25 = vmul.f32 %v5027_v0, %v740_v5  ;;  %v750_v37 = vmul.f32 %v5027_v0, %v727_v7  ;;  %v751_v28 = vmul.f32 %v5027_v0, %v728_v8  ;;  %v752_v30 = vmul.f32 %v5027_v0, %v729_v18 }
 0x2e9   :  { %v753_v31 = vmul.f32 %v5027_v0, %v730_v22  ;;  %v754_v40 = vmul.f32 %v5027_v0, %v731_v23  ;;  %v755_v24 = vmul.f32 %v5027_v0, %v732_v35  ;;  %v734_v43 = vmul.f32 %v5022_v3, %v4957_v39 }
 0x2ea   :  { %v773_v53 = vadd.f32 %v5039_v21, %v750_v37  ;;  %v774_v50 = vadd.f32 %v5039_v21, %v751_v28  ;;  %v775_v2 = vadd.f32 %v5039_v21, %v752_v30  ;;  %v756_v62 = vmul.f32 %v5027_v0, %v733_v36 }
 0x2eb   :  { %v776_v9 = vadd.f32 %v5039_v21, %v753_v31  ;;  %v777_v38 = vadd.f32 %v5039_v21, %v754_v40  ;;  %v778_v47 = vadd.f32 %v5039_v21, %v755_v24  ;;  %v757_v54 = vmul.f32 %v5027_v0, %v734_v43 }
 0x2ec   :  { %v789_v60 = vmax.f32 %v773_v53, 0.0  ;;  %v790_v61 = vmax.f32 %v774_v50, 0.0  ;;  %v791_v29 = vmax.f32 %v775_v2, 0.0  ;;  %v779_v39 = vadd.f32 %v5039_v21, %v756_v62 }
 0x2ed   :  { %v792_v5 = vmax.f32 %v776_v9, 0.0  ;;  %v793_v7 = vmax.f32 %v777_v38, 0.0  ;;  %v794_v8 = vmax.f32 %v778_v47, 0.0  ;;  %v780_v18 = vadd.f32 %v5039_v21, %v757_v54 }
 0x2ee   :  { %v805_v22 = vmul.f32 %v4804_v45, %v789_v60  ;;  %v806_v23 = vmul.f32 %v4807_v46, %v790_v61  ;;  %v807_v35 = vmul.f32 %v4818_v52, %v791_v29  ;;  %v795_v36 = vmax.f32 %v779_v39, 0.0 }
 0x2ef   :  { %v808_v37 = vmul.f32 %v4829_v58, %v792_v5  ;;  %v809_v28 = vmul.f32 %v4837_v1, %v793_v7  ;;  %v810_v30 = vmul.f32 %v4846_v17, %v794_v8  ;;  %v796_v31 = vmax.f32 %v780_v18, 0.0 }
 0x2f0   :  { %v821_v40 = vpack.c.bf16 %v806_v23, %v805_v22  ;;  %v811_v24 = vmul.f32 %v4858_v26, %v795_v36  ;;  %v735_v43 = vmul.f32 %v5022_v3, %v4960_v49  ;;  %v736_v53 = vmul.f32 %v5022_v3, %v4962_v48 }
 0x2f1   :  { %v822_v50 = vpack.c.bf16 %v808_v37, %v807_v35  ;;  %v823_v2 = vpack.c.bf16 %v810_v30, %v809_v28  ;;  %v812_v62 = vmul.f32 %v4869_v34, %v796_v31  ;;  %v737_v9 = vmul.f32 %v5022_v3, %v4965_v56 }
 0x2f2   :  { %3902 = vmatprep.mubr.bf16.mxu0 %v821_v40  ;;  %v758_v38 = vmul.f32 %v5027_v0, %v735_v43  ;;  %v759_v47 = vmul.f32 %v5027_v0, %v736_v53  ;;  %v738_v54 = vmul.f32 %v5022_v3, %v4967_v51  ;;  %v739_v49 = vmul.f32 %v5022_v3, %v4969_v6 }
 0x2f3   :  { %3903 = vmatmul.mubr.bf16.vlgmr.msra.gmra.mrb[16].mxu0 %v822_v50  ;;  %v824_v48 = vpack.c.bf16 %v812_v62, %v811_v24  ;;  %v760_v60 = vmul.f32 %v5027_v0, %v737_v9  ;;  %v786_v61 = vadd.f32 %v5039_v21, %v763_v25  ;;  %v741_v56 = vmul.f32 %v5022_v3, %v4971_v57 }
 0x2f4   :  { %3906 = vmatprep.mubr.bf16.mxu0 %v823_v2  ;;  %v781_v29 = vadd.f32 %v5039_v21, %v758_v38  ;;  %v782_v39 = vadd.f32 %v5039_v21, %v759_v47  ;;  %v761_v5 = vmul.f32 %v5027_v0, %v738_v54  ;;  %v762_v51 = vmul.f32 %v5027_v0, %v739_v49  ;;  %v3349_v49 = vld [vmem:[%s6117_s5 + $0x1] ss:$0 sm:$0xff] }
 0x2f5   :  { %v783_v6 = vadd.f32 %v5039_v21, %v760_v60  ;;  %v802_v7 = vmax.f32 %v786_v61, 0.0  ;;  %v742_v8 = vmul.f32 %v5022_v3, %v4973_v20  ;;  %v764_v25 = vmul.f32 %v5027_v0, %v741_v56 }
 0x2f6   :  { %v797_v18 = vmax.f32 %v781_v29, 0.0  ;;  %v798_v22 = vmax.f32 %v782_v39, 0.0  ;;  %v784_v57 = vadd.f32 %v5039_v21, %v761_v5  ;;  %v785_v23 = vadd.f32 %v5039_v21, %v762_v51 }
 0x2f7   :  { %v799_v35 = vmax.f32 %v783_v6, 0.0  ;;  %v818_v36 = vmul.f32 %v4917_v41, %v802_v7  ;;  %v765_v37 = vmul.f32 %v5027_v0, %v742_v8  ;;  %v787_v28 = vadd.f32 %v5039_v21, %v764_v25 }
 0x2f8   :  { %v813_v30 = vmul.f32 %v4877_v42, %v797_v18  ;;  %v814_v31 = vmul.f32 %v4886_v59, %v798_v22  ;;  %v800_v20 = vmax.f32 %v784_v57, 0.0  ;;  %v801_v3 = vmax.f32 %v785_v23, 0.0 }
 0x2f9   :  { %v815_v40 = vmul.f32 %v4896_v4, %v799_v35  ;;  %v788_v24 = vadd.f32 %v5039_v21, %v765_v37  ;;  %v803_v43 = vmax.f32 %v787_v28, 0.0 }
 0x2fa   :  { %v825_v53 = vpack.c.bf16 %v814_v31, %v813_v30  ;;  %v816_v50 = vmul.f32 %v4904_v19, %v800_v20  ;;  %v817_v2 = vmul.f32 %v4912_v33, %v801_v3 }
 0x2fb   :  { %3907 = vmatmul.mubr.bf16.gmra.mrb[20].mxu0 %v824_v48  ;;  %v804_v0 = vmax.f32 %v788_v24, 0.0  ;;  %v819_v62 = vmul.f32 %v4921_v55, %v803_v43 }
 0x2fc   :  { %3910 = vmatprep.mubr.bf16.mxu0 %v825_v53  ;;  %v826_v9 = vpack.c.bf16 %v816_v50, %v815_v40  ;;  %v827_v38 = vpack.c.bf16 %v818_v36, %v817_v2 }
 0x2fd   :  { %v820_v47 = vmul.f32 %v4925_v63, %v804_v0 }
 0x2ff   :  { %v828_v54 = vpack.c.bf16 %v820_v47, %v819_v62 }
 0x303   :  { %3911 = vmatmul.mubr.bf16.gmra.mrb[24].mxu0 %v826_v9 }
 0x304   :  { %3914 = vmatprep.mubr.bf16.mxu0 %v827_v38 }
 0x30b   :  { %3915 = vmatmul.mubr.bf16.gmra.mrb[28].mxu0 %v828_v54 }
 0x3c6   :  { %v3904_v21 = vpop.f32.mrb[16].mxu0 }
 0x3c7   :  { %v936_v60 = vpop.f32.mrb[17].mxu0  ;;  %v945_v48 = vadd.f32 %v3904_v21, %v3349_v49 }
 0x3c8   :  { %v3905_v61 = vpop.f32.mrb[18].mxu0  ;;  %v937_v39 = vadd.f32 %v3349_v49, %v936_v60 }
 0x3c9   :  { %v948_v56 = vadd.f32 %v3905_v61, %v3349_v49  ;;  %v939_v29 = vpop.f32.mrb[19].mxu0 }
 0x3ca   :  { %v940_v5 = vadd.f32 %v3349_v49, %v939_v29 }
 0x3cb   :  { %v1000_v51 = vpack.c.bf16 %v948_v56, %v945_v48  ;;  %v4262_v48 = vld [vmem:[#allocation9 + $0x88] sm:$0xff]  }
 0x3cc   :  { %v999_v6 = vpack.c.bf16 %v940_v5, %v937_v39  ;;  %v4267_v5 = vld [vmem:[#allocation9 + $0xb0] sm:$0xff]  }
 0x3ce   :  { %v3908_v7 = vpop.f32.mrb[20].mxu0  ;;  %3918 = vmatprep.subr.bf16.mxu1 %v999_v6 }
 0x3cf   :  { %v952_v8 = vpop.f32.mrb[21].mxu0  ;;  %3919 = vmatpush3.bf16.msra.mxu1 %v999_v6  ;;  %v961_v18 = vadd.f32 %v3908_v7, %v3349_v49 }
 0x3d0   :  { %v3909_v25 = vpop.f32.mrb[22].mxu0  ;;  %3920 = vmatprep.subr.bf16.mxu1 %v1000_v51  ;;  %v953_v23 = vadd.f32 %v3349_v49, %v952_v8 }
 0x3d1   :  { %v964_v22 = vadd.f32 %v3909_v25, %v3349_v49  ;;  %v955_v57 = vpop.f32.mrb[23].mxu0  ;;  %v3599_v25 = vld [vmem:[#allocation10 + $0x50] sm:$0xff]  }
 0x3d2   :  { %v956_v35 = vadd.f32 %v3349_v49, %v955_v57  ;;  %v3600_v57 = vld [vmem:[#allocation10 + $0x58] sm:$0xff]  }
 0x3d3   :  { %v1002_v36 = vpack.c.bf16 %v964_v22, %v961_v18  ;;  %3921 = vmatpush3.bf16.msra.mxu1 %v1000_v51 }
 0x3d4   :  { %v1001_v37 = vpack.c.bf16 %v956_v35, %v953_v23  ;;  %v4268_v23 = vld [vmem:[#allocation9 + $0xb8] sm:$0xff]  }
 0x3d6   :  { %v3912_v28 = vpop.f32.mrb[24].mxu0  ;;  %3922 = vmatprep.subr.bf16.mxu1 %v1001_v37 }
 0x3d7   :  { %v968_v30 = vpop.f32.mrb[25].mxu0  ;;  %3923 = vmatpush3.bf16.msra.mxu1 %v1001_v37  ;;  %v977_v20 = vadd.f32 %v3912_v28, %v3349_v49  ;;  %v3473_v28 = vunpack.c.l.bf16 %v3599_v25 }
 0x3d8   :  { %v3913_v31 = vpop.f32.mrb[26].mxu0  ;;  %3924 = vmatprep.subr.bf16.mxu1 %v1002_v36  ;;  %v969_v24 = vadd.f32 %v3349_v49, %v968_v30 }
 0x3d9   :  { %v980_v3 = vadd.f32 %v3913_v31, %v3349_v49  ;;  %v971_v40 = vpop.f32.mrb[27].mxu0 }
 0x3da   :  { %v972_v43 = vadd.f32 %v3349_v49, %v971_v40  ;;  %v3474_v40 = vunpack.c.h.bf16 %v3599_v25 }
 0x3db   :  { %v1004_v53 = vpack.c.bf16 %v980_v3, %v977_v20  ;;  %3925 = vmatpush3.bf16.msra.mxu1 %v1002_v36  ;;  %v3477_v20 = vunpack.c.l.bf16 %v3600_v57 }
 0x3dc   :  { %v1003_v50 = vpack.c.bf16 %v972_v43, %v969_v24 }
 0x3de   :  { %v3916_v2 = vpop.f32.mrb[28].mxu0  ;;  %3926 = vmatprep.subr.bf16.mxu1 %v1003_v50 }
 0x3df   :  { %v984_v0 = vpop.f32.mrb[29].mxu0  ;;  %3927 = vmatpush3.bf16.msra.mxu1 %v1003_v50  ;;  %v993_v9 = vadd.f32 %v3916_v2, %v3349_v49  ;;  %v3478_v2 = vunpack.c.h.bf16 %v3600_v57 }
 0x3e0   :  { %v3917_v62 = vpop.f32.mrb[30].mxu0  ;;  %3928 = vmatprep.subr.bf16.mxu1 %v1004_v53  ;;  %v985_v54 = vadd.f32 %v3349_v49, %v984_v0 }
 0x3e1   :  { %v996_v38 = vadd.f32 %v3917_v62, %v3349_v49  ;;  %v987_v47 = vpop.f32.mrb[31].mxu0 }
 0x3e2   :  { %v988_v21 = vadd.f32 %v3349_v49, %v987_v47  ;;  %v4261_v49 = vld [vmem:[#allocation9 + $0x80] sm:$0xff]  }
 0x3e3   :  { %v1006_v60 = vpack.c.bf16 %v996_v38, %v993_v9  ;;  %3929 = vmatpush3.bf16.msra.mxu1 %v1004_v53  ;;  %3950 = vmatprep.subr.bf16.mxu0 %v4261_v49  ;;  %v3601_v9 = vld [vmem:[#allocation10 + $0x60] sm:$0xff]  }
 0x3e4   :  { %v1005_v61 = vpack.c.bf16 %v988_v21, %v985_v54  ;;  %3951 = vmatpush3.bf16.msra.mxu0 %v4261_v49 }
 0x3e5   :  { %3952 = vmatprep.subr.bf16.mxu0 %v4262_v48 }
 0x3e6   :  { %3930 = vmatprep.subr.bf16.mxu1 %v1005_v61 }
 0x3e7   :  { %3931 = vmatpush3.bf16.msra.mxu1 %v1005_v61 }
 0x3e8   :  { %3932 = vmatprep.subr.bf16.mxu1 %v1006_v60  ;;  %3953 = vmatpush3.bf16.msra.mxu0 %v4262_v48 }
 0x3eb   :  { %3933 = vmatpush3.bf16.msra.mxu1 %v1006_v60  ;;  %v3602_v60 = vld [vmem:[#allocation10 + $0x68] sm:$0xff]  }
 0x3ee   :  { %3935 = vmatmul.mubr.bf16.vlgmr.msra.gmra.mrb[16].mxu1 %v4764_v10  ;;  %v4263_v10 = vld [vmem:[#allocation9 + $0x90] sm:$0xff]  }
 0x3ef   :  { %3938 = vmatprep.mubr.bf16.mxu1 %v4766_v11  ;;  %3954 = vmatprep.subr.bf16.mxu0 %v4263_v10  ;;  %v4264_v11 = vld [vmem:[#allocation9 + $0x98] sm:$0xff]  }
 0x3f0   :  { %3955 = vmatpush3.bf16.msra.mxu0 %v4263_v10  ;;  %v3481_v10 = vunpack.c.l.bf16 %v3601_v9 }
 0x3f1   :  { %3956 = vmatprep.subr.bf16.mxu0 %v4264_v11 }
 0x3f4   :  { %3957 = vmatpush3.bf16.msra.mxu0 %v4264_v11 }
 0x3f6   :  { %3939 = vmatmul.mubr.bf16.gmra.mrb[20].mxu1 %v4770_v12  ;;  %v3464_v12 = vld [vmem:[#allocation10 + $0x40] sm:$0xff]  }
 0x3f7   :  { %3942 = vmatprep.mubr.bf16.mxu1 %v4772_v13  ;;  %v4265_v13 = vld [vmem:[#allocation9 + $0xa0] sm:$0xff]   ;;  %v3466_v29 = vunpack.c.h.bf16 %v3464_v12 }
 0x3f8   :  { %3958 = vmatprep.subr.bf16.mxu0 %v4265_v13 }
 0x3f9   :  { %3959 = vmatpush3.bf16.msra.mxu0 %v4265_v13  ;;  %v3485_v13 = vunpack.c.l.bf16 %v3602_v60 }
 0x3fe   :  { %3943 = vmatmul.mubr.bf16.gmra.mrb[24].mxu1 %v4776_v14  ;;  %v3598_v14 = vld [vmem:[#allocation10 + $0x48] sm:$0xff]  }
 0x3ff   :  { %3946 = vmatprep.mubr.bf16.mxu1 %v4778_v15  ;;  %v4266_v15 = vld [vmem:[#allocation9 + $0xa8] sm:$0xff]   ;;  %v3469_v56 = vunpack.c.l.bf16 %v3598_v14  ;;  %v3470_v6 = vunpack.c.h.bf16 %v3598_v14 }
 0x400   :  { %3960 = vmatprep.subr.bf16.mxu0 %v4266_v15 }
 0x401   :  { %3961 = vmatpush3.bf16.msra.mxu0 %v4266_v15  ;;  %v3482_v15 = vunpack.c.h.bf16 %v3601_v9 }
 0x402   :  { %3962 = vmatprep.subr.bf16.mxu0 %v4267_v5 }
 0x405   :  { %3963 = vmatpush3.bf16.msra.mxu0 %v4267_v5 }
 0x406   :  { %3947 = vmatmul.mubr.bf16.gmra.mrb[28].mxu1 %v4782_v16  ;;  %v3465_v16 = vunpack.c.l.bf16 %v3464_v12  ;;  %3964 = vmatprep.subr.bf16.mxu0 %v4268_v23 }
 0x407   :  { %3998 = vmatprep.mubr.bf16.mxu1 %v4758_v32 }
 0x409   :  { %3965 = vmatpush3.bf16.msra.mxu0 %v4268_v23 }
 0x4c1   :  { %v3936_v32 = vpop.f32.mrb[16].mxu1 }
 0x4c2   :  { %v1074_v39 = vpop.f32.mrb[17].mxu1  ;;  %v5126_v18 = vadd.f32 %v3936_v32, %v3469_v56 }
 0x4c3   :  { %v5124_v51 = vadd.f32 %v3465_v16, %v1074_v39  ;;  %v3937_v7 = vpop.f32.mrb[18].mxu1  ;;  %v3486_v39 = vunpack.c.h.bf16 %v3602_v60 }
 0x4c4   :  { %v1077_v8 = vpop.f32.mrb[19].mxu1  ;;  %v5132_v36 = vadd.f32 %v3937_v7, %v3470_v6  ;;  %v1139_v30 = vmul.f32 %v4818_v52, %v5126_v18  ;;  %v3603_v7 = vld [vmem:[#allocation10 + $0x70] sm:$0xff]  }
 0x4c5   :  { %v5128_v22 = vadd.f32 %v3466_v29, %v1077_v8  ;;  %v1137_v35 = vmul.f32 %v4804_v45, %v5124_v51 }
 0x4c6   :  { %v1140_v43 = vmul.f32 %v4829_v58, %v5132_v36 }
 0x4c7   :  { %v1138_v37 = vmul.f32 %v4807_v46, %v5128_v22 }
 0x4c9   :  { %v1153_v31 = vadd.f32 %v1138_v37, %v1137_v35  ;;  %v3940_v3 = vpop.f32.mrb[20].mxu1  ;;  %v3604_v35 = vld [vmem:[#allocation10 + $0x78] sm:$0xff]  }
 0x4ca   :  { %v1090_v24 = vpop.f32.mrb[21].mxu1  ;;  %v5142_v38 = vadd.f32 %v3940_v3, %v3477_v20  ;;  %v3494_v9 = vunpack.c.h.bf16 %v3604_v35 }
 0x4cb   :  { %v1154_v53 = vadd.f32 %v1153_v31, %v1139_v30  ;;  %v5140_v50 = vadd.f32 %v3473_v28, %v1090_v24  ;;  %v3941_v0 = vpop.f32.mrb[22].mxu1  ;;  %v3489_v31 = vunpack.c.l.bf16 %v3603_v7 }
 0x4cc   :  { %v1093_v62 = vpop.f32.mrb[23].mxu1  ;;  %v5148_v49 = vadd.f32 %v3941_v0, %v3478_v2  ;;  %v1143_v11 = vmul.f32 %v4858_v26, %v5142_v38 }
 0x4cd   :  { %v1141_v47 = vmul.f32 %v4837_v1, %v5140_v50  ;;  %v1155_v54 = vadd.f32 %v1154_v53, %v1140_v43  ;;  %v5146_v21 = vadd.f32 %v3474_v40, %v1093_v62  ;;  %v3493_v40 = vunpack.c.l.bf16 %v3604_v35 }
 0x4ce   :  { %v1144_v56 = vmul.f32 %v4869_v34, %v5148_v49  ;;  %v3490_v43 = vunpack.c.h.bf16 %v3603_v7 }
 0x4cf   :  { %v1156_v61 = vadd.f32 %v1155_v54, %v1141_v47  ;;  %v1142_v48 = vmul.f32 %v4846_v17, %v5146_v21 }
 0x4d1   :  { %v1157_v12 = vadd.f32 %v1156_v61, %v1142_v48  ;;  %v3944_v14 = vpop.f32.mrb[24].mxu1 }
 0x4d2   :  { %v1106_v16 = vpop.f32.mrb[25].mxu1  ;;  %v1115_v8 = vadd.f32 %v3944_v14, %v3485_v13 }
 0x4d3   :  { %v1158_v32 = vadd.f32 %v1157_v12, %v1143_v11  ;;  %v1107_v29 = vadd.f32 %v3481_v10, %v1106_v16  ;;  %v3945_v5 = vpop.f32.mrb[26].mxu1 }
 0x4d4   :  { %v1109_v6 = vpop.f32.mrb[27].mxu1  ;;  %v1118_v28 = vadd.f32 %v3945_v5, %v3486_v39  ;;  %v1147_v20 = vmul.f32 %v4896_v4, %v1115_v8 }
 0x4d5   :  { %v1145_v25 = vmul.f32 %v4877_v42, %v1107_v29  ;;  %v1159_v57 = vadd.f32 %v1158_v32, %v1144_v56  ;;  %v1110_v23 = vadd.f32 %v3482_v15, %v1109_v6 }
 0x4d6   :  { %v1148_v2 = vmul.f32 %v4904_v19, %v1118_v28 }
 0x4d7   :  { %v1160_v37 = vadd.f32 %v1159_v57, %v1145_v25  ;;  %v1146_v30 = vmul.f32 %v4886_v59, %v1110_v23 }
 0x4d9   :  { %v1161_v3 = vadd.f32 %v1160_v37, %v1146_v30  ;;  %v3948_v24 = vpop.f32.mrb[28].mxu1 }
 0x4da   :  { %v1122_v53 = vpop.f32.mrb[29].mxu1  ;;  %v1131_v60 = vadd.f32 %v3948_v24, %v3493_v40 }
 0x4db   :  { %v1162_v0 = vadd.f32 %v1161_v3, %v1147_v20  ;;  %v1123_v62 = vadd.f32 %v3489_v31, %v1122_v53  ;;  %v3949_v47 = vpop.f32.mrb[30].mxu1 }
 0x4dc   :  { %v1125_v54 = vpop.f32.mrb[31].mxu1  ;;  %v1134_v12 = vadd.f32 %v3949_v47, %v3494_v9  ;;  %v1151_v14 = vmul.f32 %v4921_v55, %v1131_v60 }
 0x4dd   :  { %v1149_v61 = vmul.f32 %v4912_v33, %v1123_v62  ;;  %v1163_v48 = vadd.f32 %v1162_v0, %v1148_v2  ;;  %v1126_v10 = vadd.f32 %v3490_v43, %v1125_v54 }
 0x4de   :  { %v1152_v16 = vmul.f32 %v4925_v63, %v1134_v12 }
 0x4df   :  { %v1164_v11 = vadd.f32 %v1163_v48, %v1149_v61  ;;  %v1150_v13 = vmul.f32 %v4917_v41, %v1126_v10 }
 0x4e1   :  { %v1165_v15 = vadd.f32 %v1164_v11, %v1150_v13 }
 0x4e3   :  { %v1166_v56 = vadd.f32 %v1165_v15, %v1151_v14 }
 0x4e5   :  { %v1167_v32 = vadd.f32 %v1166_v56, %v1152_v16 }
 0x4e7   :  { %v1168_v39 = vrot.slane %v1167_v32, 4 }
 0x4e9   :  { %v1169_v5 = vadd.f32 %v1168_v39, %v1167_v32 }
 0x4eb   :  { %v1170_v6 = vrot.slane %v1169_v5, 2 }
 0x4ed   :  { %v1171_v7 = vadd.f32 %v1170_v6, %v1169_v5 }
 0x4ef   :  { %v1172_v25 = vrot.slane %v1171_v7, 1 }
 0x4f1   :  { %v1173_v57 = vadd.f32 %v1172_v25, %v1171_v7 }
 0x4f3   :  { %v1174_v35 = vmul.f32 %v1173_v57, %v4932_v27 }
 0x4f5   :  { %v5166_v37 = vsub.f32 %v5124_v51, %v1174_v35  ;;  %v5169_v30 = vsub.f32 %v5128_v22, %v1174_v35  ;;  %v5172_v31 = vsub.f32 %v5126_v18, %v1174_v35  ;;  %v5175_v20 = vsub.f32 %v5132_v36, %v1174_v35 }
 0x4f6   :  { %v5178_v3 = vsub.f32 %v5140_v50, %v1174_v35  ;;  %v5181_v40 = vsub.f32 %v5146_v21, %v1174_v35  ;;  %v5184_v24 = vsub.f32 %v5142_v38, %v1174_v35  ;;  %v5187_v51 = vsub.f32 %v5148_v49, %v1174_v35 }
 0x4f7   :  { %v5189_v22 = vsub.f32 %v1107_v29, %v1174_v35  ;;  %v5191_v43 = vsub.f32 %v1110_v23, %v1174_v35  ;;  %v5193_v18 = vsub.f32 %v1115_v8, %v1174_v35  ;;  %v5195_v36 = vsub.f32 %v1118_v28, %v1174_v35 }
 0x4f8   :  { %v5197_v53 = vsub.f32 %v1123_v62, %v1174_v35  ;;  %v1188_v50 = vsub.f32 %v1126_v10, %v1174_v35  ;;  %v5199_v2 = vsub.f32 %v1131_v60, %v1174_v35  ;;  %v5201_v21 = vsub.f32 %v1134_v12, %v1174_v35 }
 0x4f9   :  { %v1191_v38 = vmul.f32 %v5166_v37, %v5166_v37  ;;  %v1192_v49 = vmul.f32 %v5169_v30, %v5169_v30  ;;  %v1193_v29 = vmul.f32 %v5172_v31, %v5172_v31  ;;  %v1194_v28 = vmul.f32 %v5175_v20, %v5175_v20 }
 0x4fa   :  { %v1195_v0 = vmul.f32 %v5178_v3, %v5178_v3  ;;  %v1196_v47 = vmul.f32 %v5181_v40, %v5181_v40  ;;  %v1197_v61 = vmul.f32 %v5184_v24, %v5184_v24  ;;  %v1198_v11 = vmul.f32 %v5187_v51, %v5187_v51 }
 0x4fb   :  { %v1207_v8 = vmul.f32 %v4804_v45, %v1191_v38  ;;  %v1208_v23 = vmul.f32 %v4807_v46, %v1192_v49  ;;  %v1209_v62 = vmul.f32 %v4818_v52, %v1193_v29  ;;  %v1210_v54 = vmul.f32 %v4829_v58, %v1194_v28 }
 0x4fc   :  { %v1211_v48 = vmul.f32 %v4837_v1, %v1195_v0  ;;  %v1212_v12 = vmul.f32 %v4846_v17, %v1196_v47  ;;  %v1199_v14 = vmul.f32 %v5189_v22, %v5189_v22  ;;  %v1213_v15 = vmul.f32 %v4858_v26, %v1197_v61 }
 0x4fd   :  { %v1223_v9 = vadd.f32 %v1208_v23, %v1207_v8  ;;  %v1200_v56 = vmul.f32 %v5191_v43, %v5191_v43  ;;  %v1214_v32 = vmul.f32 %v4869_v34, %v1198_v11  ;;  %v1201_v5 = vmul.f32 %v5193_v18, %v5193_v18 }
 0x4fe   :  { %v1215_v6 = vmul.f32 %v4877_v42, %v1199_v14  ;;  %v1202_v25 = vmul.f32 %v5195_v36, %v5195_v36  ;;  %v1203_v38 = vmul.f32 %v5197_v53, %v5197_v53  ;;  %v1204_v8 = vmul.f32 %v1188_v50, %v1188_v50 }
 0x4ff   :  { %v1224_v60 = vadd.f32 %v1223_v9, %v1209_v62  ;;  %v1216_v57 = vmul.f32 %v4886_v59, %v1200_v56  ;;  %v1217_v49 = vmul.f32 %v4896_v4, %v1201_v5  ;;  %v1205_v0 = vmul.f32 %v5199_v2, %v5199_v2 }
 0x500   :  { %v1218_v23 = vmul.f32 %v4904_v19, %v1202_v25  ;;  %v1219_v62 = vmul.f32 %v4912_v33, %v1203_v38  ;;  %v1206_v47 = vmul.f32 %v5201_v21, %v5201_v21 }
 0x501   :  { %v1225_v10 = vadd.f32 %v1224_v60, %v1210_v54  ;;  %v1220_v54 = vmul.f32 %v4917_v41, %v1204_v8  ;;  %v1221_v61 = vmul.f32 %v4921_v55, %v1205_v0 }
 0x503   :  { %v1226_v13 = vadd.f32 %v1225_v10, %v1211_v48  ;;  %v1222_v10 = vmul.f32 %v4925_v63, %v1206_v47 }
 0x505   :  { %v1227_v16 = vadd.f32 %v1226_v13, %v1212_v12 }
 0x507   :  { %v1228_v39 = vadd.f32 %v1227_v16, %v1213_v15 }
 0x509   :  { %v1229_v7 = vadd.f32 %v1228_v39, %v1214_v32 }
 0x50b   :  { %v1230_v35 = vadd.f32 %v1229_v7, %v1215_v6  ;;  %v5255_v7 = vld [vmem:[%s6118_s6 + $0x1] ss:$0 sm:$0xff] }
 0x50d   :  { %v1231_v29 = vadd.f32 %v1230_v35, %v1216_v57 }
 0x50f   :  { %v1232_v28 = vadd.f32 %v1231_v29, %v1217_v49  ;;  %v5267_v49 = vld [vmem:[%s6119_s7 + $0x1] ss:$0 sm:$0xff] }
 0x511   :  { %v1233_v9 = vadd.f32 %v1232_v28, %v1218_v23 }
 0x513   :  { %v1234_v60 = vadd.f32 %v1233_v9, %v1219_v62 }
 0x515   :  { %v1235_v48 = vadd.f32 %v1234_v60, %v1220_v54 }
 0x517   :  { %v1236_v11 = vadd.f32 %v1235_v48, %v1221_v61 }
 0x519   :  { %v1237_v12 = vadd.f32 %v1236_v11, %v1222_v10 }
 0x51b   :  { %v1238_v13 = vrot.slane %v1237_v12, 4 }
 0x51d   :  { %v1239_v14 = vadd.f32 %v1238_v13, %v1237_v12 }
 0x51f   :  { %v1240_v15 = vrot.slane %v1239_v14, 2 }
 0x521   :  { %v1241_v16 = vadd.f32 %v1240_v15, %v1239_v14 }
 0x523   :  { %v1242_v56 = vrot.slane %v1241_v16, 1 }
 0x525   :  { %v1243_v32 = vadd.f32 %v1242_v56, %v1241_v16 }
 0x527   :  { %v1244_v39 = vmul.f32 %v1243_v32, %v4932_v27 }
 0x529   :  { %v1245_v5 = vadd.f32 1e-05, %v1244_v39 }
 0x52b   :  { %4311 = vrsqrt.f32 %v1245_v5 }
 0x535   :  { %v5250_v6 = vpop.eup %4311 }
 0x536   :  { %v1260_v25 = vmul.f32 %v5250_v6, %v1188_v50  ;;  %v1247_v57 = vmul.f32 %v5250_v6, %v5166_v37  ;;  %v1248_v35 = vmul.f32 %v5250_v6, %v5169_v30  ;;  %v1249_v38 = vmul.f32 %v5250_v6, %v5172_v31 }
 0x537   :  { %v1250_v29 = vmul.f32 %v5250_v6, %v5175_v20  ;;  %v1251_v50 = vmul.f32 %v5250_v6, %v5178_v3  ;;  %v1252_v37 = vmul.f32 %v5250_v6, %v5181_v40  ;;  %v1253_v30 = vmul.f32 %v5250_v6, %v5184_v24 }
 0x538   :  { %v1284_v8 = vmul.f32 %v5255_v7, %v1260_v25  ;;  %v1271_v31 = vmul.f32 %v5255_v7, %v1247_v57  ;;  %v1272_v23 = vmul.f32 %v5255_v7, %v1248_v35  ;;  %v1273_v28 = vmul.f32 %v5255_v7, %v1249_v38 }
 0x539   :  { %v1274_v0 = vmul.f32 %v5255_v7, %v1250_v29  ;;  %v1275_v20 = vmul.f32 %v5255_v7, %v1251_v50  ;;  %v1276_v3 = vmul.f32 %v5255_v7, %v1252_v37  ;;  %v1254_v40 = vmul.f32 %v5250_v6, %v5187_v51 }
 0x53a   :  { %v1295_v62 = vadd.f32 %v5267_v49, %v1271_v31  ;;  %v1296_v24 = vadd.f32 %v5267_v49, %v1272_v23  ;;  %v1297_v9 = vadd.f32 %v5267_v49, %v1273_v28  ;;  %v1277_v47 = vmul.f32 %v5255_v7, %v1253_v30 }
 0x53b   :  { %v1298_v54 = vadd.f32 %v5267_v49, %v1274_v0  ;;  %v1299_v60 = vadd.f32 %v5267_v49, %v1275_v20  ;;  %v1300_v61 = vadd.f32 %v5267_v49, %v1276_v3  ;;  %v1278_v48 = vmul.f32 %v5255_v7, %v1254_v40 }
 0x53c   :  { %v1311_v10 = vmax.f32 %v1295_v62, 0.0  ;;  %v1312_v11 = vmax.f32 %v1296_v24, 0.0  ;;  %v1313_v12 = vmax.f32 %v1297_v9, 0.0  ;;  %v1301_v51 = vadd.f32 %v5267_v49, %v1277_v47 }
 0x53d   :  { %v1314_v13 = vmax.f32 %v1298_v54, 0.0  ;;  %v1315_v14 = vmax.f32 %v1299_v60, 0.0  ;;  %v1316_v15 = vmax.f32 %v1300_v61, 0.0  ;;  %v1302_v16 = vadd.f32 %v5267_v49, %v1278_v48 }
 0x53e   :  { %v1327_v56 = vmul.f32 %v4804_v45, %v1311_v10  ;;  %v1328_v32 = vmul.f32 %v4807_v46, %v1312_v11  ;;  %v1329_v39 = vmul.f32 %v4818_v52, %v1313_v12  ;;  %v1317_v5 = vmax.f32 %v1301_v51, 0.0 }
 0x53f   :  { %v1330_v25 = vmul.f32 %v4829_v58, %v1314_v13  ;;  %v1331_v57 = vmul.f32 %v4837_v1, %v1315_v14  ;;  %v1332_v35 = vmul.f32 %v4846_v17, %v1316_v15  ;;  %v1318_v38 = vmax.f32 %v1302_v16, 0.0 }
 0x540   :  { %v1343_v29 = vpack.c.bf16 %v1328_v32, %v1327_v56  ;;  %v1333_v50 = vmul.f32 %v4858_v26, %v1317_v5  ;;  %v1255_v37 = vmul.f32 %v5250_v6, %v5189_v22  ;;  %v1256_v30 = vmul.f32 %v5250_v6, %v5191_v43 }
 0x541   :  { %v1344_v31 = vpack.c.bf16 %v1330_v25, %v1329_v39  ;;  %v1345_v23 = vpack.c.bf16 %v1332_v35, %v1331_v57  ;;  %v1334_v28 = vmul.f32 %v4869_v34, %v1318_v38  ;;  %v1257_v0 = vmul.f32 %v5250_v6, %v5193_v18 }
 0x542   :  { %3966 = vmatprep.mubr.bf16.mxu0 %v1343_v29  ;;  %v1279_v20 = vmul.f32 %v5255_v7, %v1255_v37  ;;  %v1280_v3 = vmul.f32 %v5255_v7, %v1256_v30  ;;  %v1258_v40 = vmul.f32 %v5250_v6, %v5195_v36  ;;  %v1259_v22 = vmul.f32 %v5250_v6, %v5197_v53  ;;  %v3363_v30 = vld [vmem:[%s6117_s5 + $0x2] ss:$0 sm:$0xff] }
 0x543   :  { %3967 = vmatmul.mubr.bf16.vlgmr.msra.gmra.mrb[32].mxu0 %v1344_v31  ;;  %v1346_v43 = vpack.c.bf16 %v1334_v28, %v1333_v50  ;;  %v1281_v62 = vmul.f32 %v5255_v7, %v1257_v0  ;;  %v1308_v24 = vadd.f32 %v5267_v49, %v1284_v8  ;;  %v1261_v18 = vmul.f32 %v5250_v6, %v5199_v2 }
 0x544   :  { %3970 = vmatprep.mubr.bf16.mxu0 %v1345_v23  ;;  %v1303_v9 = vadd.f32 %v5267_v49, %v1279_v20  ;;  %v1304_v47 = vadd.f32 %v5267_v49, %v1280_v3  ;;  %v1282_v54 = vmul.f32 %v5255_v7, %v1258_v40  ;;  %v1283_v36 = vmul.f32 %v5255_v7, %v1259_v22 }
 0x545   :  { %v1305_v53 = vadd.f32 %v5267_v49, %v1281_v62  ;;  %v1324_v60 = vmax.f32 %v1308_v24, 0.0  ;;  %v1262_v61 = vmul.f32 %v5250_v6, %v5201_v21  ;;  %v1285_v8 = vmul.f32 %v5255_v7, %v1261_v18 }
 0x546   :  { %v1319_v48 = vmax.f32 %v1303_v9, 0.0  ;;  %v1320_v10 = vmax.f32 %v1304_v47, 0.0  ;;  %v1306_v2 = vadd.f32 %v5267_v49, %v1282_v54  ;;  %v1307_v11 = vadd.f32 %v5267_v49, %v1283_v36 }
 0x547   :  { %v1321_v12 = vmax.f32 %v1305_v53, 0.0  ;;  %v1340_v51 = vmul.f32 %v4917_v41, %v1324_v60  ;;  %v1286_v13 = vmul.f32 %v5255_v7, %v1262_v61  ;;  %v1309_v14 = vadd.f32 %v5267_v49, %v1285_v8 }
 0x548   :  { %v1335_v15 = vmul.f32 %v4877_v42, %v1319_v48  ;;  %v1336_v16 = vmul.f32 %v4886_v59, %v1320_v10  ;;  %v1322_v21 = vmax.f32 %v1306_v2, 0.0  ;;  %v1323_v6 = vmax.f32 %v1307_v11, 0.0 }
 0x549   :  { %v1337_v56 = vmul.f32 %v4896_v4, %v1321_v12  ;;  %v1310_v32 = vadd.f32 %v5267_v49, %v1286_v13  ;;  %v1325_v39 = vmax.f32 %v1309_v14, 0.0 }
 0x54a   :  { %v1347_v5 = vpack.c.bf16 %v1336_v16, %v1335_v15  ;;  %v1338_v25 = vmul.f32 %v4904_v19, %v1322_v21  ;;  %v1339_v57 = vmul.f32 %v4912_v33, %v1323_v6 }
 0x54b   :  { %3971 = vmatmul.mubr.bf16.gmra.mrb[36].mxu0 %v1346_v43  ;;  %v1326_v7 = vmax.f32 %v1310_v32, 0.0  ;;  %v1341_v35 = vmul.f32 %v4921_v55, %v1325_v39 }
 0x54c   :  { %3974 = vmatprep.mubr.bf16.mxu0 %v1347_v5  ;;  %v1348_v38 = vpack.c.bf16 %v1338_v25, %v1337_v56  ;;  %v1349_v29 = vpack.c.bf16 %v1340_v51, %v1339_v57 }
 0x54d   :  { %v1342_v50 = vmul.f32 %v4925_v63, %v1326_v7 }
 0x54f   :  { %v1350_v37 = vpack.c.bf16 %v1342_v50, %v1341_v35  ;;  %v5344_v35 = vld [vmem:[#allocation7 + $0x8] sm:$0xff]   ;;  %v5353_v50 = vld [vmem:[#allocation7 + $0x20] sm:$0xff]  }
 0x553   :  { %3975 = vmatmul.mubr.bf16.gmra.mrb[40].mxu0 %v1348_v38  ;;  %v5347_v38 = vld [vmem:[#allocation7 + $0x10] sm:$0xff]  }
 0x554   :  { %3978 = vmatprep.mubr.bf16.mxu0 %v1349_v29  ;;  %v5350_v29 = vld [vmem:[#allocation7 + $0x18] sm:$0xff]  }
 0x55b   :  { %3979 = vmatmul.mubr.bf16.gmra.mrb[44].mxu0 %v1350_v37  ;;  %v5356_v37 = vld [vmem:[#allocation7 + $0x28] sm:$0xff]  }
 0x616   :  { %v3968_v49 = vpop.f32.mrb[32].mxu0 }
 0x617   :  { %v1458_v31 = vpop.f32.mrb[33].mxu0  ;;  %v1467_v28 = vadd.f32 %v3968_v49, %v3363_v30  ;;  %v5359_v49 = vld [vmem:[#allocation7 + $0x30] sm:$0xff]  }
 0x618   :  { %v3969_v23 = vpop.f32.mrb[34].mxu0  ;;  %v1459_v3 = vadd.f32 %v3363_v30, %v1458_v31  ;;  %v5365_v31 = vld [vmem:[#allocation7] sm:$0xff]  }
 0x619   :  { %v1470_v0 = vadd.f32 %v3969_v23, %v3363_v30  ;;  %v1461_v20 = vpop.f32.mrb[35].mxu0  ;;  %v4269_v23 = vld [vmem:[#allocation9 + $0xc0] sm:$0xff]  }
 0x61a   :  { %v1462_v40 = vadd.f32 %v3363_v30, %v1461_v20  ;;  %4014 = vmatprep.subr.bf16.mxu0 %v4269_v23  ;;  %v4272_v20 = vld [vmem:[#allocation9 + $0xd8] sm:$0xff]  }
 0x61b   :  { %v1522_v22 = vpack.c.bf16 %v1470_v0, %v1467_v28  ;;  %4015 = vmatpush3.bf16.msra.mxu0 %v4269_v23  ;;  %v4270_v28 = vld [vmem:[#allocation9 + $0xc8] sm:$0xff]   ;;  %v4271_v0 = vld [vmem:[#allocation9 + $0xd0] sm:$0xff]  }
 0x61c   :  { %v1521_v43 = vpack.c.bf16 %v1462_v40, %v1459_v3  ;;  %4016 = vmatprep.subr.bf16.mxu0 %v4270_v28  ;;  %v3496_v3 = vld [vmem:[#allocation10 + $0x80] sm:$0xff]  }
 0x61d   :  { %v4273_v40 = vld [vmem:[#allocation9 + $0xe0] sm:$0xff]  }
 0x61e   :  { %v3972_v62 = vpop.f32.mrb[36].mxu0  ;;  %3982 = vmatprep.subr.bf16.mxu1 %v1521_v43 }
 0x61f   :  { %v1474_v24 = vpop.f32.mrb[37].mxu0  ;;  %3983 = vmatpush3.bf16.msra.mxu1 %v1521_v43  ;;  %v1483_v9 = vadd.f32 %v3972_v62, %v3363_v30  ;;  %4017 = vmatpush3.bf16.msra.mxu0 %v4270_v28  ;;  %v4274_v43 = vld [vmem:[#allocation9 + $0xe8] sm:$0xff]   ;;  %v3497_v62 = vunpack.c.l.bf16 %v3496_v3  ;;  %v3608_v28 = vld [vmem:[#allocation10 + $0xa0] sm:$0xff]  }
 0x620   :  { %v3973_v18 = vpop.f32.mrb[38].mxu0  ;;  %3984 = vmatprep.subr.bf16.mxu1 %v1522_v22  ;;  %v1475_v36 = vadd.f32 %v3363_v30, %v1474_v24  ;;  %4018 = vmatprep.subr.bf16.mxu0 %v4271_v0 }
 0x621   :  { %v1486_v47 = vadd.f32 %v3973_v18, %v3363_v30  ;;  %v1477_v54 = vpop.f32.mrb[39].mxu0 }
 0x622   :  { %v1478_v53 = vadd.f32 %v3363_v30, %v1477_v54  ;;  %v4275_v54 = vld [vmem:[#allocation9 + $0xf0] sm:$0xff]  }
 0x623   :  { %v1524_v60 = vpack.c.bf16 %v1486_v47, %v1483_v9  ;;  %3985 = vmatpush3.bf16.msra.mxu1 %v1522_v22  ;;  %4019 = vmatpush3.bf16.msra.mxu0 %v4271_v0  ;;  %v3605_v22 = vld [vmem:[#allocation10 + $0x88] sm:$0xff]   ;;  %v3498_v9 = vunpack.c.h.bf16 %v3496_v3 }
 0x624   :  { %v1523_v61 = vpack.c.bf16 %v1478_v53, %v1475_v36  ;;  %4020 = vmatprep.subr.bf16.mxu0 %v4272_v20  ;;  %v3501_v24 = vunpack.c.l.bf16 %v3605_v22  ;;  %v3502_v53 = vunpack.c.h.bf16 %v3605_v22  ;;  %v3609_v22 = vld [vmem:[#allocation10 + $0xa8] sm:$0xff]  }
 0x626   :  { %v3976_v8 = vpop.f32.mrb[40].mxu0  ;;  %3986 = vmatprep.subr.bf16.mxu1 %v1523_v61 }
 0x627   :  { %v1490_v48 = vpop.f32.mrb[41].mxu0  ;;  %3987 = vmatpush3.bf16.msra.mxu1 %v1523_v61  ;;  %v1499_v2 = vadd.f32 %v3976_v8, %v3363_v30  ;;  %4021 = vmatpush3.bf16.msra.mxu0 %v4272_v20  ;;  %v3606_v8 = vld [vmem:[#allocation10 + $0x90] sm:$0xff]  }
 0x628   :  { %v3977_v10 = vpop.f32.mrb[42].mxu0  ;;  %3988 = vmatprep.subr.bf16.mxu1 %v1524_v60  ;;  %v1491_v51 = vadd.f32 %v3363_v30, %v1490_v48  ;;  %4022 = vmatprep.subr.bf16.mxu0 %v4273_v40 }
 0x629   :  { %v1502_v11 = vadd.f32 %v3977_v10, %v3363_v30  ;;  %v1493_v12 = vpop.f32.mrb[43].mxu0 }
 0x62a   :  { %v1494_v13 = vadd.f32 %v3363_v30, %v1493_v12 }
 0x62b   :  { %v1526_v14 = vpack.c.bf16 %v1502_v11, %v1499_v2  ;;  %3989 = vmatpush3.bf16.msra.mxu1 %v1524_v60  ;;  %4023 = vmatpush3.bf16.msra.mxu0 %v4273_v40  ;;  %v3607_v2 = vld [vmem:[#allocation10 + $0x98] sm:$0xff]  }
 0x62c   :  { %v1525_v15 = vpack.c.bf16 %v1494_v13, %v1491_v51  ;;  %4024 = vmatprep.subr.bf16.mxu0 %v4274_v43  ;;  %v4276_v11 = vld [vmem:[#allocation9 + $0xf8] sm:$0xff]  }
 0x62e   :  { %v3980_v16 = vpop.f32.mrb[44].mxu0  ;;  %3990 = vmatprep.subr.bf16.mxu1 %v1525_v15 }
 0x62f   :  { %v1506_v21 = vpop.f32.mrb[45].mxu0  ;;  %3991 = vmatpush3.bf16.msra.mxu1 %v1525_v15  ;;  %v1515_v56 = vadd.f32 %v3980_v16, %v3363_v30  ;;  %4025 = vmatpush3.bf16.msra.mxu0 %v4274_v43 }
 0x630   :  { %v3981_v6 = vpop.f32.mrb[46].mxu0  ;;  %3992 = vmatprep.subr.bf16.mxu1 %v1526_v14  ;;  %v1507_v5 = vadd.f32 %v3363_v30, %v1506_v21  ;;  %4026 = vmatprep.subr.bf16.mxu0 %v4275_v54  ;;  %v3509_v21 = vunpack.c.l.bf16 %v3607_v2 }
 0x631   :  { %v1518_v32 = vadd.f32 %v3981_v6, %v3363_v30  ;;  %v1509_v39 = vpop.f32.mrb[47].mxu0 }
 0x632   :  { %v1510_v25 = vadd.f32 %v3363_v30, %v1509_v39  ;;  %v5362_v30 = vld [vmem:[#allocation7 + $0x38] sm:$0xff]  }
 0x633   :  { %v1528_v57 = vpack.c.bf16 %v1518_v32, %v1515_v56  ;;  %3993 = vmatpush3.bf16.msra.mxu1 %v1526_v14  ;;  %v3505_v14 = vunpack.c.l.bf16 %v3606_v8  ;;  %v3506_v56 = vunpack.c.h.bf16 %v3606_v8  ;;  %4027 = vmatpush3.bf16.msra.mxu0 %v4275_v54  ;;  %v3517_v54 = vunpack.c.l.bf16 %v3609_v22 }
 0x634   :  { %v1527_v7 = vpack.c.bf16 %v1510_v25, %v1507_v5  ;;  %4028 = vmatprep.subr.bf16.mxu0 %v4276_v11 }
 0x636   :  { %3994 = vmatprep.subr.bf16.mxu1 %v1527_v7 }
 0x637   :  { %3995 = vmatpush3.bf16.msra.mxu1 %v1527_v7  ;;  %4029 = vmatpush3.bf16.msra.mxu0 %v4276_v11 }
 0x638   :  { %3996 = vmatprep.subr.bf16.mxu1 %v1528_v57 }
 0x63b   :  { %3997 = vmatpush3.bf16.msra.mxu1 %v1528_v57  ;;  %v3510_v57 = vunpack.c.h.bf16 %v3607_v2 }
 0x63e   :  { %3999 = vmatmul.mubr.bf16.vlgmr.msra.gmra.mrb[32].mxu1 %v5344_v35 }
 0x63f   :  { %4002 = vmatprep.mubr.bf16.mxu1 %v5347_v38 }
 0x646   :  { %4003 = vmatmul.mubr.bf16.gmra.mrb[36].mxu1 %v5350_v29 }
 0x647   :  { %4006 = vmatprep.mubr.bf16.mxu1 %v5353_v50 }
 0x64e   :  { %4007 = vmatmul.mubr.bf16.gmra.mrb[40].mxu1 %v5356_v37 }
 0x64f   :  { %4010 = vmatprep.mubr.bf16.mxu1 %v5359_v49 }
 0x656   :  { %4011 = vmatmul.mubr.bf16.gmra.mrb[44].mxu1 %v5362_v30 }
 0x657   :  { %4062 = vmatprep.mubr.bf16.mxu1 %v5365_v31 }
 0x711   :  { %v4000_v18 = vpop.f32.mrb[32].mxu1 }
 0x712   :  { %v1596_v47 = vpop.f32.mrb[33].mxu1  ;;  %v5370_v48 = vadd.f32 %v4000_v18, %v3501_v24  ;;  %v3513_v18 = vunpack.c.l.bf16 %v3608_v28 }
 0x713   :  { %v5368_v36 = vadd.f32 %v3497_v62, %v1596_v47  ;;  %v4001_v60 = vpop.f32.mrb[34].mxu1 }
 0x714   :  { %v1599_v61 = vpop.f32.mrb[35].mxu1  ;;  %v5376_v51 = vadd.f32 %v4001_v60, %v3502_v53  ;;  %v1661_v15 = vmul.f32 %v4818_v52, %v5370_v48  ;;  %v3514_v60 = vunpack.c.h.bf16 %v3608_v28 }
 0x715   :  { %v5372_v10 = vadd.f32 %v3498_v9, %v1599_v61  ;;  %v1659_v12 = vmul.f32 %v4804_v45, %v5368_v36 }
 0x716   :  { %v1662_v39 = vmul.f32 %v4829_v58, %v5376_v51 }
 0x717   :  { %v1660_v13 = vmul.f32 %v4807_v46, %v5372_v10 }
 0x719   :  { %v1675_v16 = vadd.f32 %v1660_v13, %v1659_v12  ;;  %v4004_v6 = vpop.f32.mrb[36].mxu1  ;;  %v3518_v12 = vunpack.c.h.bf16 %v3609_v22 }
 0x71a   :  { %v1612_v32 = vpop.f32.mrb[37].mxu1  ;;  %v5386_v0 = vadd.f32 %v4004_v6, %v3509_v21 }
 0x71b   :  { %v1676_v5 = vadd.f32 %v1675_v16, %v1661_v15  ;;  %v5384_v25 = vadd.f32 %v3505_v14, %v1612_v32  ;;  %v4005_v7 = vpop.f32.mrb[38].mxu1  ;;  %v3610_v15 = vld [vmem:[#allocation10 + $0xb0] sm:$0xff]   ;;  %v3611_v32 = vld [vmem:[#allocation10 + $0xb8] sm:$0xff]  }
 0x71c   :  { %v1615_v23 = vpop.f32.mrb[39].mxu1  ;;  %v5392_v62 = vadd.f32 %v4005_v7, %v3510_v57  ;;  %v1665_v9 = vmul.f32 %v4858_v26, %v5386_v0  ;;  %v3521_v7 = vunpack.c.l.bf16 %v3610_v15  ;;  %v3522_v22 = vunpack.c.h.bf16 %v3610_v15 }
 0x71d   :  { %v1663_v20 = vmul.f32 %v4837_v1, %v5384_v25  ;;  %v1677_v3 = vadd.f32 %v1676_v5, %v1662_v39  ;;  %v5390_v40 = vadd.f32 %v3506_v56, %v1615_v23 }
 0x71e   :  { %v1666_v8 = vmul.f32 %v4869_v34, %v5392_v62 }
 0x71f   :  { %v1678_v43 = vadd.f32 %v1677_v3, %v1663_v20  ;;  %v1664_v24 = vmul.f32 %v4846_v17, %v5390_v40  ;;  %v3525_v20 = vunpack.c.l.bf16 %v3611_v32 }
 0x721   :  { %v1679_v47 = vadd.f32 %v1678_v43, %v1664_v24  ;;  %v4008_v53 = vpop.f32.mrb[40].mxu1 }
 0x722   :  { %v1628_v61 = vpop.f32.mrb[41].mxu1  ;;  %v1637_v16 = vadd.f32 %v4008_v53, %v3517_v54 }
 0x723   :  { %v1680_v2 = vadd.f32 %v1679_v47, %v1665_v9  ;;  %v1629_v11 = vadd.f32 %v3513_v18, %v1628_v61  ;;  %v4009_v13 = vpop.f32.mrb[42].mxu1  ;;  %v3526_v47 = vunpack.c.h.bf16 %v3611_v32 }
 0x724   :  { %v1631_v14 = vpop.f32.mrb[43].mxu1  ;;  %v1640_v5 = vadd.f32 %v4009_v13, %v3518_v12  ;;  %v1669_v23 = vmul.f32 %v4896_v4, %v1637_v16 }
 0x725   :  { %v1667_v21 = vmul.f32 %v4877_v42, %v1629_v11  ;;  %v1681_v6 = vadd.f32 %v1680_v2, %v1666_v8  ;;  %v1632_v56 = vadd.f32 %v3514_v60, %v1631_v14 }
 0x726   :  { %v1670_v24 = vmul.f32 %v4904_v19, %v1640_v5 }
 0x727   :  { %v1682_v39 = vadd.f32 %v1681_v6, %v1667_v21  ;;  %v1668_v57 = vmul.f32 %v4886_v59, %v1632_v56 }
 0x729   :  { %v1683_v28 = vadd.f32 %v1682_v39, %v1668_v57  ;;  %v4012_v3 = vpop.f32.mrb[44].mxu1 }
 0x72a   :  { %v1644_v43 = vpop.f32.mrb[45].mxu1  ;;  %v1653_v60 = vadd.f32 %v4012_v3, %v3525_v20 }
 0x72b   :  { %v1684_v18 = vadd.f32 %v1683_v28, %v1669_v23  ;;  %v1645_v9 = vadd.f32 %v3521_v7, %v1644_v43  ;;  %v4013_v54 = vpop.f32.mrb[46].mxu1 }
 0x72c   :  { %v1647_v53 = vpop.f32.mrb[47].mxu1  ;;  %v1656_v13 = vadd.f32 %v4013_v54, %v3526_v47  ;;  %v1673_v21 = vmul.f32 %v4921_v55, %v1653_v60 }
 0x72d   :  { %v1671_v61 = vmul.f32 %v4912_v33, %v1645_v9  ;;  %v1685_v8 = vadd.f32 %v1684_v18, %v1670_v24  ;;  %v1648_v2 = vadd.f32 %v3522_v22, %v1647_v53 }
 0x72e   :  { %v1674_v6 = vmul.f32 %v4925_v63, %v1656_v13 }
 0x72f   :  { %v1686_v12 = vadd.f32 %v1685_v8, %v1671_v61  ;;  %v1672_v14 = vmul.f32 %v4917_v41, %v1648_v2 }
 0x731   :  { %v1687_v15 = vadd.f32 %v1686_v12, %v1672_v14 }
 0x733   :  { %v1688_v39 = vadd.f32 %v1687_v15, %v1673_v21 }
 0x735   :  { %v1689_v57 = vadd.f32 %v1688_v39, %v1674_v6 }
 0x737   :  { %v1690_v7 = vrot.slane %v1689_v57, 4 }
 0x739   :  { %v1691_v32 = vadd.f32 %v1690_v7, %v1689_v57 }
 0x73b   :  { %v1692_v23 = vrot.slane %v1691_v32, 2 }
 0x73d   :  { %v1693_v28 = vadd.f32 %v1692_v23, %v1691_v32 }
 0x73f   :  { %v1694_v20 = vrot.slane %v1693_v28, 1 }
 0x741   :  { %v1695_v3 = vadd.f32 %v1694_v20, %v1693_v28 }
 0x743   :  { %v1696_v43 = vmul.f32 %v1695_v3, %v4932_v27 }
 0x745   :  { %v5410_v22 = vsub.f32 %v5368_v36, %v1696_v43  ;;  %v5413_v24 = vsub.f32 %v5372_v10, %v1696_v43  ;;  %v5416_v18 = vsub.f32 %v5370_v48, %v1696_v43  ;;  %v5419_v47 = vsub.f32 %v5376_v51, %v1696_v43 }
 0x746   :  { %v5422_v54 = vsub.f32 %v5384_v25, %v1696_v43  ;;  %v5425_v53 = vsub.f32 %v5390_v40, %v1696_v43  ;;  %v5428_v61 = vsub.f32 %v5386_v0, %v1696_v43  ;;  %v5431_v36 = vsub.f32 %v5392_v62, %v1696_v43 }
 0x747   :  { %v5433_v10 = vsub.f32 %v1629_v11, %v1696_v43  ;;  %v5435_v8 = vsub.f32 %v1632_v56, %v1696_v43  ;;  %v5437_v48 = vsub.f32 %v1637_v16, %v1696_v43  ;;  %v5439_v51 = vsub.f32 %v1640_v5, %v1696_v43 }
 0x748   :  { %v5441_v12 = vsub.f32 %v1645_v9, %v1696_v43  ;;  %v1710_v25 = vsub.f32 %v1648_v2, %v1696_v43  ;;  %v5443_v14 = vsub.f32 %v1653_v60, %v1696_v43  ;;  %v5445_v40 = vsub.f32 %v1656_v13, %v1696_v43 }
 0x749   :  { %v1713_v0 = vmul.f32 %v5410_v22, %v5410_v22  ;;  %v1714_v62 = vmul.f32 %v5413_v24, %v5413_v24  ;;  %v1715_v11 = vmul.f32 %v5416_v18, %v5416_v18  ;;  %v1716_v5 = vmul.f32 %v5419_v47, %v5419_v47 }
 0x74a   :  { %v1717_v9 = vmul.f32 %v5422_v54, %v5422_v54  ;;  %v1718_v13 = vmul.f32 %v5425_v53, %v5425_v53  ;;  %v1719_v6 = vmul.f32 %v5428_v61, %v5428_v61  ;;  %v1720_v7 = vmul.f32 %v5431_v36, %v5431_v36 }
 0x74b   :  { %v1729_v16 = vmul.f32 %v4804_v45, %v1713_v0  ;;  %v1730_v56 = vmul.f32 %v4807_v46, %v1714_v62  ;;  %v1731_v60 = vmul.f32 %v4818_v52, %v1715_v11  ;;  %v1732_v21 = vmul.f32 %v4829_v58, %v1716_v5 }
 0x74c   :  { %v1733_v39 = vmul.f32 %v4837_v1, %v1717_v9  ;;  %v1734_v32 = vmul.f32 %v4846_v17, %v1718_v13  ;;  %v1721_v28 = vmul.f32 %v5433_v10, %v5433_v10  ;;  %v1735_v20 = vmul.f32 %v4858_v26, %v1719_v6 }
 0x74d   :  { %v1745_v2 = vadd.f32 %v1730_v56, %v1729_v16  ;;  %v1722_v43 = vmul.f32 %v5435_v8, %v5435_v8  ;;  %v1736_v0 = vmul.f32 %v4869_v34, %v1720_v7  ;;  %v1723_v11 = vmul.f32 %v5437_v48, %v5437_v48 }
 0x74e   :  { %v1737_v16 = vmul.f32 %v4877_v42, %v1721_v28  ;;  %v1724_v5 = vmul.f32 %v5439_v51, %v5439_v51 }
 0x74f   :  { %v1746_v15 = vadd.f32 %v1745_v2, %v1731_v60  ;;  %v1738_v9 = vmul.f32 %v4886_v59, %v1722_v43  ;;  %v1725_v2 = vmul.f32 %v5441_v12, %v5441_v12  ;;  %v1739_v13 = vmul.f32 %v4896_v4, %v1723_v11 }
 0x750   :  { %v1740_v6 = vmul.f32 %v4904_v19, %v1724_v5 }
 0x751   :  { %v1747_v57 = vadd.f32 %v1746_v15, %v1732_v21  ;;  %v1726_v15 = vmul.f32 %v1710_v25, %v1710_v25  ;;  %v1741_v7 = vmul.f32 %v4912_v33, %v1725_v2 }
 0x753   :  { %v1748_v23 = vadd.f32 %v1747_v57, %v1733_v39  ;;  %v1727_v57 = vmul.f32 %v5443_v14, %v5443_v14  ;;  %v1742_v28 = vmul.f32 %v4917_v41, %v1726_v15  ;;  %v5499_v15 = vld [vmem:[%s6118_s6 + $0x2] ss:$0 sm:$0xff] }
 0x755   :  { %v1749_v3 = vadd.f32 %v1748_v23, %v1734_v32  ;;  %v1728_v23 = vmul.f32 %v5445_v40, %v5445_v40 }
 0x757   :  { %v1750_v62 = vadd.f32 %v1749_v3, %v1735_v20  ;;  %v1743_v3 = vmul.f32 %v4921_v55, %v1727_v57 }
 0x759   :  { %v1751_v56 = vadd.f32 %v1750_v62, %v1736_v0  ;;  %v1744_v0 = vmul.f32 %v4925_v63, %v1728_v23  ;;  %v5511_v23 = vld [vmem:[%s6119_s7 + $0x2] ss:$0 sm:$0xff] }
 0x75b   :  { %v1752_v60 = vadd.f32 %v1751_v56, %v1737_v16 }
 0x75d   :  { %v1753_v21 = vadd.f32 %v1752_v60, %v1738_v9 }
 0x75f   :  { %v1754_v39 = vadd.f32 %v1753_v21, %v1739_v13 }
 0x761   :  { %v1755_v32 = vadd.f32 %v1754_v39, %v1740_v6 }
 0x763   :  { %v1756_v20 = vadd.f32 %v1755_v32, %v1741_v7 }
 0x765   :  { %v1757_v43 = vadd.f32 %v1756_v20, %v1742_v28 }
 0x767   :  { %v1758_v62 = vadd.f32 %v1757_v43, %v1743_v3 }
 0x769   :  { %v1759_v11 = vadd.f32 %v1758_v62, %v1744_v0 }
 0x76b   :  { %v1760_v16 = vrot.slane %v1759_v11, 4 }
 0x76d   :  { %v1761_v56 = vadd.f32 %v1760_v16, %v1759_v11 }
 0x76f   :  { %v1762_v5 = vrot.slane %v1761_v56, 2 }
 0x771   :  { %v1763_v9 = vadd.f32 %v1762_v5, %v1761_v56 }
 0x773   :  { %v1764_v60 = vrot.slane %v1763_v9, 1 }
 0x775   :  { %v1765_v2 = vadd.f32 %v1764_v60, %v1763_v9 }
 0x777   :  { %v1766_v13 = vmul.f32 %v1765_v2, %v4932_v27 }
 0x779   :  { %v1767_v21 = vadd.f32 1e-05, %v1766_v13 }
 0x77b   :  { %4313 = vrsqrt.f32 %v1767_v21 }
 0x785   :  { %v5494_v6 = vpop.eup %4313 }
 0x786   :  { %v1782_v39 = vmul.f32 %v5494_v6, %v1710_v25  ;;  %v1769_v57 = vmul.f32 %v5494_v6, %v5410_v22  ;;  %v1770_v7 = vmul.f32 %v5494_v6, %v5413_v24  ;;  %v1771_v32 = vmul.f32 %v5494_v6, %v5416_v18 }
 0x787   :  { %v1772_v28 = vmul.f32 %v5494_v6, %v5419_v47  ;;  %v1773_v25 = vmul.f32 %v5494_v6, %v5422_v54  ;;  %v1774_v22 = vmul.f32 %v5494_v6, %v5425_v53  ;;  %v1775_v24 = vmul.f32 %v5494_v6, %v5428_v61 }
 0x788   :  { %v1806_v20 = vmul.f32 %v5499_v15, %v1782_v39  ;;  %v1793_v18 = vmul.f32 %v5499_v15, %v1769_v57  ;;  %v1794_v3 = vmul.f32 %v5499_v15, %v1770_v7  ;;  %v1795_v43 = vmul.f32 %v5499_v15, %v1771_v32 }
 0x789   :  { %v1796_v0 = vmul.f32 %v5499_v15, %v1772_v28  ;;  %v1797_v47 = vmul.f32 %v5499_v15, %v1773_v25  ;;  %v1798_v54 = vmul.f32 %v5499_v15, %v1774_v22  ;;  %v1776_v53 = vmul.f32 %v5494_v6, %v5431_v36 }
 0x78a   :  { %v1817_v62 = vadd.f32 %v5511_v23, %v1793_v18  ;;  %v1818_v61 = vadd.f32 %v5511_v23, %v1794_v3  ;;  %v1819_v11 = vadd.f32 %v5511_v23, %v1795_v43  ;;  %v1799_v16 = vmul.f32 %v5499_v15, %v1775_v24 }
 0x78b   :  { %v1820_v56 = vadd.f32 %v5511_v23, %v1796_v0  ;;  %v1821_v5 = vadd.f32 %v5511_v23, %v1797_v47  ;;  %v1822_v9 = vadd.f32 %v5511_v23, %v1798_v54  ;;  %v1800_v60 = vmul.f32 %v5499_v15, %v1776_v53 }
 0x78c   :  { %v1833_v2 = vmax.f32 %v1817_v62, 0.0  ;;  %v1834_v13 = vmax.f32 %v1818_v61, 0.0  ;;  %v1835_v21 = vmax.f32 %v1819_v11, 0.0  ;;  %v1823_v36 = vadd.f32 %v5511_v23, %v1799_v16 }
 0x78d   :  { %v1836_v39 = vmax.f32 %v1820_v56, 0.0  ;;  %v1837_v57 = vmax.f32 %v1821_v5, 0.0  ;;  %v1838_v7 = vmax.f32 %v1822_v9, 0.0  ;;  %v1824_v32 = vadd.f32 %v5511_v23, %v1800_v60 }
 0x78e   :  { %v1849_v28 = vmul.f32 %v4804_v45, %v1833_v2  ;;  %v1850_v25 = vmul.f32 %v4807_v46, %v1834_v13  ;;  %v1851_v22 = vmul.f32 %v4818_v52, %v1835_v21  ;;  %v1839_v24 = vmax.f32 %v1823_v36, 0.0 }
 0x78f   :  { %v1852_v18 = vmul.f32 %v4829_v58, %v1836_v39  ;;  %v1853_v3 = vmul.f32 %v4837_v1, %v1837_v57  ;;  %v1854_v43 = vmul.f32 %v4846_v17, %v1838_v7  ;;  %v1840_v0 = vmax.f32 %v1824_v32, 0.0 }
 0x790   :  { %v1865_v47 = vpack.c.bf16 %v1850_v25, %v1849_v28  ;;  %v1855_v54 = vmul.f32 %v4858_v26, %v1839_v24  ;;  %v1777_v53 = vmul.f32 %v5494_v6, %v5433_v10  ;;  %v1778_v62 = vmul.f32 %v5494_v6, %v5435_v8 }
 0x791   :  { %v1866_v61 = vpack.c.bf16 %v1852_v18, %v1851_v22  ;;  %v1867_v11 = vpack.c.bf16 %v1854_v43, %v1853_v3  ;;  %v1856_v16 = vmul.f32 %v4869_v34, %v1840_v0  ;;  %v1779_v56 = vmul.f32 %v5494_v6, %v5437_v48 }
 0x792   :  { %4030 = vmatprep.mubr.bf16.mxu0 %v1865_v47  ;;  %v1801_v5 = vmul.f32 %v5499_v15, %v1777_v53  ;;  %v1802_v9 = vmul.f32 %v5499_v15, %v1778_v62  ;;  %v1780_v60 = vmul.f32 %v5494_v6, %v5439_v51  ;;  %v1781_v10 = vmul.f32 %v5494_v6, %v5441_v12 }
 0x793   :  { %4031 = vmatmul.mubr.bf16.vlgmr.msra.gmra.mrb[48].mxu0 %v1866_v61  ;;  %v1868_v8 = vpack.c.bf16 %v1856_v16, %v1855_v54  ;;  %v1803_v2 = vmul.f32 %v5499_v15, %v1779_v56  ;;  %v1830_v13 = vadd.f32 %v5511_v23, %v1806_v20  ;;  %v1783_v48 = vmul.f32 %v5494_v6, %v5443_v14 }
 0x794   :  { %4034 = vmatprep.mubr.bf16.mxu0 %v1867_v11  ;;  %v1825_v21 = vadd.f32 %v5511_v23, %v1801_v5  ;;  %v1826_v36 = vadd.f32 %v5511_v23, %v1802_v9  ;;  %v1804_v39 = vmul.f32 %v5499_v15, %v1780_v60  ;;  %v1805_v51 = vmul.f32 %v5499_v15, %v1781_v10  ;;  %v3377_v10 = vld [vmem:[%s6117_s5 + $0x3] ss:$0 sm:$0xff] }
 0x795   :  { %v1827_v12 = vadd.f32 %v5511_v23, %v1803_v2  ;;  %v1846_v57 = vmax.f32 %v1830_v13, 0.0  ;;  %v1784_v7 = vmul.f32 %v5494_v6, %v5445_v40  ;;  %v1807_v20 = vmul.f32 %v5499_v15, %v1783_v48 }
 0x796   :  { %v1841_v32 = vmax.f32 %v1825_v21, 0.0  ;;  %v1842_v28 = vmax.f32 %v1826_v36, 0.0  ;;  %v1828_v14 = vadd.f32 %v5511_v23, %v1804_v39  ;;  %v1829_v25 = vadd.f32 %v5511_v23, %v1805_v51 }
 0x797   :  { %v1843_v22 = vmax.f32 %v1827_v12, 0.0  ;;  %v1862_v24 = vmul.f32 %v4917_v41, %v1846_v57  ;;  %v1808_v18 = vmul.f32 %v5499_v15, %v1784_v7  ;;  %v1831_v3 = vadd.f32 %v5511_v23, %v1807_v20 }
 0x798   :  { %v1857_v43 = vmul.f32 %v4877_v42, %v1841_v32  ;;  %v1858_v0 = vmul.f32 %v4886_v59, %v1842_v28  ;;  %v1844_v40 = vmax.f32 %v1828_v14, 0.0  ;;  %v1845_v6 = vmax.f32 %v1829_v25, 0.0 }
 0x799   :  { %v1859_v47 = vmul.f32 %v4896_v4, %v1843_v22  ;;  %v1832_v54 = vadd.f32 %v5511_v23, %v1808_v18  ;;  %v1847_v53 = vmax.f32 %v1831_v3, 0.0 }
 0x79a   :  { %v1869_v62 = vpack.c.bf16 %v1858_v0, %v1857_v43  ;;  %v1860_v61 = vmul.f32 %v4904_v19, %v1844_v40  ;;  %v1861_v11 = vmul.f32 %v4912_v33, %v1845_v6 }
 0x79b   :  { %4035 = vmatmul.mubr.bf16.gmra.mrb[52].mxu0 %v1868_v8  ;;  %v1848_v15 = vmax.f32 %v1832_v54, 0.0  ;;  %v1863_v16 = vmul.f32 %v4921_v55, %v1847_v53 }
 0x79c   :  { %4038 = vmatprep.mubr.bf16.mxu0 %v1869_v62  ;;  %v1870_v56 = vpack.c.bf16 %v1860_v61, %v1859_v47  ;;  %v1871_v5 = vpack.c.bf16 %v1862_v24, %v1861_v11 }
 0x79d   :  { %v1864_v9 = vmul.f32 %v4925_v63, %v1848_v15 }
 0x79f   :  { %v1872_v60 = vpack.c.bf16 %v1864_v9, %v1863_v16 }
 0x7a3   :  { %4039 = vmatmul.mubr.bf16.gmra.mrb[56].mxu0 %v1870_v56 }
 0x7a4   :  { %4042 = vmatprep.mubr.bf16.mxu0 %v1871_v5 }
 0x7ab   :  { %4043 = vmatmul.mubr.bf16.gmra.mrb[60].mxu0 %v1872_v60 }
 0x866   :  { %v4032_v23 = vpop.f32.mrb[48].mxu0 }
 0x867   :  { %v1980_v2 = vpop.f32.mrb[49].mxu0  ;;  %v1989_v8 = vadd.f32 %v4032_v23, %v3377_v10 }
 0x868   :  { %v4033_v13 = vpop.f32.mrb[50].mxu0  ;;  %v1981_v36 = vadd.f32 %v3377_v10, %v1980_v2 }
 0x869   :  { %v1992_v48 = vadd.f32 %v4033_v13, %v3377_v10  ;;  %v1983_v21 = vpop.f32.mrb[51].mxu0 }
 0x86a   :  { %v1984_v39 = vadd.f32 %v3377_v10, %v1983_v21 }
 0x86b   :  { %v2044_v51 = vpack.c.bf16 %v1992_v48, %v1989_v8  ;;  %v4278_v8 = vld [vmem:[#allocation9 + $0x108] sm:$0xff]  }
 0x86c   :  { %v2043_v12 = vpack.c.bf16 %v1984_v39, %v1981_v36  ;;  %v4283_v39 = vld [vmem:[#allocation9 + $0x130] sm:$0xff]  }
 0x86e   :  { %v4036_v57 = vpop.f32.mrb[52].mxu0  ;;  %4046 = vmatprep.subr.bf16.mxu1 %v2043_v12 }
 0x86f   :  { %v1996_v7 = vpop.f32.mrb[53].mxu0  ;;  %4047 = vmatpush3.bf16.msra.mxu1 %v2043_v12  ;;  %v2005_v32 = vadd.f32 %v4036_v57, %v3377_v10 }
 0x870   :  { %v4037_v20 = vpop.f32.mrb[54].mxu0  ;;  %4048 = vmatprep.subr.bf16.mxu1 %v2044_v51  ;;  %v1997_v25 = vadd.f32 %v3377_v10, %v1996_v7 }
 0x871   :  { %v2008_v28 = vadd.f32 %v4037_v20, %v3377_v10  ;;  %v1999_v14 = vpop.f32.mrb[55].mxu0  ;;  %v3613_v20 = vld [vmem:[#allocation10 + $0xd0] sm:$0xff]  }
 0x872   :  { %v2000_v22 = vadd.f32 %v3377_v10, %v1999_v14  ;;  %v3614_v14 = vld [vmem:[#allocation10 + $0xd8] sm:$0xff]  }
 0x873   :  { %v2046_v24 = vpack.c.bf16 %v2008_v28, %v2005_v32  ;;  %4049 = vmatpush3.bf16.msra.mxu1 %v2044_v51 }
 0x874   :  { %v2045_v18 = vpack.c.bf16 %v2000_v22, %v1997_v25  ;;  %v4284_v25 = vld [vmem:[#allocation9 + $0x138] sm:$0xff]  }
 0x876   :  { %v4040_v3 = vpop.f32.mrb[56].mxu0  ;;  %4050 = vmatprep.subr.bf16.mxu1 %v2045_v18 }
 0x877   :  { %v2012_v43 = vpop.f32.mrb[57].mxu0  ;;  %4051 = vmatpush3.bf16.msra.mxu1 %v2045_v18  ;;  %v2021_v40 = vadd.f32 %v4040_v3, %v3377_v10  ;;  %v3537_v3 = vunpack.c.l.bf16 %v3613_v20 }
 0x878   :  { %v4041_v0 = vpop.f32.mrb[58].mxu0  ;;  %4052 = vmatprep.subr.bf16.mxu1 %v2046_v24  ;;  %v2013_v54 = vadd.f32 %v3377_v10, %v2012_v43 }
 0x879   :  { %v2024_v6 = vadd.f32 %v4041_v0, %v3377_v10  ;;  %v2015_v47 = vpop.f32.mrb[59].mxu0 }
 0x87a   :  { %v2016_v53 = vadd.f32 %v3377_v10, %v2015_v47  ;;  %v3538_v47 = vunpack.c.h.bf16 %v3613_v20 }
 0x87b   :  { %v2048_v62 = vpack.c.bf16 %v2024_v6, %v2021_v40  ;;  %4053 = vmatpush3.bf16.msra.mxu1 %v2046_v24  ;;  %v3541_v40 = vunpack.c.l.bf16 %v3614_v14 }
 0x87c   :  { %v2047_v61 = vpack.c.bf16 %v2016_v53, %v2013_v54 }
 0x87e   :  { %v4044_v11 = vpop.f32.mrb[60].mxu0  ;;  %4054 = vmatprep.subr.bf16.mxu1 %v2047_v61 }
 0x87f   :  { %v2028_v15 = vpop.f32.mrb[61].mxu0  ;;  %4055 = vmatpush3.bf16.msra.mxu1 %v2047_v61  ;;  %v2037_v56 = vadd.f32 %v4044_v11, %v3377_v10  ;;  %v3542_v11 = vunpack.c.h.bf16 %v3614_v14 }
 0x880   :  { %v4045_v16 = vpop.f32.mrb[62].mxu0  ;;  %4056 = vmatprep.subr.bf16.mxu1 %v2048_v62  ;;  %v2029_v60 = vadd.f32 %v3377_v10, %v2028_v15 }
 0x881   :  { %v2040_v5 = vadd.f32 %v4045_v16, %v3377_v10  ;;  %v2031_v9 = vpop.f32.mrb[63].mxu0 }
 0x882   :  { %v2032_v23 = vadd.f32 %v3377_v10, %v2031_v9  ;;  %v4277_v10 = vld [vmem:[#allocation9 + $0x100] sm:$0xff]  }
 0x883   :  { %v2050_v2 = vpack.c.bf16 %v2040_v5, %v2037_v56  ;;  %4057 = vmatpush3.bf16.msra.mxu1 %v2048_v62  ;;  %4078 = vmatprep.subr.bf16.mxu0 %v4277_v10  ;;  %v3615_v56 = vld [vmem:[#allocation10 + $0xe0] sm:$0xff]  }
 0x884   :  { %v2049_v13 = vpack.c.bf16 %v2032_v23, %v2029_v60  ;;  %4079 = vmatpush3.bf16.msra.mxu0 %v4277_v10 }
 0x885   :  { %4080 = vmatprep.subr.bf16.mxu0 %v4278_v8 }
 0x886   :  { %4058 = vmatprep.subr.bf16.mxu1 %v2049_v13 }
 0x887   :  { %4059 = vmatpush3.bf16.msra.mxu1 %v2049_v13 }
 0x888   :  { %4060 = vmatprep.subr.bf16.mxu1 %v2050_v2  ;;  %4081 = vmatpush3.bf16.msra.mxu0 %v4278_v8 }
 0x88b   :  { %4061 = vmatpush3.bf16.msra.mxu1 %v2050_v2  ;;  %v3616_v2 = vld [vmem:[#allocation10 + $0xe8] sm:$0xff]  }
 0x88e   :  { %4063 = vmatmul.mubr.bf16.vlgmr.msra.gmra.mrb[48].mxu1 %v5344_v35  ;;  %v4279_v35 = vld [vmem:[#allocation9 + $0x110] sm:$0xff]  }
 0x88f   :  { %4066 = vmatprep.mubr.bf16.mxu1 %v5347_v38  ;;  %4082 = vmatprep.subr.bf16.mxu0 %v4279_v35  ;;  %v4280_v38 = vld [vmem:[#allocation9 + $0x118] sm:$0xff]  }
 0x890   :  { %4083 = vmatpush3.bf16.msra.mxu0 %v4279_v35  ;;  %v3545_v35 = vunpack.c.l.bf16 %v3615_v56 }
 0x891   :  { %4084 = vmatprep.subr.bf16.mxu0 %v4280_v38 }
 0x894   :  { %4085 = vmatpush3.bf16.msra.mxu0 %v4280_v38 }
 0x896   :  { %4067 = vmatmul.mubr.bf16.gmra.mrb[52].mxu1 %v5350_v29  ;;  %v3528_v29 = vld [vmem:[#allocation10 + $0xc0] sm:$0xff]  }
 0x897   :  { %4070 = vmatprep.mubr.bf16.mxu1 %v5353_v50  ;;  %v4281_v50 = vld [vmem:[#allocation9 + $0x120] sm:$0xff]   ;;  %v3530_v21 = vunpack.c.h.bf16 %v3528_v29 }
 0x898   :  { %4086 = vmatprep.subr.bf16.mxu0 %v4281_v50 }
 0x899   :  { %4087 = vmatpush3.bf16.msra.mxu0 %v4281_v50  ;;  %v3549_v50 = vunpack.c.l.bf16 %v3616_v2 }
 0x89e   :  { %4071 = vmatmul.mubr.bf16.gmra.mrb[56].mxu1 %v5356_v37  ;;  %v3612_v37 = vld [vmem:[#allocation10 + $0xc8] sm:$0xff]  }
 0x89f   :  { %4074 = vmatprep.mubr.bf16.mxu1 %v5359_v49  ;;  %v4282_v49 = vld [vmem:[#allocation9 + $0x128] sm:$0xff]   ;;  %v3533_v48 = vunpack.c.l.bf16 %v3612_v37  ;;  %v3534_v12 = vunpack.c.h.bf16 %v3612_v37 }
 0x8a0   :  { %4088 = vmatprep.subr.bf16.mxu0 %v4282_v49 }
 0x8a1   :  { %4089 = vmatpush3.bf16.msra.mxu0 %v4282_v49  ;;  %v3546_v49 = vunpack.c.h.bf16 %v3615_v56 }
 0x8a2   :  { %4090 = vmatprep.subr.bf16.mxu0 %v4283_v39 }
 0x8a5   :  { %4091 = vmatpush3.bf16.msra.mxu0 %v4283_v39 }
 0x8a6   :  { %4075 = vmatmul.mubr.bf16.gmra.mrb[60].mxu1 %v5362_v30  ;;  %v3529_v30 = vunpack.c.l.bf16 %v3528_v29  ;;  %4092 = vmatprep.subr.bf16.mxu0 %v4284_v25 }
 0x8a7   :  { %4126 = vmatprep.mubr.bf16.mxu1 %v5365_v31 }
 0x8a9   :  { %4093 = vmatpush3.bf16.msra.mxu0 %v4284_v25 }
 0x8aa   :  { %4142 = vmatprep.subr.bf16.mxu0 %v4555_v44 }
 0x961   :  { %v4064_v31 = vpop.f32.mrb[48].mxu1 }
 0x962   :  { %v2118_v36 = vpop.f32.mrb[49].mxu1  ;;  %v5598_v32 = vadd.f32 %v4064_v31, %v3533_v48 }
 0x963   :  { %v5596_v51 = vadd.f32 %v3529_v30, %v2118_v36  ;;  %v4065_v57 = vpop.f32.mrb[50].mxu1  ;;  %v3550_v36 = vunpack.c.h.bf16 %v3616_v2 }
 0x964   :  { %v2121_v7 = vpop.f32.mrb[51].mxu1  ;;  %v5604_v24 = vadd.f32 %v4065_v57, %v3534_v12  ;;  %v2183_v43 = vmul.f32 %v4818_v52, %v5598_v32  ;;  %v3617_v57 = vld [vmem:[#allocation10 + $0xf0] sm:$0xff]  }
 0x965   :  { %v5600_v28 = vadd.f32 %v3530_v21, %v2121_v7  ;;  %v2181_v22 = vmul.f32 %v4804_v45, %v5596_v51 }
 0x966   :  { %v2184_v53 = vmul.f32 %v4829_v58, %v5604_v24 }
 0x967   :  { %v2182_v18 = vmul.f32 %v4807_v46, %v5600_v28 }
 0x969   :  { %v2197_v0 = vadd.f32 %v2182_v18, %v2181_v22  ;;  %v4068_v6 = vpop.f32.mrb[52].mxu1  ;;  %v3618_v22 = vld [vmem:[#allocation10 + $0xf8] sm:$0xff]  }
 0x96a   :  { %v2134_v54 = vpop.f32.mrb[53].mxu1  ;;  %v5614_v5 = vadd.f32 %v4068_v6, %v3541_v40  ;;  %v3558_v56 = vunpack.c.h.bf16 %v3618_v22 }
 0x96b   :  { %v2198_v62 = vadd.f32 %v2197_v0, %v2183_v43  ;;  %v5612_v61 = vadd.f32 %v3537_v3, %v2134_v54  ;;  %v4069_v15 = vpop.f32.mrb[54].mxu1  ;;  %v3553_v0 = vunpack.c.l.bf16 %v3617_v57 }
 0x96c   :  { %v2137_v16 = vpop.f32.mrb[55].mxu1  ;;  %v5621_v10 = vadd.f32 %v4069_v15, %v3542_v11  ;;  %v2187_v38 = vmul.f32 %v4858_v26, %v5614_v5 }
 0x96d   :  { %v2185_v9 = vmul.f32 %v4837_v1, %v5612_v61  ;;  %v2199_v60 = vadd.f32 %v2198_v62, %v2184_v53  ;;  %v5618_v23 = vadd.f32 %v3538_v47, %v2137_v16  ;;  %v3557_v47 = vunpack.c.l.bf16 %v3618_v22 }
 0x96e   :  { %v2188_v48 = vmul.f32 %v4869_v34, %v5621_v10  ;;  %v3554_v53 = vunpack.c.h.bf16 %v3617_v57 }
 0x96f   :  { %v2200_v13 = vadd.f32 %v2199_v60, %v2185_v9  ;;  %v2186_v8 = vmul.f32 %v4846_v17, %v5618_v23 }
 0x971   :  { %v2201_v29 = vadd.f32 %v2200_v13, %v2186_v8  ;;  %v4072_v37 = vpop.f32.mrb[56].mxu1 }
 0x972   :  { %v2150_v30 = vpop.f32.mrb[57].mxu1  ;;  %v2159_v7 = vadd.f32 %v4072_v37, %v3549_v50 }
 0x973   :  { %v2202_v31 = vadd.f32 %v2201_v29, %v2187_v38  ;;  %v2151_v21 = vadd.f32 %v3545_v35, %v2150_v30  ;;  %v4073_v39 = vpop.f32.mrb[58].mxu1 }
 0x974   :  { %v2153_v12 = vpop.f32.mrb[59].mxu1  ;;  %v2162_v3 = vadd.f32 %v4073_v39, %v3550_v36  ;;  %v2191_v40 = vmul.f32 %v4896_v4, %v2159_v7 }
 0x975   :  { %v2189_v20 = vmul.f32 %v4877_v42, %v2151_v21  ;;  %v2203_v14 = vadd.f32 %v2202_v31, %v2188_v48  ;;  %v2154_v25 = vadd.f32 %v3546_v49, %v2153_v12 }
 0x976   :  { %v2192_v11 = vmul.f32 %v4904_v19, %v2162_v3 }
 0x977   :  { %v2204_v18 = vadd.f32 %v2203_v14, %v2189_v20  ;;  %v2190_v43 = vmul.f32 %v4886_v59, %v2154_v25 }
 0x979   :  { %v2205_v6 = vadd.f32 %v2204_v18, %v2190_v43  ;;  %v4076_v54 = vpop.f32.mrb[60].mxu1 }
 0x97a   :  { %v2166_v62 = vpop.f32.mrb[61].mxu1  ;;  %v2175_v2 = vadd.f32 %v4076_v54, %v3557_v47 }
 0x97b   :  { %v2206_v15 = vadd.f32 %v2205_v6, %v2191_v40  ;;  %v2167_v16 = vadd.f32 %v3553_v0, %v2166_v62  ;;  %v4077_v9 = vpop.f32.mrb[62].mxu1 }
 0x97c   :  { %v2169_v60 = vpop.f32.mrb[63].mxu1  ;;  %v2178_v29 = vadd.f32 %v4077_v9, %v3558_v56  ;;  %v2195_v37 = vmul.f32 %v4921_v55, %v2175_v2 }
 0x97d   :  { %v2193_v13 = vmul.f32 %v4912_v33, %v2167_v16  ;;  %v2207_v8 = vadd.f32 %v2206_v15, %v2192_v11  ;;  %v2170_v35 = vadd.f32 %v3554_v53, %v2169_v60 }
 0x97e   :  { %v2196_v30 = vmul.f32 %v4925_v63, %v2178_v29 }
 0x97f   :  { %v2208_v38 = vadd.f32 %v2207_v8, %v2193_v13  ;;  %v2194_v50 = vmul.f32 %v4917_v41, %v2170_v35 }
 0x981   :  { %v2209_v49 = vadd.f32 %v2208_v38, %v2194_v50 }
 0x983   :  { %v2210_v48 = vadd.f32 %v2209_v49, %v2195_v37 }
 0x985   :  { %v2211_v31 = vadd.f32 %v2210_v48, %v2196_v30 }
 0x987   :  { %v2212_v36 = vrot.slane %v2211_v31, 4 }
 0x989   :  { %v2213_v39 = vadd.f32 %v2212_v36, %v2211_v31 }
 0x98b   :  { %v2214_v12 = vrot.slane %v2213_v39, 2 }
 0x98d   :  { %v2215_v57 = vadd.f32 %v2214_v12, %v2213_v39 }
 0x98f   :  { %v2216_v20 = vrot.slane %v2215_v57, 1 }
 0x991   :  { %v2217_v14 = vadd.f32 %v2216_v20, %v2215_v57 }
 0x993   :  { %v2218_v22 = vmul.f32 %v2217_v14, %v4932_v27 }
 0x995   :  { %v5639_v18 = vsub.f32 %v5596_v51, %v2218_v22  ;;  %v5642_v43 = vsub.f32 %v5600_v28, %v2218_v22  ;;  %v5645_v0 = vsub.f32 %v5598_v32, %v2218_v22  ;;  %v5648_v40 = vsub.f32 %v5604_v24, %v2218_v22 }
 0x996   :  { %v5651_v6 = vsub.f32 %v5612_v61, %v2218_v22  ;;  %v5654_v47 = vsub.f32 %v5618_v23, %v2218_v22  ;;  %v5657_v54 = vsub.f32 %v5614_v5, %v2218_v22  ;;  %v5660_v51 = vsub.f32 %v5621_v10, %v2218_v22 }
 0x997   :  { %v5662_v28 = vsub.f32 %v2151_v21, %v2218_v22  ;;  %v5664_v53 = vsub.f32 %v2154_v25, %v2218_v22  ;;  %v5666_v32 = vsub.f32 %v2159_v7, %v2218_v22  ;;  %v5668_v24 = vsub.f32 %v2162_v3, %v2218_v22 }
 0x998   :  { %v5670_v62 = vsub.f32 %v2167_v16, %v2218_v22  ;;  %v2232_v61 = vsub.f32 %v2170_v35, %v2218_v22  ;;  %v5672_v11 = vsub.f32 %v2175_v2, %v2218_v22  ;;  %v5674_v23 = vsub.f32 %v2178_v29, %v2218_v22 }
 0x999   :  { %v2235_v5 = vmul.f32 %v5639_v18, %v5639_v18  ;;  %v2236_v10 = vmul.f32 %v5642_v43, %v5642_v43  ;;  %v2237_v21 = vmul.f32 %v5645_v0, %v5645_v0  ;;  %v2238_v3 = vmul.f32 %v5648_v40, %v5648_v40 }
 0x99a   :  { %v2239_v15 = vmul.f32 %v5651_v6, %v5651_v6  ;;  %v2240_v9 = vmul.f32 %v5654_v47, %v5654_v47  ;;  %v2241_v13 = vmul.f32 %v5657_v54, %v5657_v54  ;;  %v2242_v38 = vmul.f32 %v5660_v51, %v5660_v51 }
 0x99b   :  { %v2251_v7 = vmul.f32 %v4804_v45, %v2235_v5  ;;  %v2252_v25 = vmul.f32 %v4807_v46, %v2236_v10  ;;  %v2253_v16 = vmul.f32 %v4818_v52, %v2237_v21  ;;  %v2254_v60 = vmul.f32 %v4829_v58, %v2238_v3 }
 0x99c   :  { %v2255_v8 = vmul.f32 %v4837_v1, %v2239_v15  ;;  %v2256_v29 = vmul.f32 %v4846_v17, %v2240_v9  ;;  %v2243_v37 = vmul.f32 %v5662_v28, %v5662_v28  ;;  %v2257_v49 = vmul.f32 %v4858_v26, %v2241_v13 }
 0x99d   :  { %v2267_v56 = vadd.f32 %v2252_v25, %v2251_v7  ;;  %v2244_v48 = vmul.f32 %v5664_v53, %v5664_v53  ;;  %v2258_v31 = vmul.f32 %v4869_v34, %v2242_v38  ;;  %v2245_v39 = vmul.f32 %v5666_v32, %v5666_v32 }
 0x99e   :  { %v2259_v12 = vmul.f32 %v4877_v42, %v2243_v37  ;;  %v2246_v20 = vmul.f32 %v5668_v24, %v5668_v24  ;;  %v2247_v5 = vmul.f32 %v5670_v62, %v5670_v62  ;;  %v2248_v7 = vmul.f32 %v2232_v61, %v2232_v61 }
 0x99f   :  { %v2268_v2 = vadd.f32 %v2267_v56, %v2253_v16  ;;  %v2260_v14 = vmul.f32 %v4886_v59, %v2244_v48  ;;  %v2261_v10 = vmul.f32 %v4896_v4, %v2245_v39  ;;  %v2249_v15 = vmul.f32 %v5672_v11, %v5672_v11 }
 0x9a0   :  { %v2262_v25 = vmul.f32 %v4904_v19, %v2246_v20  ;;  %v2263_v16 = vmul.f32 %v4912_v33, %v2247_v5  ;;  %v2250_v9 = vmul.f32 %v5674_v23, %v5674_v23 }
 0x9a1   :  { %v2269_v35 = vadd.f32 %v2268_v2, %v2254_v60  ;;  %v2264_v60 = vmul.f32 %v4917_v41, %v2248_v7  ;;  %v2265_v13 = vmul.f32 %v4921_v55, %v2249_v15 }
 0x9a3   :  { %v2270_v50 = vadd.f32 %v2269_v35, %v2255_v8  ;;  %v2266_v35 = vmul.f32 %v4925_v63, %v2250_v9 }
 0x9a5   :  { %v2271_v30 = vadd.f32 %v2270_v50, %v2256_v29 }
 0x9a7   :  { %v2272_v36 = vadd.f32 %v2271_v30, %v2257_v49 }
 0x9a9   :  { %v2273_v57 = vadd.f32 %v2272_v36, %v2258_v31 }
 0x9ab   :  { %v2274_v22 = vadd.f32 %v2273_v57, %v2259_v12  ;;  %v5728_v57 = vld [vmem:[%s6118_s6 + $0x3] ss:$0 sm:$0xff] }
 0x9ad   :  { %v2275_v21 = vadd.f32 %v2274_v22, %v2260_v14 }
 0x9af   :  { %v2276_v3 = vadd.f32 %v2275_v21, %v2261_v10  ;;  %v5740_v10 = vld [vmem:[%s6119_s7 + $0x3] ss:$0 sm:$0xff] }
 0x9b1   :  { %v2277_v56 = vadd.f32 %v2276_v3, %v2262_v25 }
 0x9b3   :  { %v2278_v2 = vadd.f32 %v2277_v56, %v2263_v16 }
 0x9b5   :  { %v2279_v8 = vadd.f32 %v2278_v2, %v2264_v60 }
 0x9b7   :  { %v2280_v38 = vadd.f32 %v2279_v8, %v2265_v13 }
 0x9b9   :  { %v2281_v29 = vadd.f32 %v2280_v38, %v2266_v35 }
 0x9bb   :  { %v2282_v50 = vrot.slane %v2281_v29, 4 }
 0x9bd   :  { %v2283_v37 = vadd.f32 %v2282_v50, %v2281_v29 }
 0x9bf   :  { %v2284_v49 = vrot.slane %v2283_v37, 2 }
 0x9c1   :  { %v2285_v30 = vadd.f32 %v2284_v49, %v2283_v37 }
 0x9c3   :  { %v2286_v48 = vrot.slane %v2285_v30, 1 }
 0x9c5   :  { %v2287_v31 = vadd.f32 %v2286_v48, %v2285_v30 }
 0x9c7   :  { %v2288_v36 = vmul.f32 %v2287_v31, %v4932_v27 }
 0x9c9   :  { %v2289_v39 = vadd.f32 1e-05, %v2288_v36 }
 0x9cb   :  { %4315 = vrsqrt.f32 %v2289_v39 }
 0x9d5   :  { %v5723_v12 = vpop.eup %4315 }
 0x9d6   :  { %v2304_v20 = vmul.f32 %v5723_v12, %v2232_v61  ;;  %v2291_v14 = vmul.f32 %v5723_v12, %v5639_v18  ;;  %v2292_v22 = vmul.f32 %v5723_v12, %v5642_v43  ;;  %v2293_v5 = vmul.f32 %v5723_v12, %v5645_v0 }
 0x9d7   :  { %v2294_v21 = vmul.f32 %v5723_v12, %v5648_v40  ;;  %v2295_v61 = vmul.f32 %v5723_v12, %v5651_v6  ;;  %v2296_v18 = vmul.f32 %v5723_v12, %v5654_v47  ;;  %v2297_v43 = vmul.f32 %v5723_v12, %v5657_v54 }
 0x9d8   :  { %v2328_v7 = vmul.f32 %v5728_v57, %v2304_v20  ;;  %v2315_v0 = vmul.f32 %v5728_v57, %v2291_v14  ;;  %v2316_v25 = vmul.f32 %v5728_v57, %v2292_v22  ;;  %v2317_v3 = vmul.f32 %v5728_v57, %v2293_v5 }
 0x9d9   :  { %v2318_v15 = vmul.f32 %v5728_v57, %v2294_v21  ;;  %v2319_v40 = vmul.f32 %v5728_v57, %v2295_v61  ;;  %v2320_v6 = vmul.f32 %v5728_v57, %v2296_v18  ;;  %v2298_v47 = vmul.f32 %v5723_v12, %v5660_v51 }
 0x9da   :  { %v2339_v16 = vadd.f32 %v5740_v10, %v2315_v0  ;;  %v2340_v54 = vadd.f32 %v5740_v10, %v2316_v25  ;;  %v2341_v56 = vadd.f32 %v5740_v10, %v2317_v3  ;;  %v2321_v9 = vmul.f32 %v5728_v57, %v2297_v43 }
 0x9db   :  { %v2342_v60 = vadd.f32 %v5740_v10, %v2318_v15  ;;  %v2343_v2 = vadd.f32 %v5740_v10, %v2319_v40  ;;  %v2344_v13 = vadd.f32 %v5740_v10, %v2320_v6  ;;  %v2322_v8 = vmul.f32 %v5728_v57, %v2298_v47 }
 0x9dc   :  { %v2355_v35 = vmax.f32 %v2339_v16, 0.0  ;;  %v2356_v38 = vmax.f32 %v2340_v54, 0.0  ;;  %v2357_v29 = vmax.f32 %v2341_v56, 0.0  ;;  %v2345_v51 = vadd.f32 %v5740_v10, %v2321_v9 }
 0x9dd   :  { %v2358_v50 = vmax.f32 %v2342_v60, 0.0  ;;  %v2359_v37 = vmax.f32 %v2343_v2, 0.0  ;;  %v2360_v49 = vmax.f32 %v2344_v13, 0.0  ;;  %v2346_v30 = vadd.f32 %v5740_v10, %v2322_v8 }
 0x9de   :  { %v2371_v48 = vmul.f32 %v4804_v45, %v2355_v35  ;;  %v2372_v31 = vmul.f32 %v4807_v46, %v2356_v38  ;;  %v2373_v36 = vmul.f32 %v4818_v52, %v2357_v29  ;;  %v2361_v39 = vmax.f32 %v2345_v51, 0.0 }
 0x9df   :  { %v2374_v20 = vmul.f32 %v4829_v58, %v2358_v50  ;;  %v2375_v14 = vmul.f32 %v4837_v1, %v2359_v37  ;;  %v2376_v22 = vmul.f32 %v4846_v17, %v2360_v49  ;;  %v2362_v5 = vmax.f32 %v2346_v30, 0.0 }
 0x9e0   :  { %v2387_v21 = vpack.c.bf16 %v2372_v31, %v2371_v48  ;;  %v2377_v61 = vmul.f32 %v4858_v26, %v2361_v39  ;;  %v2299_v18 = vmul.f32 %v5723_v12, %v5662_v28  ;;  %v2300_v43 = vmul.f32 %v5723_v12, %v5664_v53 }
 0x9e1   :  { %v2388_v0 = vpack.c.bf16 %v2374_v20, %v2373_v36  ;;  %v2389_v25 = vpack.c.bf16 %v2376_v22, %v2375_v14  ;;  %v2378_v3 = vmul.f32 %v4869_v34, %v2362_v5  ;;  %v2301_v15 = vmul.f32 %v5723_v12, %v5666_v32 }
 0x9e2   :  { %4094 = vmatprep.mubr.bf16.mxu0 %v2387_v21  ;;  %v2323_v40 = vmul.f32 %v5728_v57, %v2299_v18  ;;  %v2324_v6 = vmul.f32 %v5728_v57, %v2300_v43  ;;  %v2302_v47 = vmul.f32 %v5723_v12, %v5668_v24  ;;  %v2303_v28 = vmul.f32 %v5723_v12, %v5670_v62  ;;  %v3391_v43 = vld [vmem:[%s6117_s5 + $0x4] ss:$0 sm:$0xff] }
 0x9e3   :  { %4095 = vmatmul.mubr.bf16.vlgmr.msra.gmra.mrb[64].mxu0 %v2388_v0  ;;  %v2390_v53 = vpack.c.bf16 %v2378_v3, %v2377_v61  ;;  %v2325_v16 = vmul.f32 %v5728_v57, %v2301_v15  ;;  %v2352_v54 = vadd.f32 %v5740_v10, %v2328_v7  ;;  %v2305_v32 = vmul.f32 %v5723_v12, %v5672_v11 }
 0x9e4   :  { %4098 = vmatprep.mubr.bf16.mxu0 %v2389_v25  ;;  %v2347_v56 = vadd.f32 %v5740_v10, %v2323_v40  ;;  %v2348_v9 = vadd.f32 %v5740_v10, %v2324_v6  ;;  %v2326_v60 = vmul.f32 %v5728_v57, %v2302_v47  ;;  %v2327_v24 = vmul.f32 %v5728_v57, %v2303_v28 }
 0x9e5   :  { %v2349_v62 = vadd.f32 %v5740_v10, %v2325_v16  ;;  %v2368_v2 = vmax.f32 %v2352_v54, 0.0  ;;  %v2306_v13 = vmul.f32 %v5723_v12, %v5674_v23  ;;  %v2329_v7 = vmul.f32 %v5728_v57, %v2305_v32 }
 0x9e6   :  { %v2363_v8 = vmax.f32 %v2347_v56, 0.0  ;;  %v2364_v35 = vmax.f32 %v2348_v9, 0.0  ;;  %v2350_v11 = vadd.f32 %v5740_v10, %v2326_v60  ;;  %v2351_v38 = vadd.f32 %v5740_v10, %v2327_v24 }
 0x9e7   :  { %v2365_v29 = vmax.f32 %v2349_v62, 0.0  ;;  %v2384_v51 = vmul.f32 %v4917_v41, %v2368_v2  ;;  %v2330_v50 = vmul.f32 %v5728_v57, %v2306_v13  ;;  %v2353_v37 = vadd.f32 %v5740_v10, %v2329_v7 }
 0x9e8   :  { %v2379_v49 = vmul.f32 %v4877_v42, %v2363_v8  ;;  %v2380_v30 = vmul.f32 %v4886_v59, %v2364_v35  ;;  %v2366_v23 = vmax.f32 %v2350_v11, 0.0  ;;  %v2367_v12 = vmax.f32 %v2351_v38, 0.0 }
 0x9e9   :  { %v2381_v48 = vmul.f32 %v4896_v4, %v2365_v29  ;;  %v2354_v31 = vadd.f32 %v5740_v10, %v2330_v50  ;;  %v2369_v36 = vmax.f32 %v2353_v37, 0.0 }
 0x9ea   :  { %v2391_v39 = vpack.c.bf16 %v2380_v30, %v2379_v49  ;;  %v2382_v20 = vmul.f32 %v4904_v19, %v2366_v23  ;;  %v2383_v14 = vmul.f32 %v4912_v33, %v2367_v12 }
 0x9eb   :  { %4099 = vmatmul.mubr.bf16.gmra.mrb[68].mxu0 %v2390_v53  ;;  %v2370_v57 = vmax.f32 %v2354_v31, 0.0  ;;  %v2385_v22 = vmul.f32 %v4921_v55, %v2369_v36 }
 0x9ec   :  { %4102 = vmatprep.mubr.bf16.mxu0 %v2391_v39  ;;  %v2392_v5 = vpack.c.bf16 %v2382_v20, %v2381_v48  ;;  %v2393_v21 = vpack.c.bf16 %v2384_v51, %v2383_v14 }
 0x9ed   :  { %v2386_v61 = vmul.f32 %v4925_v63, %v2370_v57 }
 0x9ef   :  { %v2394_v18 = vpack.c.bf16 %v2386_v61, %v2385_v22  ;;  %v4327_v22 = vld [vmem:[#allocation7 + $0x8] sm:$0xff]   ;;  %v4330_v61 = vld [vmem:[#allocation7 + $0x20] sm:$0xff]  }
 0x9f3   :  { %4103 = vmatmul.mubr.bf16.gmra.mrb[72].mxu0 %v2392_v5  ;;  %v4328_v5 = vld [vmem:[#allocation7 + $0x10] sm:$0xff]  }
 0x9f4   :  { %4106 = vmatprep.mubr.bf16.mxu0 %v2393_v21  ;;  %v4329_v21 = vld [vmem:[#allocation7 + $0x18] sm:$0xff]  }
 0x9fb   :  { %4107 = vmatmul.mubr.bf16.gmra.mrb[76].mxu0 %v2394_v18  ;;  %v4331_v18 = vld [vmem:[#allocation7 + $0x28] sm:$0xff]  }
 0x9fc   :  { %4158 = vmatprep.mubr.msk.bf16.mxu0 %vm4556_vm0, %v4555_v44 }
 0xab6   :  { %v4096_v10 = vpop.f32.mrb[64].mxu0 }
 0xab7   :  { %v2502_v0 = vpop.f32.mrb[65].mxu0  ;;  %v2511_v3 = vadd.f32 %v4096_v10, %v3391_v43  ;;  %v4332_v10 = vld [vmem:[#allocation7 + $0x30] sm:$0xff]  }
 0xab8   :  { %v4097_v25 = vpop.f32.mrb[66].mxu0  ;;  %v2503_v6 = vadd.f32 %v3391_v43, %v2502_v0  ;;  %v3560_v0 = vld [vmem:[#allocation10 + $0x100] sm:$0xff]  }
 0xab9   :  { %v2514_v15 = vadd.f32 %v4097_v25, %v3391_v43  ;;  %v2505_v40 = vpop.f32.mrb[67].mxu0  ;;  %v3619_v25 = vld [vmem:[#allocation10 + $0x108] sm:$0xff]  }
 0xaba   :  { %v2506_v47 = vadd.f32 %v3391_v43, %v2505_v40 }
 0xabb   :  { %v2566_v28 = vpack.c.bf16 %v2514_v15, %v2511_v3  ;;  %v3561_v3 = vunpack.c.l.bf16 %v3560_v0  ;;  %v3565_v15 = vunpack.c.l.bf16 %v3619_v25 }
 0xabc   :  { %v2565_v53 = vpack.c.bf16 %v2506_v47, %v2503_v6  ;;  %v3562_v6 = vunpack.c.h.bf16 %v3560_v0 }
 0xabe   :  { %v4100_v16 = vpop.f32.mrb[68].mxu0  ;;  %4110 = vmatprep.subr.bf16.mxu1 %v2565_v53 }
 0xabf   :  { %v2518_v54 = vpop.f32.mrb[69].mxu0  ;;  %4111 = vmatpush3.bf16.msra.mxu1 %v2565_v53  ;;  %v2527_v56 = vadd.f32 %v4100_v16, %v3391_v43  ;;  %v3566_v53 = vunpack.c.h.bf16 %v3619_v25 }
 0xac0   :  { %v4101_v32 = vpop.f32.mrb[70].mxu0  ;;  %4112 = vmatprep.subr.bf16.mxu1 %v2566_v28  ;;  %v2519_v24 = vadd.f32 %v3391_v43, %v2518_v54 }
 0xac1   :  { %v2530_v9 = vadd.f32 %v4101_v32, %v3391_v43  ;;  %v2521_v60 = vpop.f32.mrb[71].mxu0  ;;  %v3620_v32 = vld [vmem:[#allocation10 + $0x110] sm:$0xff]  }
 0xac2   :  { %v2522_v62 = vadd.f32 %v3391_v43, %v2521_v60  ;;  %v3621_v60 = vld [vmem:[#allocation10 + $0x118] sm:$0xff]  }
 0xac3   :  { %v2568_v2 = vpack.c.bf16 %v2530_v9, %v2527_v56  ;;  %4113 = vmatpush3.bf16.msra.mxu1 %v2566_v28 }
 0xac4   :  { %v2567_v13 = vpack.c.bf16 %v2522_v62, %v2519_v24 }
 0xac6   :  { %v4104_v7 = vpop.f32.mrb[72].mxu0  ;;  %4114 = vmatprep.subr.bf16.mxu1 %v2567_v13 }
 0xac7   :  { %v2534_v8 = vpop.f32.mrb[73].mxu0  ;;  %4115 = vmatpush3.bf16.msra.mxu1 %v2567_v13  ;;  %v2543_v11 = vadd.f32 %v4104_v7, %v3391_v43  ;;  %v3569_v13 = vunpack.c.l.bf16 %v3620_v32 }
 0xac8   :  { %v4105_v35 = vpop.f32.mrb[74].mxu0  ;;  %4116 = vmatprep.subr.bf16.mxu1 %v2568_v2  ;;  %v2535_v51 = vadd.f32 %v3391_v43, %v2534_v8 }
 0xac9   :  { %v2546_v38 = vadd.f32 %v4105_v35, %v3391_v43  ;;  %v2537_v29 = vpop.f32.mrb[75].mxu0  ;;  %v3573_v35 = vunpack.c.l.bf16 %v3621_v60 }
 0xaca   :  { %v2538_v50 = vadd.f32 %v3391_v43, %v2537_v29 }
 0xacb   :  { %v2570_v37 = vpack.c.bf16 %v2546_v38, %v2543_v11  ;;  %4117 = vmatpush3.bf16.msra.mxu1 %v2568_v2  ;;  %v3570_v38 = vunpack.c.h.bf16 %v3620_v32 }
 0xacc   :  { %v2569_v49 = vpack.c.bf16 %v2538_v50, %v2535_v51 }
 0xace   :  { %v4108_v30 = vpop.f32.mrb[76].mxu0  ;;  %4118 = vmatprep.subr.bf16.mxu1 %v2569_v49 }
 0xacf   :  { %v2550_v23 = vpop.f32.mrb[77].mxu0  ;;  %4119 = vmatpush3.bf16.msra.mxu1 %v2569_v49  ;;  %v2559_v48 = vadd.f32 %v4108_v30, %v3391_v43  ;;  %v3574_v49 = vunpack.c.h.bf16 %v3621_v60 }
 0xad0   :  { %v4109_v12 = vpop.f32.mrb[78].mxu0  ;;  %4120 = vmatprep.subr.bf16.mxu1 %v2570_v37  ;;  %v2551_v39 = vadd.f32 %v3391_v43, %v2550_v23 }
 0xad1   :  { %v2562_v31 = vadd.f32 %v4109_v12, %v3391_v43  ;;  %v2553_v36 = vpop.f32.mrb[79].mxu0  ;;  %v3622_v12 = vld [vmem:[#allocation10 + $0x120] sm:$0xff]  }
 0xad2   :  { %v2554_v20 = vadd.f32 %v3391_v43, %v2553_v36  ;;  %v4333_v43 = vld [vmem:[#allocation7 + $0x38] sm:$0xff]  }
 0xad3   :  { %v2572_v14 = vpack.c.bf16 %v2562_v31, %v2559_v48  ;;  %4121 = vmatpush3.bf16.msra.mxu1 %v2570_v37 }
 0xad4   :  { %v2571_v57 = vpack.c.bf16 %v2554_v20, %v2551_v39  ;;  %v3623_v20 = vld [vmem:[#allocation10 + $0x128] sm:$0xff]  }
 0xad6   :  { %4122 = vmatprep.subr.bf16.mxu1 %v2571_v57 }
 0xad7   :  { %4123 = vmatpush3.bf16.msra.mxu1 %v2571_v57 }
 0xad8   :  { %4124 = vmatprep.subr.bf16.mxu1 %v2572_v14 }
 0xadb   :  { %4125 = vmatpush3.bf16.msra.mxu1 %v2572_v14 }
 0xadc   :  { %4162 = vmatprep.subr.bf16.mxu1 %v4555_v44 }
 0xade   :  { %4127 = vmatmul.mubr.bf16.vlgmr.msra.gmra.mrb[64].mxu1 %v4327_v22 }
 0xadf   :  { %4130 = vmatprep.mubr.bf16.mxu1 %v4328_v5  ;;  %v3577_v5 = vunpack.c.l.bf16 %v3622_v12 }
 0xae6   :  { %4131 = vmatmul.mubr.bf16.gmra.mrb[68].mxu1 %v4329_v21 }
 0xae7   :  { %4134 = vmatprep.mubr.bf16.mxu1 %v4330_v61 }
 0xaee   :  { %4135 = vmatmul.mubr.bf16.gmra.mrb[72].mxu1 %v4331_v18  ;;  %v3581_v18 = vunpack.c.l.bf16 %v3623_v20 }
 0xaef   :  { %4138 = vmatprep.mubr.bf16.mxu1 %v4332_v10 }
 0xaf6   :  { %4139 = vmatmul.mubr.bf16.gmra.mrb[76].mxu1 %v4333_v43  ;;  %v3578_v43 = vunpack.c.h.bf16 %v3622_v12 }
 0xaf7   :  { %4178 = vmatprep.mubr.msk.bf16.mxu1 %vm4556_vm0, %v4555_v44 }
 0xbb1   :  { %v4128_v40 = vpop.f32.mrb[64].mxu1 }
 0xbb2   :  { %v2640_v47 = vpop.f32.mrb[65].mxu1  ;;  %v5820_v56 = vadd.f32 %v4128_v40, %v3565_v15  ;;  %v3582_v40 = vunpack.c.h.bf16 %v3623_v20 }
 0xbb3   :  { %v5818_v28 = vadd.f32 %v3561_v3, %v2640_v47  ;;  %v4129_v16 = vpop.f32.mrb[66].mxu1 }
 0xbb4   :  { %v2643_v54 = vpop.f32.mrb[67].mxu1  ;;  %v5826_v62 = vadd.f32 %v4129_v16, %v3566_v53  ;;  %v2705_v7 = vmul.f32 %v4818_v52, %v5820_v56  ;;  %v3624_v53 = vld [vmem:[#allocation10 + $0x130] sm:$0xff]  }
 0xbb5   :  { %v5822_v9 = vadd.f32 %v3562_v6, %v2643_v54  ;;  %v2703_v24 = vmul.f32 %v4804_v45, %v5818_v28 }
 0xbb6   :  { %v2706_v51 = vmul.f32 %v4829_v58, %v5826_v62 }
 0xbb7   :  { %v2704_v2 = vmul.f32 %v4807_v46, %v5822_v9 }
 0xbb9   :  { %v2719_v8 = vadd.f32 %v2704_v2, %v2703_v24  ;;  %v4132_v11 = vpop.f32.mrb[68].mxu1  ;;  %v3625_v24 = vld [vmem:[#allocation10 + $0x138] sm:$0xff]  }
 0xbba   :  { %v2656_v29 = vpop.f32.mrb[69].mxu1  ;;  %v5836_v48 = vadd.f32 %v4132_v11, %v3573_v35  ;;  %v3590_v12 = vunpack.c.h.bf16 %v3625_v24 }
 0xbbb   :  { %v2720_v50 = vadd.f32 %v2719_v8, %v2705_v7  ;;  %v5834_v37 = vadd.f32 %v3569_v13, %v2656_v29  ;;  %v4133_v30 = vpop.f32.mrb[70].mxu1  ;;  %v3585_v8 = vunpack.c.l.bf16 %v3624_v53 }
 0xbbc   :  { %v2659_v23 = vpop.f32.mrb[71].mxu1  ;;  %v5842_v57 = vadd.f32 %v4133_v30, %v3574_v49  ;;  %v2709_v21 = vmul.f32 %v4858_v26, %v5836_v48 }
 0xbbd   :  { %v2707_v31 = vmul.f32 %v4837_v1, %v5834_v37  ;;  %v2721_v36 = vadd.f32 %v2720_v50, %v2706_v51  ;;  %v5840_v39 = vadd.f32 %v3570_v38, %v2659_v23  ;;  %v3589_v38 = vunpack.c.l.bf16 %v3625_v24 }
 0xbbe   :  { %v2710_v25 = vmul.f32 %v4869_v34, %v5842_v57  ;;  %v3586_v51 = vunpack.c.h.bf16 %v3624_v53 }
 0xbbf   :  { %v2722_v14 = vadd.f32 %v2721_v36, %v2707_v31  ;;  %v2708_v22 = vmul.f32 %v4846_v17, %v5840_v39 }
 0xbc1   :  { %v2723_v61 = vadd.f32 %v2722_v14, %v2708_v22  ;;  %v4136_v10 = vpop.f32.mrb[72].mxu1 }
 0xbc2   :  { %v2672_v0 = vpop.f32.mrb[73].mxu1  ;;  %v5852_v16 = vadd.f32 %v4136_v10, %v3581_v18 }
 0xbc3   :  { %v2724_v3 = vadd.f32 %v2723_v61, %v2709_v21  ;;  %v5850_v15 = vadd.f32 %v3577_v5, %v2672_v0  ;;  %v4137_v6 = vpop.f32.mrb[74].mxu1 }
 0xbc4   :  { %v2675_v47 = vpop.f32.mrb[75].mxu1  ;;  %v5858_v13 = vadd.f32 %v4137_v6, %v3582_v40  ;;  %v2713_v35 = vmul.f32 %v4896_v4, %v5852_v16  ;;  %v4286_v6 = vld [vmem:[#allocation12 + $0x8] sm:$0xff]  }
 0xbc5   :  { %v2711_v54 = vmul.f32 %v4877_v42, %v5850_v15  ;;  %v2725_v32 = vadd.f32 %v2724_v3, %v2710_v25  ;;  %v5856_v60 = vadd.f32 %v3578_v43, %v2675_v47  ;;  %v4285_v3 = vld [vmem:[#allocation12] sm:$0xff]  }
 0xbc6   :  { %v2714_v49 = vmul.f32 %v4904_v19, %v5858_v13  ;;  %4163 = vmatpush3.bf16.msra.mxu1 %v4285_v3 }
 0xbc7   :  { %v2726_v2 = vadd.f32 %v2725_v32, %v2711_v54  ;;  %v2712_v7 = vmul.f32 %v4886_v59, %v5856_v60  ;;  %4164 = vmatprep.subr.bf16.mxu1 %v4555_v44  ;;  %v4287_v54 = vld [vmem:[#allocation12 + $0x10] sm:$0xff]  }
 0xbc9   :  { %v2727_v11 = vadd.f32 %v2726_v2, %v2712_v7  ;;  %v4140_v29 = vpop.f32.mrb[76].mxu1  ;;  %v4288_v2 = vld [vmem:[#allocation12 + $0x18] sm:$0xff]  }
 0xbca   :  { %v2688_v50 = vpop.f32.mrb[77].mxu1  ;;  %v2697_v20 = vadd.f32 %v4140_v29, %v3589_v38  ;;  %4165 = vmatpush3.bf16.msra.mxu1 %v4286_v6 }
 0xbcb   :  { %v2728_v30 = vadd.f32 %v2727_v11, %v2713_v35  ;;  %v2689_v23 = vadd.f32 %v3585_v8, %v2688_v50  ;;  %v4141_v31 = vpop.f32.mrb[78].mxu1  ;;  %4166 = vmatprep.subr.bf16.mxu1 %v4555_v44  ;;  %v4289_v35 = vld [vmem:[#allocation12 + $0x20] sm:$0xff]  }
 0xbcc   :  { %v2691_v36 = vpop.f32.mrb[79].mxu1  ;;  %v2700_v61 = vadd.f32 %v4141_v31, %v3590_v12  ;;  %v2717_v10 = vmul.f32 %v4921_v55, %v2697_v20 }
 0xbcd   :  { %v2715_v14 = vmul.f32 %v4912_v33, %v2689_v23  ;;  %v2729_v22 = vadd.f32 %v2728_v30, %v2714_v49  ;;  %v2692_v5 = vadd.f32 %v3586_v51, %v2691_v36  ;;  %v4290_v49 = vld [vmem:[#allocation12 + $0x28] sm:$0xff]  }
 0xbce   :  { %v2718_v0 = vmul.f32 %v4925_v63, %v2700_v61  ;;  %4167 = vmatpush3.bf16.msra.mxu1 %v4287_v54 }
 0xbcf   :  { %v2730_v21 = vadd.f32 %v2729_v22, %v2715_v14  ;;  %v2716_v18 = vmul.f32 %v4917_v41, %v2692_v5  ;;  %4168 = vmatprep.subr.bf16.mxu1 %v4555_v44 }
 0xbd1   :  { %v2731_v43 = vadd.f32 %v2730_v21, %v2716_v18 }
 0xbd2   :  { %4169 = vmatpush3.bf16.msra.mxu1 %v4288_v2 }
 0xbd3   :  { %v2732_v25 = vadd.f32 %v2731_v43, %v2717_v10  ;;  %4170 = vmatprep.subr.bf16.mxu1 %v4555_v44 }
 0xbd5   :  { %v2733_v40 = vadd.f32 %v2732_v25, %v2718_v0 }
 0xbd6   :  { %4171 = vmatpush3.bf16.msra.mxu1 %v4289_v35 }
 0xbd7   :  { %v2734_v47 = vrot.slane %v2733_v40, 4  ;;  %4172 = vmatprep.subr.bf16.mxu1 %v4555_v44 }
 0xbd9   :  { %v2735_v53 = vadd.f32 %v2734_v47, %v2733_v40 }
 0xbda   :  { %4173 = vmatpush3.bf16.msra.mxu1 %v4290_v49 }
 0xbdb   :  { %v2736_v32 = vrot.slane %v2735_v53, 2  ;;  %4174 = vmatprep.subr.bf16.mxu1 %v4555_v44 }
 0xbdd   :  { %v2737_v24 = vadd.f32 %v2736_v32, %v2735_v53 }
 0xbdf   :  { %v2738_v7 = vrot.slane %v2737_v24, 1 }
 0xbe1   :  { %v2739_v8 = vadd.f32 %v2738_v7, %v2737_v24 }
 0xbe3   :  { %v2740_v11 = vmul.f32 %v2739_v8, %v4932_v27 }
 0xbe5   :  { %v5880_v38 = vsub.f32 %v5818_v28, %v2740_v11  ;;  %v5883_v29 = vsub.f32 %v5822_v9, %v2740_v11  ;;  %v5886_v51 = vsub.f32 %v5820_v56, %v2740_v11  ;;  %v5889_v50 = vsub.f32 %v5826_v62, %v2740_v11 }
 0xbe6   :  { %v5892_v30 = vsub.f32 %v5834_v37, %v2740_v11  ;;  %v5895_v12 = vsub.f32 %v5840_v39, %v2740_v11  ;;  %v5898_v28 = vsub.f32 %v5836_v48, %v2740_v11  ;;  %v5901_v9 = vsub.f32 %v5842_v57, %v2740_v11 }
 0xbe7   :  { %v5905_v56 = vsub.f32 %v5850_v15, %v2740_v11  ;;  %v5908_v62 = vsub.f32 %v5856_v60, %v2740_v11  ;;  %v5911_v37 = vsub.f32 %v5852_v16, %v2740_v11  ;;  %v5914_v39 = vsub.f32 %v5858_v13, %v2740_v11  ;;  %v4291_v16 = vld [vmem:[#allocation12 + $0x30] sm:$0xff]  }
 0xbe8   :  { %v5916_v31 = vsub.f32 %v2689_v23, %v2740_v11  ;;  %v5918_v48 = vsub.f32 %v2692_v5, %v2740_v11  ;;  %v5920_v57 = vsub.f32 %v2697_v20, %v2740_v11  ;;  %v5922_v36 = vsub.f32 %v2700_v61, %v2740_v11  ;;  %4175 = vmatpush3.bf16.msra.mxu1 %v4291_v16 }
 0xbe9   :  { %v2757_v15 = vmul.f32 %v5880_v38, %v5880_v38  ;;  %v2758_v60 = vmul.f32 %v5883_v29, %v5883_v29  ;;  %v2759_v13 = vmul.f32 %v5886_v51, %v5886_v51  ;;  %4176 = vmatprep.subr.bf16.mxu1 %v4555_v44  ;;  %v2760_v14 = vmul.f32 %v5889_v50, %v5889_v50 }
 0xbea   :  { %v2761_v22 = vmul.f32 %v5892_v30, %v5892_v30  ;;  %v2762_v61 = vmul.f32 %v5895_v12, %v5895_v12  ;;  %v2763_v43 = vmul.f32 %v5898_v28, %v5898_v28  ;;  %v2764_v3 = vmul.f32 %v5901_v9, %v5901_v9 }
 0xbeb   :  { %v2773_v23 = vmul.f32 %v4804_v45, %v2757_v15  ;;  %v2774_v20 = vmul.f32 %v4807_v46, %v2758_v60  ;;  %v2775_v5 = vmul.f32 %v4818_v52, %v2759_v13  ;;  %v2776_v18 = vmul.f32 %v4829_v58, %v2760_v14 }
 0xbec   :  { %v2777_v0 = vmul.f32 %v4837_v1, %v2761_v22  ;;  %v2778_v40 = vmul.f32 %v4846_v17, %v2762_v61  ;;  %v2765_v47 = vmul.f32 %v5905_v56, %v5905_v56  ;;  %v2779_v53 = vmul.f32 %v4858_v26, %v2763_v43 }
 0xbed   :  { %v2789_v21 = vadd.f32 %v2774_v20, %v2773_v23  ;;  %v2766_v32 = vmul.f32 %v5908_v62, %v5908_v62  ;;  %v2780_v24 = vmul.f32 %v4869_v34, %v2764_v3  ;;  %v2767_v7 = vmul.f32 %v5911_v37, %v5911_v37 }
 0xbee   :  { %v2781_v8 = vmul.f32 %v4877_v42, %v2765_v47  ;;  %v2768_v11 = vmul.f32 %v5914_v39, %v5914_v39  ;;  %v2769_v60 = vmul.f32 %v5916_v31, %v5916_v31  ;;  %v2770_v23 = vmul.f32 %v5918_v48, %v5918_v48 }
 0xbef   :  { %v2790_v10 = vadd.f32 %v2789_v21, %v2775_v5  ;;  %v2782_v49 = vmul.f32 %v4886_v59, %v2766_v32  ;;  %v2783_v16 = vmul.f32 %v4896_v4, %v2767_v7  ;;  %v2771_v22 = vmul.f32 %v5920_v57, %v5920_v57 }
 0xbf0   :  { %v2784_v20 = vmul.f32 %v4904_v19, %v2768_v11  ;;  %v2785_v5 = vmul.f32 %v4912_v33, %v2769_v60  ;;  %v2772_v61 = vmul.f32 %v5922_v36, %v5922_v36 }
 0xbf1   :  { %v2791_v25 = vadd.f32 %v2790_v10, %v2776_v18  ;;  %v2786_v18 = vmul.f32 %v4917_v41, %v2770_v23  ;;  %v2787_v43 = vmul.f32 %v4921_v55, %v2771_v22 }
 0xbf3   :  { %v2792_v6 = vadd.f32 %v2791_v25, %v2777_v0  ;;  %v2788_v25 = vmul.f32 %v4925_v63, %v2772_v61 }
 0xbf5   :  { %v2793_v54 = vadd.f32 %v2792_v6, %v2778_v40 }
 0xbf7   :  { %v2794_v2 = vadd.f32 %v2793_v54, %v2779_v53 }
 0xbf9   :  { %v2795_v35 = vadd.f32 %v2794_v2, %v2780_v24 }
 0xbfb   :  { %v2796_v15 = vadd.f32 %v2795_v35, %v2781_v8  ;;  %v5978_v35 = vld [vmem:[%s6118_s6 + $0x4] ss:$0 sm:$0xff] }
 0xbfd   :  { %v2797_v13 = vadd.f32 %v2796_v15, %v2782_v49 }
 0xbff   :  { %v2798_v14 = vadd.f32 %v2797_v13, %v2783_v16 }
 0xc01   :  { %v2799_v21 = vadd.f32 %v2798_v14, %v2784_v20 }
 0xc03   :  { %v2800_v10 = vadd.f32 %v2799_v21, %v2785_v5 }
 0xc05   :  { %v2801_v0 = vadd.f32 %v2800_v10, %v2786_v18 }
 0xc07   :  { %v2802_v3 = vadd.f32 %v2801_v0, %v2787_v43 }
 0xc09   :  { %v2803_v40 = vadd.f32 %v2802_v3, %v2788_v25 }
 0xc0b   :  { %v2804_v6 = vrot.slane %v2803_v40, 4 }
 0xc0d   :  { %v2805_v47 = vadd.f32 %v2804_v6, %v2803_v40 }
 0xc0f   :  { %v2806_v53 = vrot.slane %v2805_v47, 2 }
 0xc11   :  { %v2807_v54 = vadd.f32 %v2806_v53, %v2805_v47 }
 0xc13   :  { %v2808_v32 = vrot.slane %v2807_v54, 1 }
 0xc15   :  { %v2809_v24 = vadd.f32 %v2808_v32, %v2807_v54 }
 0xc17   :  { %v2810_v2 = vmul.f32 %v2809_v24, %v4932_v27  ;;  %v5987_v27 = vld [vmem:[%s6119_s7 + $0x4] ss:$0 sm:$0xff] }
 0xc19   :  { %v2811_v7 = vadd.f32 1e-05, %v2810_v2 }
 0xc1b   :  { %4317 = vrsqrt.f32 %v2811_v7 }
 0xc25   :  { %v4318_v8 = vpop.eup %4317 }
 0xc26   :  { %v2826_v11 = vmul.f32 %v4318_v8, %v5918_v48  ;;  %v2813_v49 = vmul.f32 %v4318_v8, %v5880_v38  ;;  %v2814_v15 = vmul.f32 %v4318_v8, %v5883_v29  ;;  %v2815_v60 = vmul.f32 %v4318_v8, %v5886_v51 }
 0xc27   :  { %v2816_v16 = vmul.f32 %v4318_v8, %v5889_v50  ;;  %v2817_v13 = vmul.f32 %v4318_v8, %v5892_v30  ;;  %v2818_v23 = vmul.f32 %v4318_v8, %v5895_v12  ;;  %v2819_v20 = vmul.f32 %v4318_v8, %v5898_v28 }
 0xc28   :  { %v2850_v48 = vmul.f32 %v5978_v35, %v2826_v11  ;;  %v2837_v38 = vmul.f32 %v5978_v35, %v2813_v49  ;;  %v2838_v29 = vmul.f32 %v5978_v35, %v2814_v15  ;;  %v2839_v51 = vmul.f32 %v5978_v35, %v2815_v60 }
 0xc29   :  { %v2840_v14 = vmul.f32 %v5978_v35, %v2816_v16  ;;  %v2841_v22 = vmul.f32 %v5978_v35, %v2817_v13  ;;  %v2842_v50 = vmul.f32 %v5978_v35, %v2818_v23  ;;  %v2820_v30 = vmul.f32 %v4318_v8, %v5901_v9 }
 0xc2a   :  { %v2874_v12 = vadd.f32 %v5987_v27, %v2850_v48  ;;  %v2861_v28 = vadd.f32 %v5987_v27, %v2837_v38  ;;  %v2862_v5 = vadd.f32 %v5987_v27, %v2838_v29  ;;  %v2863_v21 = vadd.f32 %v5987_v27, %v2839_v51 }
 0xc2b   :  { %v2864_v61 = vadd.f32 %v5987_v27, %v2840_v14  ;;  %v2865_v18 = vadd.f32 %v5987_v27, %v2841_v22  ;;  %v2866_v10 = vadd.f32 %v5987_v27, %v2842_v50  ;;  %v2843_v43 = vmul.f32 %v5978_v35, %v2819_v20 }
 0xc2c   :  { %v2877_v0 = vmul.f32 %v4804_v45, %v2861_v28  ;;  %v2878_v9 = vmul.f32 %v4807_v46, %v2862_v5  ;;  %v2879_v25 = vmul.f32 %v4818_v52, %v2863_v21  ;;  %v2844_v3 = vmul.f32 %v5978_v35, %v2820_v30  ;;  %v4297_v30 = vld [vmem:[#allocation13 + $0x20] sm:$0xff]   ;;  %v4299_v28 = vld [vmem:[#allocation13 + $0x30] sm:$0xff]  }
 0xc2d   :  { %v2880_v40 = vmul.f32 %v4829_v58, %v2864_v61  ;;  %v2881_v6 = vmul.f32 %v4837_v1, %v2865_v18  ;;  %v2882_v47 = vmul.f32 %v4846_v17, %v2866_v10  ;;  %v2867_v53 = vadd.f32 %v5987_v27, %v2843_v43  ;;  %v4300_v43 = vld [vmem:[#allocation13 + $0x38] sm:$0xff]  }
 0xc2e   :  { %v2894_v54 = vpack.c.bf16 %v2878_v9, %v2877_v0  ;;  %v2868_v32 = vadd.f32 %v5987_v27, %v2844_v3  ;;  %v2821_v24 = vmul.f32 %v4318_v8, %v5905_v56  ;;  %v2822_v45 = vmul.f32 %v4318_v8, %v5908_v62  ;;  %v4301_v0 = vld [vmem:[#allocation15] sm:$0xff]   ;;  %v4302_v9 = vld [vmem:[#allocation15 + $0x8] sm:$0xff]   ;;  %v4304_v3 = vld [vmem:[#allocation15 + $0x18] sm:$0xff]  }
 0xc2f   :  { %v2895_v46 = vpack.c.bf16 %v2880_v40, %v2879_v25  ;;  %v2896_v2 = vpack.c.bf16 %v2882_v47, %v2881_v6  ;;  %v2883_v52 = vmul.f32 %v4858_v26, %v2867_v53  ;;  %v2823_v7 = vmul.f32 %v4318_v8, %v5911_v37  ;;  %v4303_v25 = vld [vmem:[#allocation15 + $0x10] sm:$0xff]   ;;  %v4305_v40 = vld [vmem:[#allocation15 + $0x20] sm:$0xff]   ;;  %v4306_v6 = vld [vmem:[#allocation15 + $0x28] sm:$0xff]  }
 0xc30   :  { %4143 = vmatpush3.bf16.msra.mxu0 %v2894_v54  ;;  %v2884_v58 = vmul.f32 %v4869_v34, %v2868_v32  ;;  %v2845_v1 = vmul.f32 %v5978_v35, %v2821_v24  ;;  %v2846_v17 = vmul.f32 %v5978_v35, %v2822_v45  ;;  %v2824_v11 = vmul.f32 %v4318_v8, %v5914_v39  ;;  %v3404_v47 = vld [vmem:[%s6123_s11] ss:$0 sm:$0xff]  ;;  %s4557_s11 = smov [#allocation16]  }
 0xc31   :  { %4144 = vmatprep.subr.bf16.mxu0 %v4555_v44  ;;  %v2847_v56 = vmul.f32 %v5978_v35, %v2823_v7  ;;  %v2825_v62 = vmul.f32 %v4318_v8, %v5916_v31  ;;  %v2827_v49 = vmul.f32 %v4318_v8, %v5920_v57  ;;  %v2828_v39 = vmul.f32 %v4318_v8, %v5922_v36  ;;  %v3413_v7 = vld [vmem:[%s6125_s13] ss:$0 sm:$0xff]  ;;  %s3287_s26 = sshll.u32 %s4557_s11, 4  ;;  %s3288_s26 = int_to_ptr.vmem [resolvable:$true] %s3287_s26 }
 0xc32   :  { %v2897_v26 = vpack.c.bf16 %v2884_v58, %v2883_v52  ;;  %v2869_v37 = vadd.f32 %v5987_v27, %v2845_v1  ;;  %v2870_v15 = vadd.f32 %v5987_v27, %v2846_v17  ;;  %v2848_v34 = vmul.f32 %v5978_v35, %v2824_v11  ;;  %v4308_v52 = vld [vmem:[#allocation15 + $0x38] sm:$0xff]   ;;  %s4488_s2 = scalar_lea.vmem %s3288_s26, 128  ;;  %p4493_p1 = scmp.lt.s32.totalorder %s3288_s26, %s3288_s26 }
 0xc33   :  { %v2871_v60 = vadd.f32 %v5987_v27, %v2847_v56  ;;  %v2849_v16 = vmul.f32 %v5978_v35, %v2825_v62  ;;  %v2851_v13 = vmul.f32 %v5978_v35, %v2827_v49  ;;  %v2890_v20 = vmul.f32 %v4917_v41, %v2874_v12  ;;  %v4298_v12 = vld [vmem:[#allocation13 + $0x28] sm:$0xff]   ;;  %p4489_p0 = scmp.ne.s32.totalorder %s3288_s26, %s4488_s2  ;;  %p4494_p2 = scmp.lt.s32.totalorder %s4488_s2, %s4488_s2 }
 0xc34   :  { %4145 = vmatpush3.bf16.msra.mxu0 %v2895_v46  ;;  %v2885_v31 = vmul.f32 %v4877_v42, %v2869_v37  ;;  %v2886_v57 = vmul.f32 %v4886_v59, %v2870_v15  ;;  %v2872_v23 = vadd.f32 %v5987_v27, %v2848_v34  ;;  %v2852_v29 = vmul.f32 %v5978_v35, %v2828_v39  ;;  %v4295_v35 = vld [vmem:[#allocation13 + $0x10] sm:$0xff]  }
 0xc35   :  { %4146 = vmatprep.subr.bf16.mxu0 %v4555_v44  ;;  %v2887_v48 = vmul.f32 %v4896_v4, %v2871_v60  ;;  %v2873_v38 = vadd.f32 %v5987_v27, %v2849_v16  ;;  %v2875_v36 = vadd.f32 %v5987_v27, %v2851_v13  ;;  %p4495_p3 = por %p4494_p2, %p4493_p1 }
 0xc36   :  { %v2898_v8 = vpack.c.bf16 %v2886_v57, %v2885_v31  ;;  %v2888_v51 = vmul.f32 %v4904_v19, %v2872_v23  ;;  %v2876_v59 = vadd.f32 %v5987_v27, %v2852_v29  ;;  %v2893_v19 = vld [vmem:[%s6121_s9] sm:$0xf]  ;;  %v4296_v27 = vld [vmem:[#allocation13 + $0x18] sm:$0xff]  }
 0xc37   :  { %v2889_v42 = vmul.f32 %v4912_v33, %v2873_v38  ;;  %v2891_v14 = vmul.f32 %v4921_v55, %v2875_v36  ;;  %v4292_v33 = vld [vmem:[#allocation12 + $0x38] sm:$0xff]   ;;  %v4293_v55 = vld [vmem:[#allocation13] sm:$0xff]   ;;  %p4496_p4 = pnand %p4495_p3, %p4489_p0 }
 0xc38   :  { %4147 = vmatpush3.bf16.msra.mxu0 %v2896_v2  ;;  %v2899_v41 = vpack.c.bf16 %v2888_v51, %v2887_v48  ;;  %v2892_v22 = vmul.f32 %v4925_v63, %v2876_v59  ;;  %4177 = vmatpush3.bf16.msra.mxu1 %v4292_v33  ;;  %v4294_v63 = vld [vmem:[#allocation13 + $0x8] sm:$0xff]   ;;  %v4307_v2 = vld [vmem:[#allocation15 + $0x30] sm:$0xff]  }
 0xc39   :  { %4148 = vmatprep.subr.bf16.mxu0 %v4555_v44  ;;  %v2900_v4 = vpack.c.bf16 %v2890_v20, %v2889_v42  ;;  %4202 = vmatprep.subr.bf16.mxu1 %v4555_v44 }
 0xc3a   :  { %v2901_v50 = vpack.c.bf16 %v2892_v22, %v2891_v14 }
 0xc3c   :  { %4149 = vmatpush3.bf16.msra.mxu0 %v2897_v26 }
 0xc3d   :  { %4150 = vmatprep.subr.bf16.mxu0 %v4555_v44 }
 0xc40   :  { %4151 = vmatpush3.bf16.msra.mxu0 %v2898_v8 }
 0xc41   :  { %4152 = vmatprep.subr.bf16.mxu0 %v4555_v44 }
 0xc44   :  { %4153 = vmatpush3.bf16.msra.mxu0 %v2899_v41 }
 0xc45   :  { %4154 = vmatprep.subr.bf16.mxu0 %v4555_v44 }
 0xc48   :  { %4155 = vmatpush3.bf16.msra.mxu0 %v2900_v4 }
 0xc49   :  { %4156 = vmatprep.subr.bf16.mxu0 %v4555_v44 }
 0xc4c   :  { %4157 = vmatpush3.bf16.msra.mxu0 %v2901_v50 }
 0xc4d   :  { %4182 = vmatprep.subr.bf16.mxu0 %v4555_v44 }
 0xc4f   :  { %4159 = vmatmul.mubr.bf16.vlgmr.msra.gmra.mrb[80].mxu0 %v2893_v19 }
 0xc50   :  { %4198 = vmatprep.mubr.msk.bf16.mxu0 %vm4556_vm0, %v4555_v44  ;;  %4183 = vmatpush3.bf16.msra.mxu0 %v4293_v55 }
 0xc51   :  { %4184 = vmatprep.subr.bf16.mxu0 %v4555_v44 }
 0xc54   :  { %4185 = vmatpush3.bf16.msra.mxu0 %v4294_v63 }
 0xc55   :  { %4186 = vmatprep.subr.bf16.mxu0 %v4555_v44 }
 0xc58   :  { %4187 = vmatpush3.bf16.msra.mxu0 %v4295_v35 }
 0xc59   :  { %4188 = vmatprep.subr.bf16.mxu0 %v4555_v44 }
 0xc5c   :  { %4189 = vmatpush3.bf16.msra.mxu0 %v4296_v27 }
 0xc5d   :  { %4190 = vmatprep.subr.bf16.mxu0 %v4555_v44 }
 0xc60   :  { %4191 = vmatpush3.bf16.msra.mxu0 %v4297_v30 }
 0xc61   :  { %4192 = vmatprep.subr.bf16.mxu0 %v4555_v44 }
 0xc64   :  { %4193 = vmatpush3.bf16.msra.mxu0 %v4298_v12 }
 0xc65   :  { %4194 = vmatprep.subr.bf16.mxu0 %v4555_v44 }
 0xc68   :  { %4195 = vmatpush3.bf16.msra.mxu0 %v4299_v28 }
 0xc69   :  { %4196 = vmatprep.subr.bf16.mxu0 %v4555_v44 }
 0xc6c   :  { %4197 = vmatpush3.bf16.msra.mxu0 %v4300_v43 }
 0xd22   :  { %v2936_v5 = vpop.f32.mrb[80].mxu0 }
 0xd23   :  { %v2942_v21 = vpack.c.bf16 %v2936_v5, %v2936_v5  ;;  %v4160_v61 = vpop.f32.mrb[81].mxu0 }
 0xd24   :  { %v2939_v18 = vpop.f32.mrb[82].mxu0 }
 0xd25   :  { %v4161_v10 = vpop.f32.mrb[83].mxu0  ;;  %4179 = vmatmul.mubr.bf16.vlgmr.msra.gmra.mrb[80].mxu1 %v2942_v21 }
 0xd26   :  { %4218 = vmatprep.mubr.msk.bf16.mxu1 %vm4556_vm0, %v4555_v44  ;;  %4203 = vmatpush3.bf16.msra.mxu1 %v4301_v0 }
 0xd27   :  { %4204 = vmatprep.subr.bf16.mxu1 %v4555_v44 }
 0xd2a   :  { %4205 = vmatpush3.bf16.msra.mxu1 %v4302_v9 }
 0xd2b   :  { %4206 = vmatprep.subr.bf16.mxu1 %v4555_v44 }
 0xd2e   :  { %4207 = vmatpush3.bf16.msra.mxu1 %v4303_v25 }
 0xd2f   :  { %4208 = vmatprep.subr.bf16.mxu1 %v4555_v44 }
 0xd32   :  { %4209 = vmatpush3.bf16.msra.mxu1 %v4304_v3 }
 0xd33   :  { %4210 = vmatprep.subr.bf16.mxu1 %v4555_v44 }
 0xd36   :  { %4211 = vmatpush3.bf16.msra.mxu1 %v4305_v40 }
 0xd37   :  { %4212 = vmatprep.subr.bf16.mxu1 %v4555_v44 }
 0xd3a   :  { %4213 = vmatpush3.bf16.msra.mxu1 %v4306_v6 }
 0xd3b   :  { %4214 = vmatprep.subr.bf16.mxu1 %v4555_v44 }
 0xd3e   :  { %4215 = vmatpush3.bf16.msra.mxu1 %v4307_v2 }
 0xd3f   :  { %4216 = vmatprep.subr.bf16.mxu1 %v4555_v44 }
 0xd42   :  { %4217 = vmatpush3.bf16.msra.mxu1 %v4308_v52 }
 0xdf8   :  { %v3048_v53 = vpop.f32.mrb[80].mxu1 }
 0xdf9   :  { %v3049_v54 = vadd.f32 %v3404_v47, %v3048_v53  ;;  %v4180_v32 = vpop.f32.mrb[81].mxu1 }
 0xdfa   :  { %v3051_v24 = vpop.f32.mrb[82].mxu1 }
 0xdfb   :  { %v3055_v45 = vpack.c.bf16 %v3049_v54, %v3049_v54  ;;  %3054 = vst [vmem:[#allocation16] sm:$0xff] %v3049_v54  ;;  %v4181_v46 = vpop.f32.mrb[83].mxu1 }
 0xdfd   :  { %4199 = vmatmul.mubr.bf16.vlgmr.msra.gmra.mrb[84].mxu0 %v3055_v45 }
 0xed0   :  { %v3161_v58 = vpop.f32.mrb[84].mxu0 }
 0xed1   :  { %v3162_v1 = vadd.f32 %v3413_v7, %v3161_v58  ;;  %v4200_v17 = vpop.f32.mrb[85].mxu0 }
 0xed2   :  { %v3164_v11 = vpop.f32.mrb[86].mxu0 }
 0xed3   :  { %v3167_v56 = vmax.f32 %v3162_v1, 0.0  ;;  %v4201_v62 = vpop.f32.mrb[87].mxu0 }
 0xed5   :  { %v3168_v49 = vpack.c.bf16 %v3167_v56, %v3167_v56 }
 0xed7   :  { %4219 = vmatmul.mubr.bf16.vlgmr.msra.gmra.mrb[84].mxu1 %v3168_v49 }
 0xed8   :  { %4499 = shalt.err (!%p4496_p4)
}
 0xed9   :  { %s4500_s28 = scalar_lea.hbm %s6128_s16, 128 }
 0xeda   :  { %p4501_p5 = scmp.ne.s32.totalorder %s6128_s16, %s4500_s28  ;;  %p4504_p6 = scmp.lt.u32.totalorder %s4500_s28, %s6128_s16 }
 0xedc   :  { %p4506_p7 = pnand %p4504_p6, %p4501_p5 }
 0xede   :  { %4509 = shalt.err (!%p4506_p7)
}
 0xedf   :  { %3290 = dma.vmem_to_hbm [thread:$0]  %s3288_s26, 128, %s6128_s16, [#allocation6]   ;;  %v3422_v44 = vld [vmem:[%s6127_s15] ss:$0 sm:$0xff] }
 0xee0   :  { %s4558_s0 = smov [#allocation17]  }
 0xee1   :  { %s3297_s30 = sshll.u32 %s4558_s0, 4  ;;  %s3298_s30 = int_to_ptr.vmem [resolvable:$true] %s3297_s30 }
 0xee2   :  { %s4510_s24 = scalar_lea.vmem %s3298_s30, 128  ;;  %p4515_p9 = scmp.lt.s32.totalorder %s3298_s30, %s3298_s30 }
 0xee3   :  { %p4511_p8 = scmp.ne.s32.totalorder %s3298_s30, %s4510_s24  ;;  %p4516_p10 = scmp.lt.s32.totalorder %s4510_s24, %s4510_s24 }
 0xee5   :  { %p4517_p11 = por %p4516_p10, %p4515_p9 }
 0xee7   :  { %p4518_p12 = pnand %p4517_p11, %p4511_p8 }
 0xfaa   :  { %v3274_v26 = vpop.f32.mrb[84].mxu1 }
 0xfab   :  { %v3275_v37 = vadd.f32 %v3422_v44, %v3274_v26  ;;  %v4220_v15 = vpop.f32.mrb[85].mxu1 }
 0xfac   :  { %v3277_v34 = vpop.f32.mrb[86].mxu1 }
 0xfad   :  { %3280 = vst [vmem:[#allocation17] sm:$0xff] %v3275_v37  ;;  %v4221_v60 = vpop.f32.mrb[87].mxu1 }
 0xfae   :  { %4521 = shalt.err (!%p4518_p12)
}
 0xfaf   :  { %s6136_s25 = sld [smem:[#allocation27_spill]] }
 0xfb5   :  { %s4522_s15 = scalar_lea.hbm %s6136_s25, 128 }
 0xfb6   :  { %p4523_p13 = scmp.ne.s32.totalorder %s6136_s25, %s4522_s15  ;;  %p4526_p0 = scmp.lt.u32.totalorder %s4522_s15, %s6136_s25 }
 0xfb8   :  { %p4528_p1 = pnand %p4526_p0, %p4523_p13 }
 0xfba   :  { %4531 = shalt.err (!%p4528_p1)
}
 0xfbb   :  { %3300 = dma.vmem_to_hbm [thread:$0]  %s3298_s30, 128, %s6136_s25, [#allocation18]  }
 0xfbc   :  { %4540 = dma.done.wait [#allocation6], 128  }
 0xfbd   :  { %4541 = vsyncadd [#allocation6], 4294967168 }
 0xfbe   :  { %4542 = dma.done.wait [#allocation18], 128  }
 0xfbf   :  { %4543 = vsyncadd [#allocation18], 4294967168 }
 0xfc0   :  { %3307 = vsyncpa [#allocation5], 1 }
 0xfc1   :  { %3308 = vsyncpa [#allocation8], 1 }
 0xfc2   :  { %3309 = vsyncpa [#allocation11], 1 }
 0xfc3   :  { %3310 = vsyncpa [#allocation14], 1 }
 0xfc4   :  { %3311 = vsyncpa [#allocation6], 1 }
 0xfc5   :  { %3312 = vsyncpa [#allocation18], 1 }

</bundles_post_ra>
